<compile_context>
chip_gen: v6e
topology: v6e:2x2x1
jax: 0.10.0
libtpu: 0.0.40
codegen_flags: <defaults>
</compile_context>

<pallas_src>
import jax
import jax.numpy as jnp
from jax import lax
from jax.experimental import pallas as pl
from jax.experimental.pallas import tpu as pltpu


# ----------------------------------------------------------------------------- host-side weight fusion
def _fuse_bidir_weight(wf, wb, hd):
    """[df,3hd],[db,3hd] -> [df+db, 6hd]; per-gate block-diagonal, gate order r_f,r_b,z_f,z_b,n_f,n_b."""
    df, db = wf.shape[0], wb.shape[0]
    zf = jnp.zeros((df, hd), wf.dtype)
    zb = jnp.zeros((db, hd), wb.dtype)
    cols = []
    for g in range(3):
        f_g = wf[:, g * hd:(g + 1) * hd]
        b_g = wb[:, g * hd:(g + 1) * hd]
        cols.append(jnp.concatenate([f_g, zb], axis=0))
        cols.append(jnp.concatenate([zf, b_g], axis=0))
    return jnp.concatenate(cols, axis=1)


def _fuse_bidir_bias(bf, bb, hd):
    """[1,3hd],[1,3hd] -> [1,6hd] with gate order r_f,r_b,z_f,z_b,n_f,n_b."""
    cols = []
    for g in range(3):
        cols.append(bf[:, g * hd:(g + 1) * hd])
        cols.append(bb[:, g * hd:(g + 1) * hd])
    return jnp.concatenate(cols, axis=1)


def _fold_rz_bias(bih, bhh, hd):
    """Fold the recurrent r/z biases into the input-side bias (n-gate b_hh stays separate)."""
    return jnp.concatenate([bih[:, :2 * hd] + bhh[:, :2 * hd], bih[:, 2 * hd:3 * hd]], axis=1)


# ----------------------------------------------------------------------------- kernel
def make_segmenter_kernel(T, H, HD, num_steps):
    HE = 2 * HD  # fused encoder hidden (== H)

    def kernel(breaks_ref,                          # SMEM [num_steps+1] int32 (scalar prefetch)
               wecat_ref,                           # [T, 2H]   : [we[t] || we[T-1-t]]
               wih_ref, bih_ref,                    # [2H, 6HD], [1, 6HD]  fused enc input proj (+ folded r/z b_hh)
               whh_ref, bhhn_enc_ref,               # [2HD,6HD], [1, HE]   fused enc recurrence, n-gate b_hh only
               wihd_ref, bihd_ref,                  # [H, 3H],  [1, 3H]    decoder input proj (+ folded r/z b_hh)
               whhd_ref, bhhn_dec_ref,              # [H, 3H],  [1, H]     decoder recurrence, n-gate b_hh only
               loss_ref,                            # [1, 1] output
               xg_ref, raw_ref, gi_all_ref):        # VMEM scratch: [T,6HD], [T,H], [T,3H]
        # One MXU pass for both directions' input-to-gate projections (biases pre-folded).
        xg_ref[...] = jnp.dot(wecat_ref[...], wih_ref[...],
                              preferred_element_type=jnp.float32) + bih_ref[...]

        # Loop-invariant operands loaded ONCE into vregs (ref reads are not CSE'd).
        whh = whh_ref[...]
        bhhn_enc = bhhn_enc_ref[...]

        # ------------------------------------------------ fused bidirectional encoder recurrence
        def enc_body(t, h):
            gi = xg_ref[pl.ds(t, 1), :]                                   # [1, 6HD]
            gh = jnp.dot(h, whh, preferred_element_type=jnp.float32)      # [1, 6HD], no bias add
            r = jax.nn.sigmoid(gi[:, 0:HE] + gh[:, 0:HE])
            z = jax.nn.sigmoid(gi[:, HE:2 * HE] + gh[:, HE:2 * HE])
            n = jnp.tanh(gi[:, 2 * HE:3 * HE] + r * (gh[:, 2 * HE:3 * HE] + bhhn_enc))
            h_new = (1.0 - z) * n + z * h                                 # [h_fwd || h_bwd]
            raw_ref[pl.ds(t, 1), :] = h_new                               # ONE contiguous row store
            return h_new

        lax.fori_loop(0, T, enc_body, jnp.zeros((1, HE), jnp.float32), unroll=True)

        # ------------------------------------------------ single post-loop reorder
        # fwd half stays row-aligned; bwd half at loop step t belongs to time T-1-t.
        raw = raw_ref[...]                                                # [T, H]
        ri = lax.broadcasted_iota(jnp.int32, (T, T), 0)
        ci = lax.broadcasted_iota(jnp.int32, (T, T), 1)
        rev = jnp.where(ri + ci == T - 1, 1.0, 0.0)                       # row-reversal matrix
        # TODO(synk): at production T replace this TxT matmul with lax.rev / strided DMA.
        bwd_rev = jnp.dot(rev, raw[:, HD:HE], preferred_element_type=jnp.float32)
        outall = jnp.concatenate([raw[:, 0:HD], bwd_rev], axis=1)         # [T, H] value
        out_t = outall.T                                                  # [H, T], transposed ONCE

        # Decoder input-side gate projection for ALL rows in one batched MXU pass.
        gi_all_ref[...] = jnp.dot(outall, wihd_ref[...],
                                  preferred_element_type=jnp.float32) + bihd_ref[...]

        whhd = whhd_ref[...]
        bhhn_dec = bhhn_dec_ref[...]
        h_dec0 = outall[T - 1:T, :]                                       # outputs[-1], [1, H]
        pos = lax.broadcasted_iota(jnp.int32, (1, T), 1)                  # lane-major positions

        # ------------------------------------------------ pointer decoder
        def dec_body(step, carry):
            h_dec, total = carry
            start = breaks_ref[step]
            target = breaks_ref[step + 1]
            gi = gi_all_ref[pl.ds(start, 1), :]                           # [1, 3H] gathered row
            gh = jnp.dot(h_dec, whhd, preferred_element_type=jnp.float32) # [1, 3H]
            r = jax.nn.sigmoid(gi[:, 0:H] + gh[:, 0:H])
            z = jax.nn.sigmoid(gi[:, H:2 * H] + gh[:, H:2 * H])
            n = jnp.tanh(gi[:, 2 * H:3 * H] + r * (gh[:, 2 * H:3 * H] + bhhn_dec))
            h_new = (1.0 - z) * n + z * h_dec                             # [1, H]
            # PointerAtten 'Dotproduct': lane-major [1, T] scores (operand hoisted out of loop).
            logits = jnp.dot(h_new, out_t, preferred_element_type=jnp.float32) + 1e-6
            masked = jnp.where(pos >= start, logits, -1e30)
            m = jnp.max(masked, axis=1, keepdims=True)                    # [1, 1]
            lse = m + jnp.log(jnp.sum(jnp.exp(masked - m), axis=1, keepdims=True))
            tgt = jnp.sum(jnp.where(pos == target, logits, 0.0), axis=1, keepdims=True)
            # NLLLoss(log_softmax(scores)[target - start]) == lse - logits[target]
            return h_new, total + (lse - tgt)

        _, total = lax.fori_loop(0, num_steps, dec_body,
                                 (h_dec0, jnp.zeros((1, 1), jnp.float32)),
                                 unroll=True)
        loss_ref[...] = total

    return kernel


# ----------------------------------------------------------------------------- wrapper
def pointer_segmenter_train_loss(word_embeddings, params, edu_breaks):
    """Pallas implementation of PointerSegmenter.train_segment_loss."""
    (wihf, whhf, bihf, bhhf,
     wihb, whhb, bihb, bhhb,
     wihd, whhd, bihd, bhhd) = params
    T, H = word_embeddings.shape
    HD = H // 2

    # Fused encoder weights (per-gate block-diagonal, gate order r_f,r_b,z_f,z_b,n_f,n_b).
    wih_big = _fuse_bidir_weight(wihf, wihb, HD)                      # [2H, 6HD]
    bih_big = _fuse_bidir_bias(_fold_rz_bias(bihf, bhhf, HD),
                               _fold_rz_bias(bihb, bhhb, HD), HD)     # [1, 6HD]  (r/z b_hh folded in)
    whh_big = _fuse_bidir_weight(whhf, whhb, HD)                      # [2HD, 6HD]
    bhhn_enc = jnp.concatenate([bhhf[:, 2 * HD:3 * HD],
                                bhhb[:, 2 * HD:3 * HD]], axis=1)      # [1, 2HD]  n-gate b_hh only
    # Decoder: r/z recurrent biases folded into the input-side bias (applied in gi_all).
    bihd_f = _fold_rz_bias(bihd, bhhd, H)                             # [1, 3H]
    bhhn_dec = bhhd[:, 2 * H:3 * H]                                   # [1, H]

    # Row t carries the fwd input at t and the bwd input at T-1-t.
    # TODO(synk): at production T split this into two [T,H]x[H,3HD] matmuls (no 2x duplication).
    we_cat = jnp.concatenate([word_embeddings, word_embeddings[::-1]], axis=1)   # [T, 2H]

    breaks = jnp.asarray([0] + list(edu_breaks), dtype=jnp.int32)
    num_steps = len(edu_breaks)
    kernel = make_segmenter_kernel(T, H, HD, num_steps)

    dense_inputs = (we_cat, wih_big, bih_big, whh_big, bhhn_enc,
                    wihd, bihd_f, whhd, bhhn_dec)

    flops = int(
        2 * T * (2 * H) * (6 * HD)                     # fused encoder input projection
        + T * 2 * (2 * HD) * (6 * HD)                  # encoder recurrence matmuls
        + 2 * T * T * HD                               # backward-half row reverse
        + 2 * T * H * (3 * H)                          # decoder gi_all batched projection
        + num_steps * (2 * H * (3 * H) + 2 * H * T)    # decoder recurrence + pointer scores
        + 12 * T * (2 * HD) + 12 * num_steps * H       # elementwise gate math (rough)
    )
    transcendentals = int(3 * T * (2 * HD) + num_steps * (3 * H + T + 1))
    bytes_accessed = int(sum(4 * a.size for a in dense_inputs) + 4 * breaks.size + 4)

    grid_spec = pltpu.PrefetchScalarGridSpec(
        num_scalar_prefetch=1,
        grid=(1,),
        in_specs=[pl.BlockSpec(a.shape, lambda i, b: (0, 0)) for a in dense_inputs],
        out_specs=pl.BlockSpec((1, 1), lambda i, b: (0, 0)),
        scratch_shapes=[
            pltpu.VMEM((T, 6 * HD), jnp.float32),   # fused encoder input-gate projections
            pltpu.VMEM((T, H), jnp.float32),        # raw fused encoder outputs (pre-reorder)
            pltpu.VMEM((T, 3 * H), jnp.float32),    # precomputed decoder input gates
        ],
    )
    loss = pl.pallas_call(
        kernel,
        out_shape=jax.ShapeDtypeStruct((1, 1), jnp.float32),
        grid_spec=grid_spec,
        compiler_params=pltpu.CompilerParams(dimension_semantics=("arbitrary",)),
        cost_estimate=pl.CostEstimate(flops=flops, transcendentals=transcendentals,
                                      bytes_accessed=bytes_accessed),
    )(breaks, *dense_inputs)
    return loss[0, 0]


# ----------------------------------------------------------------------------- pure-JAX reference
def ref_train_segment_loss(we, params, edu_breaks):
    """Pure-JAX reference matching the PyTorch semantics."""
    (wihf, whhf, bihf, bhhf, wihb, whhb, bihb, bhhb,
     wihd, whhd, bihd, bhhd) = params
    T, H = we.shape
    HD = H // 2

    def cell(h, x, wih, whh, bih, bhh):
        hd = whh.shape[0]
        gi = x @ wih + bih[0]
        gh = h @ whh + bhh[0]
        r = jax.nn.sigmoid(gi[:hd] + gh[:hd])
        z = jax.nn.sigmoid(gi[hd:2 * hd] + gh[hd:2 * hd])
        n = jnp.tanh(gi[2 * hd:] + r * gh[2 * hd:])
        return (1.0 - z) * n + z * h

    hf = jnp.zeros((HD,), jnp.float32)
    outs_f = []
    for t in range(T):
        hf = cell(hf, we[t], wihf, whhf, bihf, bhhf)
        outs_f.append(hf)
    hb = jnp.zeros((HD,), jnp.float32)
    outs_b = [None] * T
    for t in range(T - 1, -1, -1):
        hb = cell(hb, we[t], wihb, whhb, bihb, bhhb)
        outs_b[t] = hb
    outs = jnp.stack([jnp.concatenate([outs_f[t], outs_b[t]]) for t in range(T)])

    h_dec = outs[-1]
    breaks = [0] + list(edu_breaks)
    total = jnp.float32(0.0)
    for step in range(len(breaks) - 1):
        start = breaks[step]
        tgt = breaks[step + 1]
        h_dec = cell(h_dec, outs[start], wihd, whhd, bihd, bhhd)
        scores = outs[start:] @ h_dec + 1e-6
        log_w = jax.nn.log_softmax(scores)
        total = total - log_w[tgt - start]
    return total


if __name__ == "__main__":
    T, H = 16, 32            # seq_len, hidden_size
    HD = H // 2              # per-direction encoder hidden
    key = jax.random.PRNGKey(0)
    keys = jax.random.split(key, 13)

    def init(k, shape):
        return jax.random.normal(k, shape, dtype=jnp.float32) * 0.1

    word_embeddings = init(keys[0], (T, H))
    params = (
        # forward encoder GRU: W_ih^T [H, 3*HD], W_hh^T [HD, 3*HD], b_ih, b_hh
        init(keys[1], (H, 3 * HD)), init(keys[2], (HD, 3 * HD)),
        init(keys[3], (1, 3 * HD)), init(keys[4], (1, 3 * HD)),
        # backward encoder GRU
        init(keys[5], (H, 3 * HD)), init(keys[6], (HD, 3 * HD)),
        init(keys[7], (1, 3 * HD)), init(keys[8], (1, 3 * HD)),
        # decoder GRU (decoder_input_size = hidden_size)
        init(keys[9], (H, 3 * H)), init(keys[10], (H, 3 * H)),
        init(keys[11], (1, 3 * H)), init(keys[12], (1, 3 * H)),
    )
    edu_breaks = [4, 9, 15]

    loss = pointer_segmenter_train_loss(word_embeddings, params, edu_breaks)
    loss = jax.block_until_ready(loss)

    ref = ref_train_segment_loss(word_embeddings, params, edu_breaks)
    assert jnp.allclose(loss, ref, rtol=1e-3, atol=1e-3), (float(loss), float(ref))
    print("KERNEL_OK")
</pallas_src>

<mosaic_0001>
module attributes {stable_mosaic.version = 11 : i64} {
  func.func @kernel(%arg0: i32, %arg1: memref<4xi32, #tpu.memory_space<smem>>, %arg2: memref<16x64xf32, #tpu.memory_space<vmem>>, %arg3: memref<64x96xf32, #tpu.memory_space<vmem>>, %arg4: memref<1x96xf32, #tpu.memory_space<vmem>>, %arg5: memref<32x96xf32, #tpu.memory_space<vmem>>, %arg6: memref<1x32xf32, #tpu.memory_space<vmem>>, %arg7: memref<32x96xf32, #tpu.memory_space<vmem>>, %arg8: memref<1x96xf32, #tpu.memory_space<vmem>>, %arg9: memref<32x96xf32, #tpu.memory_space<vmem>>, %arg10: memref<1x32xf32, #tpu.memory_space<vmem>>, %arg11: memref<1x1xf32, #tpu.memory_space<vmem>>, %arg12: memref<16x96xf32, #tpu.memory_space<vmem>>, %arg13: memref<16x32xf32, #tpu.memory_space<vmem>>, %arg14: memref<16x96xf32, #tpu.memory_space<vmem>>) attributes {dimension_semantics = [#tpu.dimension_semantics<arbitrary>], iteration_bounds = array<i64: 1>, scalar_prefetch = 1 : i64, scratch_operands = 3 : i64, tpu.core_type = #tpu.core_type<tc>, window_params = [{pipeline_mode = #tpu.pipeline_mode<synchronous>, transform_indices = @transform_0, window_bounds = array<i64: 16, 64>}, {pipeline_mode = #tpu.pipeline_mode<synchronous>, transform_indices = @transform_1, window_bounds = array<i64: 64, 96>}, {pipeline_mode = #tpu.pipeline_mode<synchronous>, transform_indices = @transform_2, window_bounds = array<i64: 1, 96>}, {pipeline_mode = #tpu.pipeline_mode<synchronous>, transform_indices = @transform_3, window_bounds = array<i64: 32, 96>}, {pipeline_mode = #tpu.pipeline_mode<synchronous>, transform_indices = @transform_4, window_bounds = array<i64: 1, 32>}, {pipeline_mode = #tpu.pipeline_mode<synchronous>, transform_indices = @transform_5, window_bounds = array<i64: 32, 96>}, {pipeline_mode = #tpu.pipeline_mode<synchronous>, transform_indices = @transform_6, window_bounds = array<i64: 1, 96>}, {pipeline_mode = #tpu.pipeline_mode<synchronous>, transform_indices = @transform_7, window_bounds = array<i64: 32, 96>}, {pipeline_mode = #tpu.pipeline_mode<synchronous>, transform_indices = @transform_8, window_bounds = array<i64: 1, 32>}, {pipeline_mode = #tpu.pipeline_mode<synchronous>, transform_indices = @transform_9, window_bounds = array<i64: 1, 1>}]} {
    %c0 = arith.constant 0 : index
    %c0_0 = arith.constant 0 : index
    %0 = vector.load %arg2[%c0, %c0_0] : memref<16x64xf32, #tpu.memory_space<vmem>>, vector<16x64xf32>
    %c0_1 = arith.constant 0 : index
    %c0_2 = arith.constant 0 : index
    %1 = vector.load %arg3[%c0_1, %c0_2] : memref<64x96xf32, #tpu.memory_space<vmem>>, vector<64x96xf32>
    %cst = arith.constant dense<0.000000e+00> : vector<16x96xf32>
    %2 = tpu.matmul %0, %1, %cst {dimension_numbers = #tpu.dot_dimension_numbers<[1], [0], [0], [1], [0, 0, 1, 1], [], []>} : vector<16x64xf32>, vector<64x96xf32>, vector<16x96xf32> -> vector<16x96xf32>
    %c0_3 = arith.constant 0 : index
    %c0_4 = arith.constant 0 : index
    %3 = vector.load %arg4[%c0_3, %c0_4] : memref<1x96xf32, #tpu.memory_space<vmem>>, vector<1x96xf32>
    %4 = vector.broadcast %3 : vector<1x96xf32> to vector<16x96xf32>
    %5 = arith.addf %2, %4 : vector<16x96xf32>
    %c0_5 = arith.constant 0 : index
    %c0_6 = arith.constant 0 : index
    %6 = vector.load %arg12[%c0_5, %c0_6] : memref<16x96xf32, #tpu.memory_space<vmem>>, vector<16x96xf32>
    tpu.vector_store %arg12[%c0_5, %c0_6], %5 {strides = array<i32>} : memref<16x96xf32, #tpu.memory_space<vmem>>, vector<16x96xf32>,
    %c0_7 = arith.constant 0 : index
    %c0_8 = arith.constant 0 : index
    %7 = vector.load %arg5[%c0_7, %c0_8] : memref<32x96xf32, #tpu.memory_space<vmem>>, vector<32x96xf32>
    %c0_9 = arith.constant 0 : index
    %c0_10 = arith.constant 0 : index
    %8 = vector.load %arg6[%c0_9, %c0_10] : memref<1x32xf32, #tpu.memory_space<vmem>>, vector<1x32xf32>
    %cst_11 = arith.constant 0.000000e+00 : f32
    %9 = vector.broadcast %cst_11 : f32 to vector<1x32xf32>
    %c0_i32 = arith.constant 0 : i32
    %10 = arith.index_cast %c0_i32 : i32 to index
    %c0_12 = arith.constant 0 : index
    %11 = vector.load %arg12[%10, %c0_12] : memref<16x96xf32, #tpu.memory_space<vmem>>, vector<1x96xf32>
    %cst_13 = arith.constant dense<0.000000e+00> : vector<1x96xf32>
    %12 = tpu.matmul %9, %7, %cst_13 {dimension_numbers = #tpu.dot_dimension_numbers<[1], [0], [0], [1], [0, 0, 1, 1], [], []>} : vector<1x32xf32>, vector<32x96xf32>, vector<1x96xf32> -> vector<1x96xf32>
    %13 = vector.extract_strided_slice %11 {offsets = [0, 0], sizes = [1, 32], strides = [1, 1]} : vector<1x96xf32> to vector<1x32xf32>
    %14 = vector.extract_strided_slice %12 {offsets = [0, 0], sizes = [1, 32], strides = [1, 1]} : vector<1x96xf32> to vector<1x32xf32>
    %15 = arith.addf %13, %14 : vector<1x32xf32>
    %16 = arith.negf %15 : vector<1x32xf32>
    %17 = math.exp %16 : vector<1x32xf32>
    %cst_14 = arith.constant 1.000000e+00 : f32
    %18 = vector.broadcast %cst_14 : f32 to vector<1x32xf32>
    %19 = arith.addf %18, %17 : vector<1x32xf32>
    %20 = arith.divf %18, %19 : vector<1x32xf32>
    %21 = vector.extract_strided_slice %11 {offsets = [0, 32], sizes = [1, 32], strides = [1, 1]} : vector<1x96xf32> to vector<1x32xf32>
    %22 = vector.extract_strided_slice %12 {offsets = [0, 32], sizes = [1, 32], strides = [1, 1]} : vector<1x96xf32> to vector<1x32xf32>
    %23 = arith.addf %21, %22 : vector<1x32xf32>
    %24 = arith.negf %23 : vector<1x32xf32>
    %25 = math.exp %24 : vector<1x32xf32>
    %cst_15 = arith.constant 1.000000e+00 : f32
    %26 = vector.broadcast %cst_15 : f32 to vector<1x32xf32>
    %27 = arith.addf %26, %25 : vector<1x32xf32>
    %28 = arith.divf %26, %27 : vector<1x32xf32>
    %29 = vector.extract_strided_slice %11 {offsets = [0, 64], sizes = [1, 32], strides = [1, 1]} : vector<1x96xf32> to vector<1x32xf32>
    %30 = vector.extract_strided_slice %12 {offsets = [0, 64], sizes = [1, 32], strides = [1, 1]} : vector<1x96xf32> to vector<1x32xf32>
    %31 = arith.addf %30, %8 : vector<1x32xf32>
    %32 = arith.mulf %20, %31 : vector<1x32xf32>
    %33 = arith.addf %29, %32 : vector<1x32xf32>
    %34 = math.tanh %33 : vector<1x32xf32>
    %cst_16 = arith.constant 1.000000e+00 : f32
    %35 = vector.broadcast %cst_16 : f32 to vector<1x32xf32>
    %36 = arith.subf %35, %28 : vector<1x32xf32>
    %37 = arith.mulf %36, %34 : vector<1x32xf32>
    %38 = arith.mulf %28, %9 : vector<1x32xf32>
    %39 = arith.addf %37, %38 : vector<1x32xf32>
    %40 = arith.index_cast %c0_i32 : i32 to index
    %c0_17 = arith.constant 0 : index
    %41 = vector.load %arg13[%40, %c0_17] : memref<16x32xf32, #tpu.memory_space<vmem>>, vector<1x32xf32>
    tpu.vector_store %arg13[%40, %c0_17], %39 {strides = array<i32>} : memref<16x32xf32, #tpu.memory_space<vmem>>, vector<1x32xf32>,
    %c1_i32 = arith.constant 1 : i32
    %42 = arith.index_cast %c1_i32 : i32 to index
    %c0_18 = arith.constant 0 : index
    %43 = vector.load %arg12[%42, %c0_18] : memref<16x96xf32, #tpu.memory_space<vmem>>, vector<1x96xf32>
    %cst_19 = arith.constant dense<0.000000e+00> : vector<1x96xf32>
    %44 = tpu.matmul %39, %7, %cst_19 {dimension_numbers = #tpu.dot_dimension_numbers<[1], [0], [0], [1], [0, 0, 1, 1], [], []>} : vector<1x32xf32>, vector<32x96xf32>, vector<1x96xf32> -> vector<1x96xf32>
    %45 = vector.extract_strided_slice %43 {offsets = [0, 0], sizes = [1, 32], strides = [1, 1]} : vector<1x96xf32> to vector<1x32xf32>
    %46 = vector.extract_strided_slice %44 {offsets = [0, 0], sizes = [1, 32], strides = [1, 1]} : vector<1x96xf32> to vector<1x32xf32>
    %47 = arith.addf %45, %46 : vector<1x32xf32>
    %48 = arith.negf %47 : vector<1x32xf32>
    %49 = math.exp %48 : vector<1x32xf32>
    %cst_20 = arith.constant 1.000000e+00 : f32
    %50 = vector.broadcast %cst_20 : f32 to vector<1x32xf32>
    %51 = arith.addf %50, %49 : vector<1x32xf32>
    %52 = arith.divf %50, %51 : vector<1x32xf32>
    %53 = vector.extract_strided_slice %43 {offsets = [0, 32], sizes = [1, 32], strides = [1, 1]} : vector<1x96xf32> to vector<1x32xf32>
    %54 = vector.extract_strided_slice %44 {offsets = [0, 32], sizes = [1, 32], strides = [1, 1]} : vector<1x96xf32> to vector<1x32xf32>
    %55 = arith.addf %53, %54 : vector<1x32xf32>
    %56 = arith.negf %55 : vector<1x32xf32>
    %57 = math.exp %56 : vector<1x32xf32>
    %cst_21 = arith.constant 1.000000e+00 : f32
    %58 = vector.broadcast %cst_21 : f32 to vector<1x32xf32>
    %59 = arith.addf %58, %57 : vector<1x32xf32>
    %60 = arith.divf %58, %59 : vector<1x32xf32>
    %61 = vector.extract_strided_slice %43 {offsets = [0, 64], sizes = [1, 32], strides = [1, 1]} : vector<1x96xf32> to vector<1x32xf32>
    %62 = vector.extract_strided_slice %44 {offsets = [0, 64], sizes = [1, 32], strides = [1, 1]} : vector<1x96xf32> to vector<1x32xf32>
    %63 = arith.addf %62, %8 : vector<1x32xf32>
    %64 = arith.mulf %52, %63 : vector<1x32xf32>
    %65 = arith.addf %61, %64 : vector<1x32xf32>
    %66 = math.tanh %65 : vector<1x32xf32>
    %cst_22 = arith.constant 1.000000e+00 : f32
    %67 = vector.broadcast %cst_22 : f32 to vector<1x32xf32>
    %68 = arith.subf %67, %60 : vector<1x32xf32>
    %69 = arith.mulf %68, %66 : vector<1x32xf32>
    %70 = arith.mulf %60, %39 : vector<1x32xf32>
    %71 = arith.addf %69, %70 : vector<1x32xf32>
    %72 = arith.index_cast %c1_i32 : i32 to index
    %c0_23 = arith.constant 0 : index
    %73 = vector.load %arg13[%72, %c0_23] : memref<16x32xf32, #tpu.memory_space<vmem>>, vector<1x32xf32>
    tpu.vector_store %arg13[%72, %c0_23], %71 {strides = array<i32>} : memref<16x32xf32, #tpu.memory_space<vmem>>, vector<1x32xf32>,
    %c2_i32 = arith.constant 2 : i32
    %74 = arith.index_cast %c2_i32 : i32 to index
    %c0_24 = arith.constant 0 : index
    %75 = vector.load %arg12[%74, %c0_24] : memref<16x96xf32, #tpu.memory_space<vmem>>, vector<1x96xf32>
    %cst_25 = arith.constant dense<0.000000e+00> : vector<1x96xf32>
    %76 = tpu.matmul %71, %7, %cst_25 {dimension_numbers = #tpu.dot_dimension_numbers<[1], [0], [0], [1], [0, 0, 1, 1], [], []>} : vector<1x32xf32>, vector<32x96xf32>, vector<1x96xf32> -> vector<1x96xf32>
    %77 = vector.extract_strided_slice %75 {offsets = [0, 0], sizes = [1, 32], strides = [1, 1]} : vector<1x96xf32> to vector<1x32xf32>
    %78 = vector.extract_strided_slice %76 {offsets = [0, 0], sizes = [1, 32], strides = [1, 1]} : vector<1x96xf32> to vector<1x32xf32>
    %79 = arith.addf %77, %78 : vector<1x32xf32>
    %80 = arith.negf %79 : vector<1x32xf32>
    %81 = math.exp %80 : vector<1x32xf32>
    %cst_26 = arith.constant 1.000000e+00 : f32
    %82 = vector.broadcast %cst_26 : f32 to vector<1x32xf32>
    %83 = arith.addf %82, %81 : vector<1x32xf32>
    %84 = arith.divf %82, %83 : vector<1x32xf32>
    %85 = vector.extract_strided_slice %75 {offsets = [0, 32], sizes = [1, 32], strides = [1, 1]} : vector<1x96xf32> to vector<1x32xf32>
    %86 = vector.extract_strided_slice %76 {offsets = [0, 32], sizes = [1, 32], strides = [1, 1]} : vector<1x96xf32> to vector<1x32xf32>
    %87 = arith.addf %85, %86 : vector<1x32xf32>
    %88 = arith.negf %87 : vector<1x32xf32>
    %89 = math.exp %88 : vector<1x32xf32>
    %cst_27 = arith.constant 1.000000e+00 : f32
    %90 = vector.broadcast %cst_27 : f32 to vector<1x32xf32>
    %91 = arith.addf %90, %89 : vector<1x32xf32>
    %92 = arith.divf %90, %91 : vector<1x32xf32>
    %93 = vector.extract_strided_slice %75 {offsets = [0, 64], sizes = [1, 32], strides = [1, 1]} : vector<1x96xf32> to vector<1x32xf32>
    %94 = vector.extract_strided_slice %76 {offsets = [0, 64], sizes = [1, 32], strides = [1, 1]} : vector<1x96xf32> to vector<1x32xf32>
    %95 = arith.addf %94, %8 : vector<1x32xf32>
    %96 = arith.mulf %84, %95 : vector<1x32xf32>
    %97 = arith.addf %93, %96 : vector<1x32xf32>
    %98 = math.tanh %97 : vector<1x32xf32>
    %cst_28 = arith.constant 1.000000e+00 : f32
    %99 = vector.broadcast %cst_28 : f32 to vector<1x32xf32>
    %100 = arith.subf %99, %92 : vector<1x32xf32>
    %101 = arith.mulf %100, %98 : vector<1x32xf32>
    %102 = arith.mulf %92, %71 : vector<1x32xf32>
    %103 = arith.addf %101, %102 : vector<1x32xf32>
    %104 = arith.index_cast %c2_i32 : i32 to index
    %c0_29 = arith.constant 0 : index
    %105 = vector.load %arg13[%104, %c0_29] : memref<16x32xf32, #tpu.memory_space<vmem>>, vector<1x32xf32>
    tpu.vector_store %arg13[%104, %c0_29], %103 {strides = array<i32>} : memref<16x32xf32, #tpu.memory_space<vmem>>, vector<1x32xf32>,
    %c3_i32 = arith.constant 3 : i32
    %106 = arith.index_cast %c3_i32 : i32 to index
    %c0_30 = arith.constant 0 : index
    %107 = vector.load %arg12[%106, %c0_30] : memref<16x96xf32, #tpu.memory_space<vmem>>, vector<1x96xf32>
    %cst_31 = arith.constant dense<0.000000e+00> : vector<1x96xf32>
    %108 = tpu.matmul %103, %7, %cst_31 {dimension_numbers = #tpu.dot_dimension_numbers<[1], [0], [0], [1], [0, 0, 1, 1], [], []>} : vector<1x32xf32>, vector<32x96xf32>, vector<1x96xf32> -> vector<1x96xf32>
    %109 = vector.extract_strided_slice %107 {offsets = [0, 0], sizes = [1, 32], strides = [1, 1]} : vector<1x96xf32> to vector<1x32xf32>
    %110 = vector.extract_strided_slice %108 {offsets = [0, 0], sizes = [1, 32], strides = [1, 1]} : vector<1x96xf32> to vector<1x32xf32>
    %111 = arith.addf %109, %110 : vector<1x32xf32>
    %112 = arith.negf %111 : vector<1x32xf32>
    %113 = math.exp %112 : vector<1x32xf32>
    %cst_32 = arith.constant 1.000000e+00 : f32
    %114 = vector.broadcast %cst_32 : f32 to vector<1x32xf32>
    %115 = arith.addf %114, %113 : vector<1x32xf32>
    %116 = arith.divf %114, %115 : vector<1x32xf32>
    %117 = vector.extract_strided_slice %107 {offsets = [0, 32], sizes = [1, 32], strides = [1, 1]} : vector<1x96xf32> to vector<1x32xf32>
    %118 = vector.extract_strided_slice %108 {offsets = [0, 32], sizes = [1, 32], strides = [1, 1]} : vector<1x96xf32> to vector<1x32xf32>
    %119 = arith.addf %117, %118 : vector<1x32xf32>
    %120 = arith.negf %119 : vector<1x32xf32>
    %121 = math.exp %120 : vector<1x32xf32>
    %cst_33 = arith.constant 1.000000e+00 : f32
    %122 = vector.broadcast %cst_33 : f32 to vector<1x32xf32>
    %123 = arith.addf %122, %121 : vector<1x32xf32>
    %124 = arith.divf %122, %123 : vector<1x32xf32>
    %125 = vector.extract_strided_slice %107 {offsets = [0, 64], sizes = [1, 32], strides = [1, 1]} : vector<1x96xf32> to vector<1x32xf32>
    %126 = vector.extract_strided_slice %108 {offsets = [0, 64], sizes = [1, 32], strides = [1, 1]} : vector<1x96xf32> to vector<1x32xf32>
    %127 = arith.addf %126, %8 : vector<1x32xf32>
    %128 = arith.mulf %116, %127 : vector<1x32xf32>
    %129 = arith.addf %125, %128 : vector<1x32xf32>
    %130 = math.tanh %129 : vector<1x32xf32>
    %cst_34 = arith.constant 1.000000e+00 : f32
    %131 = vector.broadcast %cst_34 : f32 to vector<1x32xf32>
    %132 = arith.subf %131, %124 : vector<1x32xf32>
    %133 = arith.mulf %132, %130 : vector<1x32xf32>
    %134 = arith.mulf %124, %103 : vector<1x32xf32>
    %135 = arith.addf %133, %134 : vector<1x32xf32>
    %136 = arith.index_cast %c3_i32 : i32 to index
    %c0_35 = arith.constant 0 : index
    %137 = vector.load %arg13[%136, %c0_35] : memref<16x32xf32, #tpu.memory_space<vmem>>, vector<1x32xf32>
    tpu.vector_store %arg13[%136, %c0_35], %135 {strides = array<i32>} : memref<16x32xf32, #tpu.memory_space<vmem>>, vector<1x32xf32>,
    %c4_i32 = arith.constant 4 : i32
    %138 = arith.index_cast %c4_i32 : i32 to index
    %c0_36 = arith.constant 0 : index
    %139 = vector.load %arg12[%138, %c0_36] : memref<16x96xf32, #tpu.memory_space<vmem>>, vector<1x96xf32>
    %cst_37 = arith.constant dense<0.000000e+00> : vector<1x96xf32>
    %140 = tpu.matmul %135, %7, %cst_37 {dimension_numbers = #tpu.dot_dimension_numbers<[1], [0], [0], [1], [0, 0, 1, 1], [], []>} : vector<1x32xf32>, vector<32x96xf32>, vector<1x96xf32> -> vector<1x96xf32>
    %141 = vector.extract_strided_slice %139 {offsets = [0, 0], sizes = [1, 32], strides = [1, 1]} : vector<1x96xf32> to vector<1x32xf32>
    %142 = vector.extract_strided_slice %140 {offsets = [0, 0], sizes = [1, 32], strides = [1, 1]} : vector<1x96xf32> to vector<1x32xf32>
    %143 = arith.addf %141, %142 : vector<1x32xf32>
    %144 = arith.negf %143 : vector<1x32xf32>
    %145 = math.exp %144 : vector<1x32xf32>
    %cst_38 = arith.constant 1.000000e+00 : f32
    %146 = vector.broadcast %cst_38 : f32 to vector<1x32xf32>
    %147 = arith.addf %146, %145 : vector<1x32xf32>
    %148 = arith.divf %146, %147 : vector<1x32xf32>
    %149 = vector.extract_strided_slice %139 {offsets = [0, 32], sizes = [1, 32], strides = [1, 1]} : vector<1x96xf32> to vector<1x32xf32>
    %150 = vector.extract_strided_slice %140 {offsets = [0, 32], sizes = [1, 32], strides = [1, 1]} : vector<1x96xf32> to vector<1x32xf32>
    %151 = arith.addf %149, %150 : vector<1x32xf32>
    %152 = arith.negf %151 : vector<1x32xf32>
    %153 = math.exp %152 : vector<1x32xf32>
    %cst_39 = arith.constant 1.000000e+00 : f32
    %154 = vector.broadcast %cst_39 : f32 to vector<1x32xf32>
    %155 = arith.addf %154, %153 : vector<1x32xf32>
    %156 = arith.divf %154, %155 : vector<1x32xf32>
    %157 = vector.extract_strided_slice %139 {offsets = [0, 64], sizes = [1, 32], strides = [1, 1]} : vector<1x96xf32> to vector<1x32xf32>
    %158 = vector.extract_strided_slice %140 {offsets = [0, 64], sizes = [1, 32], strides = [1, 1]} : vector<1x96xf32> to vector<1x32xf32>
    %159 = arith.addf %158, %8 : vector<1x32xf32>
    %160 = arith.mulf %148, %159 : vector<1x32xf32>
    %161 = arith.addf %157, %160 : vector<1x32xf32>
    %162 = math.tanh %161 : vector<1x32xf32>
    %cst_40 = arith.constant 1.000000e+00 : f32
    %163 = vector.broadcast %cst_40 : f32 to vector<1x32xf32>
    %164 = arith.subf %163, %156 : vector<1x32xf32>
    %165 = arith.mulf %164, %162 : vector<1x32xf32>
    %166 = arith.mulf %156, %135 : vector<1x32xf32>
    %167 = arith.addf %165, %166 : vector<1x32xf32>
    %168 = arith.index_cast %c4_i32 : i32 to index
    %c0_41 = arith.constant 0 : index
    %169 = vector.load %arg13[%168, %c0_41] : memref<16x32xf32, #tpu.memory_space<vmem>>, vector<1x32xf32>
    tpu.vector_store %arg13[%168, %c0_41], %167 {strides = array<i32>} : memref<16x32xf32, #tpu.memory_space<vmem>>, vector<1x32xf32>,
    %c5_i32 = arith.constant 5 : i32
    %170 = arith.index_cast %c5_i32 : i32 to index
    %c0_42 = arith.constant 0 : index
    %171 = vector.load %arg12[%170, %c0_42] : memref<16x96xf32, #tpu.memory_space<vmem>>, vector<1x96xf32>
    %cst_43 = arith.constant dense<0.000000e+00> : vector<1x96xf32>
    %172 = tpu.matmul %167, %7, %cst_43 {dimension_numbers = #tpu.dot_dimension_numbers<[1], [0], [0], [1], [0, 0, 1, 1], [], []>} : vector<1x32xf32>, vector<32x96xf32>, vector<1x96xf32> -> vector<1x96xf32>
    %173 = vector.extract_strided_slice %171 {offsets = [0, 0], sizes = [1, 32], strides = [1, 1]} : vector<1x96xf32> to vector<1x32xf32>
    %174 = vector.extract_strided_slice %172 {offsets = [0, 0], sizes = [1, 32], strides = [1, 1]} : vector<1x96xf32> to vector<1x32xf32>
    %175 = arith.addf %173, %174 : vector<1x32xf32>
    %176 = arith.negf %175 : vector<1x32xf32>
    %177 = math.exp %176 : vector<1x32xf32>
    %cst_44 = arith.constant 1.000000e+00 : f32
    %178 = vector.broadcast %cst_44 : f32 to vector<1x32xf32>
    %179 = arith.addf %178, %177 : vector<1x32xf32>
    %180 = arith.divf %178, %179 : vector<1x32xf32>
    %181 = vector.extract_strided_slice %171 {offsets = [0, 32], sizes = [1, 32], strides = [1, 1]} : vector<1x96xf32> to vector<1x32xf32>
    %182 = vector.extract_strided_slice %172 {offsets = [0, 32], sizes = [1, 32], strides = [1, 1]} : vector<1x96xf32> to vector<1x32xf32>
    %183 = arith.addf %181, %182 : vector<1x32xf32>
    %184 = arith.negf %183 : vector<1x32xf32>
    %185 = math.exp %184 : vector<1x32xf32>
    %cst_45 = arith.constant 1.000000e+00 : f32
    %186 = vector.broadcast %cst_45 : f32 to vector<1x32xf32>
    %187 = arith.addf %186, %185 : vector<1x32xf32>
    %188 = arith.divf %186, %187 : vector<1x32xf32>
    %189 = vector.extract_strided_slice %171 {offsets = [0, 64], sizes = [1, 32], strides = [1, 1]} : vector<1x96xf32> to vector<1x32xf32>
    %190 = vector.extract_strided_slice %172 {offsets = [0, 64], sizes = [1, 32], strides = [1, 1]} : vector<1x96xf32> to vector<1x32xf32>
    %191 = arith.addf %190, %8 : vector<1x32xf32>
    %192 = arith.mulf %180, %191 : vector<1x32xf32>
    %193 = arith.addf %189, %192 : vector<1x32xf32>
    %194 = math.tanh %193 : vector<1x32xf32>
    %cst_46 = arith.constant 1.000000e+00 : f32
    %195 = vector.broadcast %cst_46 : f32 to vector<1x32xf32>
    %196 = arith.subf %195, %188 : vector<1x32xf32>
    %197 = arith.mulf %196, %194 : vector<1x32xf32>
    %198 = arith.mulf %188, %167 : vector<1x32xf32>
    %199 = arith.addf %197, %198 : vector<1x32xf32>
    %200 = arith.index_cast %c5_i32 : i32 to index
    %c0_47 = arith.constant 0 : index
    %201 = vector.load %arg13[%200, %c0_47] : memref<16x32xf32, #tpu.memory_space<vmem>>, vector<1x32xf32>
    tpu.vector_store %arg13[%200, %c0_47], %199 {strides = array<i32>} : memref<16x32xf32, #tpu.memory_space<vmem>>, vector<1x32xf32>,
    %c6_i32 = arith.constant 6 : i32
    %202 = arith.index_cast %c6_i32 : i32 to index
    %c0_48 = arith.constant 0 : index
    %203 = vector.load %arg12[%202, %c0_48] : memref<16x96xf32, #tpu.memory_space<vmem>>, vector<1x96xf32>
    %cst_49 = arith.constant dense<0.000000e+00> : vector<1x96xf32>
    %204 = tpu.matmul %199, %7, %cst_49 {dimension_numbers = #tpu.dot_dimension_numbers<[1], [0], [0], [1], [0, 0, 1, 1], [], []>} : vector<1x32xf32>, vector<32x96xf32>, vector<1x96xf32> -> vector<1x96xf32>
    %205 = vector.extract_strided_slice %203 {offsets = [0, 0], sizes = [1, 32], strides = [1, 1]} : vector<1x96xf32> to vector<1x32xf32>
    %206 = vector.extract_strided_slice %204 {offsets = [0, 0], sizes = [1, 32], strides = [1, 1]} : vector<1x96xf32> to vector<1x32xf32>
    %207 = arith.addf %205, %206 : vector<1x32xf32>
    %208 = arith.negf %207 : vector<1x32xf32>
    %209 = math.exp %208 : vector<1x32xf32>
    %cst_50 = arith.constant 1.000000e+00 : f32
    %210 = vector.broadcast %cst_50 : f32 to vector<1x32xf32>
    %211 = arith.addf %210, %209 : vector<1x32xf32>
    %212 = arith.divf %210, %211 : vector<1x32xf32>
    %213 = vector.extract_strided_slice %203 {offsets = [0, 32], sizes = [1, 32], strides = [1, 1]} : vector<1x96xf32> to vector<1x32xf32>
    %214 = vector.extract_strided_slice %204 {offsets = [0, 32], sizes = [1, 32], strides = [1, 1]} : vector<1x96xf32> to vector<1x32xf32>
    %215 = arith.addf %213, %214 : vector<1x32xf32>
    %216 = arith.negf %215 : vector<1x32xf32>
    %217 = math.exp %216 : vector<1x32xf32>
    %cst_51 = arith.constant 1.000000e+00 : f32
    %218 = vector.broadcast %cst_51 : f32 to vector<1x32xf32>
    %219 = arith.addf %218, %217 : vector<1x32xf32>
    %220 = arith.divf %218, %219 : vector<1x32xf32>
    %221 = vector.extract_strided_slice %203 {offsets = [0, 64], sizes = [1, 32], strides = [1, 1]} : vector<1x96xf32> to vector<1x32xf32>
    %222 = vector.extract_strided_slice %204 {offsets = [0, 64], sizes = [1, 32], strides = [1, 1]} : vector<1x96xf32> to vector<1x32xf32>
    %223 = arith.addf %222, %8 : vector<1x32xf32>
    %224 = arith.mulf %212, %223 : vector<1x32xf32>
    %225 = arith.addf %221, %224 : vector<1x32xf32>
    %226 = math.tanh %225 : vector<1x32xf32>
    %cst_52 = arith.constant 1.000000e+00 : f32
    %227 = vector.broadcast %cst_52 : f32 to vector<1x32xf32>
    %228 = arith.subf %227, %220 : vector<1x32xf32>
    %229 = arith.mulf %228, %226 : vector<1x32xf32>
    %230 = arith.mulf %220, %199 : vector<1x32xf32>
    %231 = arith.addf %229, %230 : vector<1x32xf32>
    %232 = arith.index_cast %c6_i32 : i32 to index
    %c0_53 = arith.constant 0 : index
    %233 = vector.load %arg13[%232, %c0_53] : memref<16x32xf32, #tpu.memory_space<vmem>>, vector<1x32xf32>
    tpu.vector_store %arg13[%232, %c0_53], %231 {strides = array<i32>} : memref<16x32xf32, #tpu.memory_space<vmem>>, vector<1x32xf32>,
    %c7_i32 = arith.constant 7 : i32
    %234 = arith.index_cast %c7_i32 : i32 to index
    %c0_54 = arith.constant 0 : index
    %235 = vector.load %arg12[%234, %c0_54] : memref<16x96xf32, #tpu.memory_space<vmem>>, vector<1x96xf32>
    %cst_55 = arith.constant dense<0.000000e+00> : vector<1x96xf32>
    %236 = tpu.matmul %231, %7, %cst_55 {dimension_numbers = #tpu.dot_dimension_numbers<[1], [0], [0], [1], [0, 0, 1, 1], [], []>} : vector<1x32xf32>, vector<32x96xf32>, vector<1x96xf32> -> vector<1x96xf32>
    %237 = vector.extract_strided_slice %235 {offsets = [0, 0], sizes = [1, 32], strides = [1, 1]} : vector<1x96xf32> to vector<1x32xf32>
    %238 = vector.extract_strided_slice %236 {offsets = [0, 0], sizes = [1, 32], strides = [1, 1]} : vector<1x96xf32> to vector<1x32xf32>
    %239 = arith.addf %237, %238 : vector<1x32xf32>
    %240 = arith.negf %239 : vector<1x32xf32>
    %241 = math.exp %240 : vector<1x32xf32>
    %cst_56 = arith.constant 1.000000e+00 : f32
    %242 = vector.broadcast %cst_56 : f32 to vector<1x32xf32>
    %243 = arith.addf %242, %241 : vector<1x32xf32>
    %244 = arith.divf %242, %243 : vector<1x32xf32>
    %245 = vector.extract_strided_slice %235 {offsets = [0, 32], sizes = [1, 32], strides = [1, 1]} : vector<1x96xf32> to vector<1x32xf32>
    %246 = vector.extract_strided_slice %236 {offsets = [0, 32], sizes = [1, 32], strides = [1, 1]} : vector<1x96xf32> to vector<1x32xf32>
    %247 = arith.addf %245, %246 : vector<1x32xf32>
    %248 = arith.negf %247 : vector<1x32xf32>
    %249 = math.exp %248 : vector<1x32xf32>
    %cst_57 = arith.constant 1.000000e+00 : f32
    %250 = vector.broadcast %cst_57 : f32 to vector<1x32xf32>
    %251 = arith.addf %250, %249 : vector<1x32xf32>
    %252 = arith.divf %250, %251 : vector<1x32xf32>
    %253 = vector.extract_strided_slice %235 {offsets = [0, 64], sizes = [1, 32], strides = [1, 1]} : vector<1x96xf32> to vector<1x32xf32>
    %254 = vector.extract_strided_slice %236 {offsets = [0, 64], sizes = [1, 32], strides = [1, 1]} : vector<1x96xf32> to vector<1x32xf32>
    %255 = arith.addf %254, %8 : vector<1x32xf32>
    %256 = arith.mulf %244, %255 : vector<1x32xf32>
    %257 = arith.addf %253, %256 : vector<1x32xf32>
    %258 = math.tanh %257 : vector<1x32xf32>
    %cst_58 = arith.constant 1.000000e+00 : f32
    %259 = vector.broadcast %cst_58 : f32 to vector<1x32xf32>
    %260 = arith.subf %259, %252 : vector<1x32xf32>
    %261 = arith.mulf %260, %258 : vector<1x32xf32>
    %262 = arith.mulf %252, %231 : vector<1x32xf32>
    %263 = arith.addf %261, %262 : vector<1x32xf32>
    %264 = arith.index_cast %c7_i32 : i32 to index
    %c0_59 = arith.constant 0 : index
    %265 = vector.load %arg13[%264, %c0_59] : memref<16x32xf32, #tpu.memory_space<vmem>>, vector<1x32xf32>
    tpu.vector_store %arg13[%264, %c0_59], %263 {strides = array<i32>} : memref<16x32xf32, #tpu.memory_space<vmem>>, vector<1x32xf32>,
    %c8_i32 = arith.constant 8 : i32
    %266 = arith.index_cast %c8_i32 : i32 to index
    %c0_60 = arith.constant 0 : index
    %267 = vector.load %arg12[%266, %c0_60] : memref<16x96xf32, #tpu.memory_space<vmem>>, vector<1x96xf32>
    %cst_61 = arith.constant dense<0.000000e+00> : vector<1x96xf32>
    %268 = tpu.matmul %263, %7, %cst_61 {dimension_numbers = #tpu.dot_dimension_numbers<[1], [0], [0], [1], [0, 0, 1, 1], [], []>} : vector<1x32xf32>, vector<32x96xf32>, vector<1x96xf32> -> vector<1x96xf32>
    %269 = vector.extract_strided_slice %267 {offsets = [0, 0], sizes = [1, 32], strides = [1, 1]} : vector<1x96xf32> to vector<1x32xf32>
    %270 = vector.extract_strided_slice %268 {offsets = [0, 0], sizes = [1, 32], strides = [1, 1]} : vector<1x96xf32> to vector<1x32xf32>
    %271 = arith.addf %269, %270 : vector<1x32xf32>
    %272 = arith.negf %271 : vector<1x32xf32>
    %273 = math.exp %272 : vector<1x32xf32>
    %cst_62 = arith.constant 1.000000e+00 : f32
    %274 = vector.broadcast %cst_62 : f32 to vector<1x32xf32>
    %275 = arith.addf %274, %273 : vector<1x32xf32>
    %276 = arith.divf %274, %275 : vector<1x32xf32>
    %277 = vector.extract_strided_slice %267 {offsets = [0, 32], sizes = [1, 32], strides = [1, 1]} : vector<1x96xf32> to vector<1x32xf32>
    %278 = vector.extract_strided_slice %268 {offsets = [0, 32], sizes = [1, 32], strides = [1, 1]} : vector<1x96xf32> to vector<1x32xf32>
    %279 = arith.addf %277, %278 : vector<1x32xf32>
    %280 = arith.negf %279 : vector<1x32xf32>
    %281 = math.exp %280 : vector<1x32xf32>
    %cst_63 = arith.constant 1.000000e+00 : f32
    %282 = vector.broadcast %cst_63 : f32 to vector<1x32xf32>
    %283 = arith.addf %282, %281 : vector<1x32xf32>
    %284 = arith.divf %282, %283 : vector<1x32xf32>
    %285 = vector.extract_strided_slice %267 {offsets = [0, 64], sizes = [1, 32], strides = [1, 1]} : vector<1x96xf32> to vector<1x32xf32>
    %286 = vector.extract_strided_slice %268 {offsets = [0, 64], sizes = [1, 32], strides = [1, 1]} : vector<1x96xf32> to vector<1x32xf32>
    %287 = arith.addf %286, %8 : vector<1x32xf32>
    %288 = arith.mulf %276, %287 : vector<1x32xf32>
    %289 = arith.addf %285, %288 : vector<1x32xf32>
    %290 = math.tanh %289 : vector<1x32xf32>
    %cst_64 = arith.constant 1.000000e+00 : f32
    %291 = vector.broadcast %cst_64 : f32 to vector<1x32xf32>
    %292 = arith.subf %291, %284 : vector<1x32xf32>
    %293 = arith.mulf %292, %290 : vector<1x32xf32>
    %294 = arith.mulf %284, %263 : vector<1x32xf32>
    %295 = arith.addf %293, %294 : vector<1x32xf32>
    %296 = arith.index_cast %c8_i32 : i32 to index
    %c0_65 = arith.constant 0 : index
    %297 = vector.load %arg13[%296, %c0_65] : memref<16x32xf32, #tpu.memory_space<vmem>>, vector<1x32xf32>
    tpu.vector_store %arg13[%296, %c0_65], %295 {strides = array<i32>} : memref<16x32xf32, #tpu.memory_space<vmem>>, vector<1x32xf32>,
    %c9_i32 = arith.constant 9 : i32
    %298 = arith.index_cast %c9_i32 : i32 to index
    %c0_66 = arith.constant 0 : index
    %299 = vector.load %arg12[%298, %c0_66] : memref<16x96xf32, #tpu.memory_space<vmem>>, vector<1x96xf32>
    %cst_67 = arith.constant dense<0.000000e+00> : vector<1x96xf32>
    %300 = tpu.matmul %295, %7, %cst_67 {dimension_numbers = #tpu.dot_dimension_numbers<[1], [0], [0], [1], [0, 0, 1, 1], [], []>} : vector<1x32xf32>, vector<32x96xf32>, vector<1x96xf32> -> vector<1x96xf32>
    %301 = vector.extract_strided_slice %299 {offsets = [0, 0], sizes = [1, 32], strides = [1, 1]} : vector<1x96xf32> to vector<1x32xf32>
    %302 = vector.extract_strided_slice %300 {offsets = [0, 0], sizes = [1, 32], strides = [1, 1]} : vector<1x96xf32> to vector<1x32xf32>
    %303 = arith.addf %301, %302 : vector<1x32xf32>
    %304 = arith.negf %303 : vector<1x32xf32>
    %305 = math.exp %304 : vector<1x32xf32>
    %cst_68 = arith.constant 1.000000e+00 : f32
    %306 = vector.broadcast %cst_68 : f32 to vector<1x32xf32>
    %307 = arith.addf %306, %305 : vector<1x32xf32>
    %308 = arith.divf %306, %307 : vector<1x32xf32>
    %309 = vector.extract_strided_slice %299 {offsets = [0, 32], sizes = [1, 32], strides = [1, 1]} : vector<1x96xf32> to vector<1x32xf32>
    %310 = vector.extract_strided_slice %300 {offsets = [0, 32], sizes = [1, 32], strides = [1, 1]} : vector<1x96xf32> to vector<1x32xf32>
    %311 = arith.addf %309, %310 : vector<1x32xf32>
    %312 = arith.negf %311 : vector<1x32xf32>
    %313 = math.exp %312 : vector<1x32xf32>
    %cst_69 = arith.constant 1.000000e+00 : f32
    %314 = vector.broadcast %cst_69 : f32 to vector<1x32xf32>
    %315 = arith.addf %314, %313 : vector<1x32xf32>
    %316 = arith.divf %314, %315 : vector<1x32xf32>
    %317 = vector.extract_strided_slice %299 {offsets = [0, 64], sizes = [1, 32], strides = [1, 1]} : vector<1x96xf32> to vector<1x32xf32>
    %318 = vector.extract_strided_slice %300 {offsets = [0, 64], sizes = [1, 32], strides = [1, 1]} : vector<1x96xf32> to vector<1x32xf32>
    %319 = arith.addf %318, %8 : vector<1x32xf32>
    %320 = arith.mulf %308, %319 : vector<1x32xf32>
    %321 = arith.addf %317, %320 : vector<1x32xf32>
    %322 = math.tanh %321 : vector<1x32xf32>
    %cst_70 = arith.constant 1.000000e+00 : f32
    %323 = vector.broadcast %cst_70 : f32 to vector<1x32xf32>
    %324 = arith.subf %323, %316 : vector<1x32xf32>
    %325 = arith.mulf %324, %322 : vector<1x32xf32>
    %326 = arith.mulf %316, %295 : vector<1x32xf32>
    %327 = arith.addf %325, %326 : vector<1x32xf32>
    %328 = arith.index_cast %c9_i32 : i32 to index
    %c0_71 = arith.constant 0 : index
    %329 = vector.load %arg13[%328, %c0_71] : memref<16x32xf32, #tpu.memory_space<vmem>>, vector<1x32xf32>
    tpu.vector_store %arg13[%328, %c0_71], %327 {strides = array<i32>} : memref<16x32xf32, #tpu.memory_space<vmem>>, vector<1x32xf32>,
    %c10_i32 = arith.constant 10 : i32
    %330 = arith.index_cast %c10_i32 : i32 to index
    %c0_72 = arith.constant 0 : index
    %331 = vector.load %arg12[%330, %c0_72] : memref<16x96xf32, #tpu.memory_space<vmem>>, vector<1x96xf32>
    %cst_73 = arith.constant dense<0.000000e+00> : vector<1x96xf32>
    %332 = tpu.matmul %327, %7, %cst_73 {dimension_numbers = #tpu.dot_dimension_numbers<[1], [0], [0], [1], [0, 0, 1, 1], [], []>} : vector<1x32xf32>, vector<32x96xf32>, vector<1x96xf32> -> vector<1x96xf32>
    %333 = vector.extract_strided_slice %331 {offsets = [0, 0], sizes = [1, 32], strides = [1, 1]} : vector<1x96xf32> to vector<1x32xf32>
    %334 = vector.extract_strided_slice %332 {offsets = [0, 0], sizes = [1, 32], strides = [1, 1]} : vector<1x96xf32> to vector<1x32xf32>
    %335 = arith.addf %333, %334 : vector<1x32xf32>
    %336 = arith.negf %335 : vector<1x32xf32>
    %337 = math.exp %336 : vector<1x32xf32>
    %cst_74 = arith.constant 1.000000e+00 : f32
    %338 = vector.broadcast %cst_74 : f32 to vector<1x32xf32>
    %339 = arith.addf %338, %337 : vector<1x32xf32>
    %340 = arith.divf %338, %339 : vector<1x32xf32>
    %341 = vector.extract_strided_slice %331 {offsets = [0, 32], sizes = [1, 32], strides = [1, 1]} : vector<1x96xf32> to vector<1x32xf32>
    %342 = vector.extract_strided_slice %332 {offsets = [0, 32], sizes = [1, 32], strides = [1, 1]} : vector<1x96xf32> to vector<1x32xf32>
    %343 = arith.addf %341, %342 : vector<1x32xf32>
    %344 = arith.negf %343 : vector<1x32xf32>
    %345 = math.exp %344 : vector<1x32xf32>
    %cst_75 = arith.constant 1.000000e+00 : f32
    %346 = vector.broadcast %cst_75 : f32 to vector<1x32xf32>
    %347 = arith.addf %346, %345 : vector<1x32xf32>
    %348 = arith.divf %346, %347 : vector<1x32xf32>
    %349 = vector.extract_strided_slice %331 {offsets = [0, 64], sizes = [1, 32], strides = [1, 1]} : vector<1x96xf32> to vector<1x32xf32>
    %350 = vector.extract_strided_slice %332 {offsets = [0, 64], sizes = [1, 32], strides = [1, 1]} : vector<1x96xf32> to vector<1x32xf32>
    %351 = arith.addf %350, %8 : vector<1x32xf32>
    %352 = arith.mulf %340, %351 : vector<1x32xf32>
    %353 = arith.addf %349, %352 : vector<1x32xf32>
    %354 = math.tanh %353 : vector<1x32xf32>
    %cst_76 = arith.constant 1.000000e+00 : f32
    %355 = vector.broadcast %cst_76 : f32 to vector<1x32xf32>
    %356 = arith.subf %355, %348 : vector<1x32xf32>
    %357 = arith.mulf %356, %354 : vector<1x32xf32>
    %358 = arith.mulf %348, %327 : vector<1x32xf32>
    %359 = arith.addf %357, %358 : vector<1x32xf32>
    %360 = arith.index_cast %c10_i32 : i32 to index
    %c0_77 = arith.constant 0 : index
    %361 = vector.load %arg13[%360, %c0_77] : memref<16x32xf32, #tpu.memory_space<vmem>>, vector<1x32xf32>
    tpu.vector_store %arg13[%360, %c0_77], %359 {strides = array<i32>} : memref<16x32xf32, #tpu.memory_space<vmem>>, vector<1x32xf32>,
    %c11_i32 = arith.constant 11 : i32
    %362 = arith.index_cast %c11_i32 : i32 to index
    %c0_78 = arith.constant 0 : index
    %363 = vector.load %arg12[%362, %c0_78] : memref<16x96xf32, #tpu.memory_space<vmem>>, vector<1x96xf32>
    %cst_79 = arith.constant dense<0.000000e+00> : vector<1x96xf32>
    %364 = tpu.matmul %359, %7, %cst_79 {dimension_numbers = #tpu.dot_dimension_numbers<[1], [0], [0], [1], [0, 0, 1, 1], [], []>} : vector<1x32xf32>, vector<32x96xf32>, vector<1x96xf32> -> vector<1x96xf32>
    %365 = vector.extract_strided_slice %363 {offsets = [0, 0], sizes = [1, 32], strides = [1, 1]} : vector<1x96xf32> to vector<1x32xf32>
    %366 = vector.extract_strided_slice %364 {offsets = [0, 0], sizes = [1, 32], strides = [1, 1]} : vector<1x96xf32> to vector<1x32xf32>
    %367 = arith.addf %365, %366 : vector<1x32xf32>
    %368 = arith.negf %367 : vector<1x32xf32>
    %369 = math.exp %368 : vector<1x32xf32>
    %cst_80 = arith.constant 1.000000e+00 : f32
    %370 = vector.broadcast %cst_80 : f32 to vector<1x32xf32>
    %371 = arith.addf %370, %369 : vector<1x32xf32>
    %372 = arith.divf %370, %371 : vector<1x32xf32>
    %373 = vector.extract_strided_slice %363 {offsets = [0, 32], sizes = [1, 32], strides = [1, 1]} : vector<1x96xf32> to vector<1x32xf32>
    %374 = vector.extract_strided_slice %364 {offsets = [0, 32], sizes = [1, 32], strides = [1, 1]} : vector<1x96xf32> to vector<1x32xf32>
    %375 = arith.addf %373, %374 : vector<1x32xf32>
    %376 = arith.negf %375 : vector<1x32xf32>
    %377 = math.exp %376 : vector<1x32xf32>
    %cst_81 = arith.constant 1.000000e+00 : f32
    %378 = vector.broadcast %cst_81 : f32 to vector<1x32xf32>
    %379 = arith.addf %378, %377 : vector<1x32xf32>
    %380 = arith.divf %378, %379 : vector<1x32xf32>
    %381 = vector.extract_strided_slice %363 {offsets = [0, 64], sizes = [1, 32], strides = [1, 1]} : vector<1x96xf32> to vector<1x32xf32>
    %382 = vector.extract_strided_slice %364 {offsets = [0, 64], sizes = [1, 32], strides = [1, 1]} : vector<1x96xf32> to vector<1x32xf32>
    %383 = arith.addf %382, %8 : vector<1x32xf32>
    %384 = arith.mulf %372, %383 : vector<1x32xf32>
    %385 = arith.addf %381, %384 : vector<1x32xf32>
    %386 = math.tanh %385 : vector<1x32xf32>
    %cst_82 = arith.constant 1.000000e+00 : f32
    %387 = vector.broadcast %cst_82 : f32 to vector<1x32xf32>
    %388 = arith.subf %387, %380 : vector<1x32xf32>
    %389 = arith.mulf %388, %386 : vector<1x32xf32>
    %390 = arith.mulf %380, %359 : vector<1x32xf32>
    %391 = arith.addf %389, %390 : vector<1x32xf32>
    %392 = arith.index_cast %c11_i32 : i32 to index
    %c0_83 = arith.constant 0 : index
    %393 = vector.load %arg13[%392, %c0_83] : memref<16x32xf32, #tpu.memory_space<vmem>>, vector<1x32xf32>
    tpu.vector_store %arg13[%392, %c0_83], %391 {strides = array<i32>} : memref<16x32xf32, #tpu.memory_space<vmem>>, vector<1x32xf32>,
    %c12_i32 = arith.constant 12 : i32
    %394 = arith.index_cast %c12_i32 : i32 to index
    %c0_84 = arith.constant 0 : index
    %395 = vector.load %arg12[%394, %c0_84] : memref<16x96xf32, #tpu.memory_space<vmem>>, vector<1x96xf32>
    %cst_85 = arith.constant dense<0.000000e+00> : vector<1x96xf32>
    %396 = tpu.matmul %391, %7, %cst_85 {dimension_numbers = #tpu.dot_dimension_numbers<[1], [0], [0], [1], [0, 0, 1, 1], [], []>} : vector<1x32xf32>, vector<32x96xf32>, vector<1x96xf32> -> vector<1x96xf32>
    %397 = vector.extract_strided_slice %395 {offsets = [0, 0], sizes = [1, 32], strides = [1, 1]} : vector<1x96xf32> to vector<1x32xf32>
    %398 = vector.extract_strided_slice %396 {offsets = [0, 0], sizes = [1, 32], strides = [1, 1]} : vector<1x96xf32> to vector<1x32xf32>
    %399 = arith.addf %397, %398 : vector<1x32xf32>
    %400 = arith.negf %399 : vector<1x32xf32>
    %401 = math.exp %400 : vector<1x32xf32>
    %cst_86 = arith.constant 1.000000e+00 : f32
    %402 = vector.broadcast %cst_86 : f32 to vector<1x32xf32>
    %403 = arith.addf %402, %401 : vector<1x32xf32>
    %404 = arith.divf %402, %403 : vector<1x32xf32>
    %405 = vector.extract_strided_slice %395 {offsets = [0, 32], sizes = [1, 32], strides = [1, 1]} : vector<1x96xf32> to vector<1x32xf32>
    %406 = vector.extract_strided_slice %396 {offsets = [0, 32], sizes = [1, 32], strides = [1, 1]} : vector<1x96xf32> to vector<1x32xf32>
    %407 = arith.addf %405, %406 : vector<1x32xf32>
    %408 = arith.negf %407 : vector<1x32xf32>
    %409 = math.exp %408 : vector<1x32xf32>
    %cst_87 = arith.constant 1.000000e+00 : f32
    %410 = vector.broadcast %cst_87 : f32 to vector<1x32xf32>
    %411 = arith.addf %410, %409 : vector<1x32xf32>
    %412 = arith.divf %410, %411 : vector<1x32xf32>
    %413 = vector.extract_strided_slice %395 {offsets = [0, 64], sizes = [1, 32], strides = [1, 1]} : vector<1x96xf32> to vector<1x32xf32>
    %414 = vector.extract_strided_slice %396 {offsets = [0, 64], sizes = [1, 32], strides = [1, 1]} : vector<1x96xf32> to vector<1x32xf32>
    %415 = arith.addf %414, %8 : vector<1x32xf32>
    %416 = arith.mulf %404, %415 : vector<1x32xf32>
    %417 = arith.addf %413, %416 : vector<1x32xf32>
    %418 = math.tanh %417 : vector<1x32xf32>
    %cst_88 = arith.constant 1.000000e+00 : f32
    %419 = vector.broadcast %cst_88 : f32 to vector<1x32xf32>
    %420 = arith.subf %419, %412 : vector<1x32xf32>
    %421 = arith.mulf %420, %418 : vector<1x32xf32>
    %422 = arith.mulf %412, %391 : vector<1x32xf32>
    %423 = arith.addf %421, %422 : vector<1x32xf32>
    %424 = arith.index_cast %c12_i32 : i32 to index
    %c0_89 = arith.constant 0 : index
    %425 = vector.load %arg13[%424, %c0_89] : memref<16x32xf32, #tpu.memory_space<vmem>>, vector<1x32xf32>
    tpu.vector_store %arg13[%424, %c0_89], %423 {strides = array<i32>} : memref<16x32xf32, #tpu.memory_space<vmem>>, vector<1x32xf32>,
    %c13_i32 = arith.constant 13 : i32
    %426 = arith.index_cast %c13_i32 : i32 to index
    %c0_90 = arith.constant 0 : index
    %427 = vector.load %arg12[%426, %c0_90] : memref<16x96xf32, #tpu.memory_space<vmem>>, vector<1x96xf32>
    %cst_91 = arith.constant dense<0.000000e+00> : vector<1x96xf32>
    %428 = tpu.matmul %423, %7, %cst_91 {dimension_numbers = #tpu.dot_dimension_numbers<[1], [0], [0], [1], [0, 0, 1, 1], [], []>} : vector<1x32xf32>, vector<32x96xf32>, vector<1x96xf32> -> vector<1x96xf32>
    %429 = vector.extract_strided_slice %427 {offsets = [0, 0], sizes = [1, 32], strides = [1, 1]} : vector<1x96xf32> to vector<1x32xf32>
    %430 = vector.extract_strided_slice %428 {offsets = [0, 0], sizes = [1, 32], strides = [1, 1]} : vector<1x96xf32> to vector<1x32xf32>
    %431 = arith.addf %429, %430 : vector<1x32xf32>
    %432 = arith.negf %431 : vector<1x32xf32>
    %433 = math.exp %432 : vector<1x32xf32>
    %cst_92 = arith.constant 1.000000e+00 : f32
    %434 = vector.broadcast %cst_92 : f32 to vector<1x32xf32>
    %435 = arith.addf %434, %433 : vector<1x32xf32>
    %436 = arith.divf %434, %435 : vector<1x32xf32>
    %437 = vector.extract_strided_slice %427 {offsets = [0, 32], sizes = [1, 32], strides = [1, 1]} : vector<1x96xf32> to vector<1x32xf32>
    %438 = vector.extract_strided_slice %428 {offsets = [0, 32], sizes = [1, 32], strides = [1, 1]} : vector<1x96xf32> to vector<1x32xf32>
    %439 = arith.addf %437, %438 : vector<1x32xf32>
    %440 = arith.negf %439 : vector<1x32xf32>
    %441 = math.exp %440 : vector<1x32xf32>
    %cst_93 = arith.constant 1.000000e+00 : f32
    %442 = vector.broadcast %cst_93 : f32 to vector<1x32xf32>
    %443 = arith.addf %442, %441 : vector<1x32xf32>
    %444 = arith.divf %442, %443 : vector<1x32xf32>
    %445 = vector.extract_strided_slice %427 {offsets = [0, 64], sizes = [1, 32], strides = [1, 1]} : vector<1x96xf32> to vector<1x32xf32>
    %446 = vector.extract_strided_slice %428 {offsets = [0, 64], sizes = [1, 32], strides = [1, 1]} : vector<1x96xf32> to vector<1x32xf32>
    %447 = arith.addf %446, %8 : vector<1x32xf32>
    %448 = arith.mulf %436, %447 : vector<1x32xf32>
    %449 = arith.addf %445, %448 : vector<1x32xf32>
    %450 = math.tanh %449 : vector<1x32xf32>
    %cst_94 = arith.constant 1.000000e+00 : f32
    %451 = vector.broadcast %cst_94 : f32 to vector<1x32xf32>
    %452 = arith.subf %451, %444 : vector<1x32xf32>
    %453 = arith.mulf %452, %450 : vector<1x32xf32>
    %454 = arith.mulf %444, %423 : vector<1x32xf32>
    %455 = arith.addf %453, %454 : vector<1x32xf32>
    %456 = arith.index_cast %c13_i32 : i32 to index
    %c0_95 = arith.constant 0 : index
    %457 = vector.load %arg13[%456, %c0_95] : memref<16x32xf32, #tpu.memory_space<vmem>>, vector<1x32xf32>
    tpu.vector_store %arg13[%456, %c0_95], %455 {strides = array<i32>} : memref<16x32xf32, #tpu.memory_space<vmem>>, vector<1x32xf32>,
    %c14_i32 = arith.constant 14 : i32
    %458 = arith.index_cast %c14_i32 : i32 to index
    %c0_96 = arith.constant 0 : index
    %459 = vector.load %arg12[%458, %c0_96] : memref<16x96xf32, #tpu.memory_space<vmem>>, vector<1x96xf32>
    %cst_97 = arith.constant dense<0.000000e+00> : vector<1x96xf32>
    %460 = tpu.matmul %455, %7, %cst_97 {dimension_numbers = #tpu.dot_dimension_numbers<[1], [0], [0], [1], [0, 0, 1, 1], [], []>} : vector<1x32xf32>, vector<32x96xf32>, vector<1x96xf32> -> vector<1x96xf32>
    %461 = vector.extract_strided_slice %459 {offsets = [0, 0], sizes = [1, 32], strides = [1, 1]} : vector<1x96xf32> to vector<1x32xf32>
    %462 = vector.extract_strided_slice %460 {offsets = [0, 0], sizes = [1, 32], strides = [1, 1]} : vector<1x96xf32> to vector<1x32xf32>
    %463 = arith.addf %461, %462 : vector<1x32xf32>
    %464 = arith.negf %463 : vector<1x32xf32>
    %465 = math.exp %464 : vector<1x32xf32>
    %cst_98 = arith.constant 1.000000e+00 : f32
    %466 = vector.broadcast %cst_98 : f32 to vector<1x32xf32>
    %467 = arith.addf %466, %465 : vector<1x32xf32>
    %468 = arith.divf %466, %467 : vector<1x32xf32>
    %469 = vector.extract_strided_slice %459 {offsets = [0, 32], sizes = [1, 32], strides = [1, 1]} : vector<1x96xf32> to vector<1x32xf32>
    %470 = vector.extract_strided_slice %460 {offsets = [0, 32], sizes = [1, 32], strides = [1, 1]} : vector<1x96xf32> to vector<1x32xf32>
    %471 = arith.addf %469, %470 : vector<1x32xf32>
    %472 = arith.negf %471 : vector<1x32xf32>
    %473 = math.exp %472 : vector<1x32xf32>
    %cst_99 = arith.constant 1.000000e+00 : f32
    %474 = vector.broadcast %cst_99 : f32 to vector<1x32xf32>
    %475 = arith.addf %474, %473 : vector<1x32xf32>
    %476 = arith.divf %474, %475 : vector<1x32xf32>
    %477 = vector.extract_strided_slice %459 {offsets = [0, 64], sizes = [1, 32], strides = [1, 1]} : vector<1x96xf32> to vector<1x32xf32>
    %478 = vector.extract_strided_slice %460 {offsets = [0, 64], sizes = [1, 32], strides = [1, 1]} : vector<1x96xf32> to vector<1x32xf32>
    %479 = arith.addf %478, %8 : vector<1x32xf32>
    %480 = arith.mulf %468, %479 : vector<1x32xf32>
    %481 = arith.addf %477, %480 : vector<1x32xf32>
    %482 = math.tanh %481 : vector<1x32xf32>
    %cst_100 = arith.constant 1.000000e+00 : f32
    %483 = vector.broadcast %cst_100 : f32 to vector<1x32xf32>
    %484 = arith.subf %483, %476 : vector<1x32xf32>
    %485 = arith.mulf %484, %482 : vector<1x32xf32>
    %486 = arith.mulf %476, %455 : vector<1x32xf32>
    %487 = arith.addf %485, %486 : vector<1x32xf32>
    %488 = arith.index_cast %c14_i32 : i32 to index
    %c0_101 = arith.constant 0 : index
    %489 = vector.load %arg13[%488, %c0_101] : memref<16x32xf32, #tpu.memory_space<vmem>>, vector<1x32xf32>
    tpu.vector_store %arg13[%488, %c0_101], %487 {strides = array<i32>} : memref<16x32xf32, #tpu.memory_space<vmem>>, vector<1x32xf32>,
    %c15_i32 = arith.constant 15 : i32
    %490 = arith.index_cast %c15_i32 : i32 to index
    %c0_102 = arith.constant 0 : index
    %491 = vector.load %arg12[%490, %c0_102] : memref<16x96xf32, #tpu.memory_space<vmem>>, vector<1x96xf32>
    %cst_103 = arith.constant dense<0.000000e+00> : vector<1x96xf32>
    %492 = tpu.matmul %487, %7, %cst_103 {dimension_numbers = #tpu.dot_dimension_numbers<[1], [0], [0], [1], [0, 0, 1, 1], [], []>} : vector<1x32xf32>, vector<32x96xf32>, vector<1x96xf32> -> vector<1x96xf32>
    %493 = vector.extract_strided_slice %491 {offsets = [0, 0], sizes = [1, 32], strides = [1, 1]} : vector<1x96xf32> to vector<1x32xf32>
    %494 = vector.extract_strided_slice %492 {offsets = [0, 0], sizes = [1, 32], strides = [1, 1]} : vector<1x96xf32> to vector<1x32xf32>
    %495 = arith.addf %493, %494 : vector<1x32xf32>
    %496 = arith.negf %495 : vector<1x32xf32>
    %497 = math.exp %496 : vector<1x32xf32>
    %cst_104 = arith.constant 1.000000e+00 : f32
    %498 = vector.broadcast %cst_104 : f32 to vector<1x32xf32>
    %499 = arith.addf %498, %497 : vector<1x32xf32>
    %500 = arith.divf %498, %499 : vector<1x32xf32>
    %501 = vector.extract_strided_slice %491 {offsets = [0, 32], sizes = [1, 32], strides = [1, 1]} : vector<1x96xf32> to vector<1x32xf32>
    %502 = vector.extract_strided_slice %492 {offsets = [0, 32], sizes = [1, 32], strides = [1, 1]} : vector<1x96xf32> to vector<1x32xf32>
    %503 = arith.addf %501, %502 : vector<1x32xf32>
    %504 = arith.negf %503 : vector<1x32xf32>
    %505 = math.exp %504 : vector<1x32xf32>
    %cst_105 = arith.constant 1.000000e+00 : f32
    %506 = vector.broadcast %cst_105 : f32 to vector<1x32xf32>
    %507 = arith.addf %506, %505 : vector<1x32xf32>
    %508 = arith.divf %506, %507 : vector<1x32xf32>
    %509 = vector.extract_strided_slice %491 {offsets = [0, 64], sizes = [1, 32], strides = [1, 1]} : vector<1x96xf32> to vector<1x32xf32>
    %510 = vector.extract_strided_slice %492 {offsets = [0, 64], sizes = [1, 32], strides = [1, 1]} : vector<1x96xf32> to vector<1x32xf32>
    %511 = arith.addf %510, %8 : vector<1x32xf32>
    %512 = arith.mulf %500, %511 : vector<1x32xf32>
    %513 = arith.addf %509, %512 : vector<1x32xf32>
    %514 = math.tanh %513 : vector<1x32xf32>
    %cst_106 = arith.constant 1.000000e+00 : f32
    %515 = vector.broadcast %cst_106 : f32 to vector<1x32xf32>
    %516 = arith.subf %515, %508 : vector<1x32xf32>
    %517 = arith.mulf %516, %514 : vector<1x32xf32>
    %518 = arith.mulf %508, %487 : vector<1x32xf32>
    %519 = arith.addf %517, %518 : vector<1x32xf32>
    %520 = arith.index_cast %c15_i32 : i32 to index
    %c0_107 = arith.constant 0 : index
    %521 = vector.load %arg13[%520, %c0_107] : memref<16x32xf32, #tpu.memory_space<vmem>>, vector<1x32xf32>
    tpu.vector_store %arg13[%520, %c0_107], %519 {strides = array<i32>} : memref<16x32xf32, #tpu.memory_space<vmem>>, vector<1x32xf32>,
    %c16_i32 = arith.constant 16 : i32
    %c0_108 = arith.constant 0 : index
    %c0_109 = arith.constant 0 : index
    %522 = vector.load %arg13[%c0_108, %c0_109] : memref<16x32xf32, #tpu.memory_space<vmem>>, vector<16x32xf32>
    %523 = tpu.iota {dimensions = array<i32: 0>} : vector<16x16xi32>
    %524 = tpu.iota {dimensions = array<i32: 1>} : vector<16x16xi32>
    %525 = arith.addi %523, %524 : vector<16x16xi32>
    %c15_i32_110 = arith.constant 15 : i32
    %526 = vector.broadcast %c15_i32_110 : i32 to vector<16x16xi32>
    %527 = arith.cmpi eq, %525, %526 : vector<16x16xi32>
    %cst_111 = arith.constant 1.000000e+00 : f32
    %cst_112 = arith.constant 0.000000e+00 : f32
    %528 = vector.broadcast %cst_111 : f32 to vector<16x16xf32>
    %529 = vector.broadcast %cst_112 : f32 to vector<16x16xf32>
    %530 = arith.select %527, %528, %529 : vector<16x16xi1>, vector<16x16xf32>
    %531 = vector.extract_strided_slice %522 {offsets = [0, 16], sizes = [16, 16], strides = [1, 1]} : vector<16x32xf32> to vector<16x16xf32>
    %cst_113 = arith.constant dense<0.000000e+00> : vector<16x16xf32>
    %532 = tpu.matmul %530, %531, %cst_113 {dimension_numbers = #tpu.dot_dimension_numbers<[1], [0], [0], [1], [0, 0, 1, 1], [], []>} : vector<16x16xf32>, vector<16x16xf32>, vector<16x16xf32> -> vector<16x16xf32>
    %533 = vector.extract_strided_slice %522 {offsets = [0, 0], sizes = [16, 16], strides = [1, 1]} : vector<16x32xf32> to vector<16x16xf32>
    %534 = tpu.concatenate %533, %532 in 1 : vector<16x16xf32>, vector<16x16xf32> -> vector<16x32xf32>
    %535 = tpu.transpose %534, [1, 0] : vector<16x32xf32> -> vector<32x16xf32>
    %c0_114 = arith.constant 0 : index
    %c0_115 = arith.constant 0 : index
    %536 = vector.load %arg7[%c0_114, %c0_115] : memref<32x96xf32, #tpu.memory_space<vmem>>, vector<32x96xf32>
    %cst_116 = arith.constant dense<0.000000e+00> : vector<16x96xf32>
    %537 = tpu.matmul %534, %536, %cst_116 {dimension_numbers = #tpu.dot_dimension_numbers<[1], [0], [0], [1], [0, 0, 1, 1], [], []>} : vector<16x32xf32>, vector<32x96xf32>, vector<16x96xf32> -> vector<16x96xf32>
    %c0_117 = arith.constant 0 : index
    %c0_118 = arith.constant 0 : index
    %538 = vector.load %arg8[%c0_117, %c0_118] : memref<1x96xf32, #tpu.memory_space<vmem>>, vector<1x96xf32>
    %539 = vector.broadcast %538 : vector<1x96xf32> to vector<16x96xf32>
    %540 = arith.addf %537, %539 : vector<16x96xf32>
    %c0_119 = arith.constant 0 : index
    %c0_120 = arith.constant 0 : index
    %541 = vector.load %arg14[%c0_119, %c0_120] : memref<16x96xf32, #tpu.memory_space<vmem>>, vector<16x96xf32>
    tpu.vector_store %arg14[%c0_119, %c0_120], %540 {strides = array<i32>} : memref<16x96xf32, #tpu.memory_space<vmem>>, vector<16x96xf32>,
    %c0_121 = arith.constant 0 : index
    %c0_122 = arith.constant 0 : index
    %542 = vector.load %arg9[%c0_121, %c0_122] : memref<32x96xf32, #tpu.memory_space<vmem>>, vector<32x96xf32>
    %c0_123 = arith.constant 0 : index
    %c0_124 = arith.constant 0 : index
    %543 = vector.load %arg10[%c0_123, %c0_124] : memref<1x32xf32, #tpu.memory_space<vmem>>, vector<1x32xf32>
    %544 = vector.extract_strided_slice %534 {offsets = [15, 0], sizes = [1, 32], strides = [1, 1]} : vector<16x32xf32> to vector<1x32xf32>
    %545 = tpu.iota {dimensions = array<i32: 1>} : vector<1x16xi32>
    %cst_125 = arith.constant 0.000000e+00 : f32
    %546 = vector.broadcast %cst_125 : f32 to vector<1x1xf32>
    %c0_i32_126 = arith.constant 0 : i32
    %547 = arith.index_cast %c0_i32_126 : i32 to index
    %548 = memref.load %arg1[%547] : memref<4xi32, #tpu.memory_space<smem>>
    %c1_i32_127 = arith.constant 1 : i32
    %549 = arith.addi %c0_i32_126, %c1_i32_127 : i32
    %550 = arith.index_cast %549 : i32 to index
    %551 = memref.load %arg1[%550] : memref<4xi32, #tpu.memory_space<smem>>
    %552 = arith.index_cast %548 : i32 to index
    %c0_128 = arith.constant 0 : index
    %553 = vector.load %arg14[%552, %c0_128] : memref<16x96xf32, #tpu.memory_space<vmem>>, vector<1x96xf32>
    %cst_129 = arith.constant dense<0.000000e+00> : vector<1x96xf32>
    %554 = tpu.matmul %544, %542, %cst_129 {dimension_numbers = #tpu.dot_dimension_numbers<[1], [0], [0], [1], [0, 0, 1, 1], [], []>} : vector<1x32xf32>, vector<32x96xf32>, vector<1x96xf32> -> vector<1x96xf32>
    %555 = vector.extract_strided_slice %553 {offsets = [0, 0], sizes = [1, 32], strides = [1, 1]} : vector<1x96xf32> to vector<1x32xf32>
    %556 = vector.extract_strided_slice %554 {offsets = [0, 0], sizes = [1, 32], strides = [1, 1]} : vector<1x96xf32> to vector<1x32xf32>
    %557 = arith.addf %555, %556 : vector<1x32xf32>
    %558 = arith.negf %557 : vector<1x32xf32>
    %559 = math.exp %558 : vector<1x32xf32>
    %cst_130 = arith.constant 1.000000e+00 : f32
    %560 = vector.broadcast %cst_130 : f32 to vector<1x32xf32>
    %561 = arith.addf %560, %559 : vector<1x32xf32>
    %562 = arith.divf %560, %561 : vector<1x32xf32>
    %563 = vector.extract_strided_slice %553 {offsets = [0, 32], sizes = [1, 32], strides = [1, 1]} : vector<1x96xf32> to vector<1x32xf32>
    %564 = vector.extract_strided_slice %554 {offsets = [0, 32], sizes = [1, 32], strides = [1, 1]} : vector<1x96xf32> to vector<1x32xf32>
    %565 = arith.addf %563, %564 : vector<1x32xf32>
    %566 = arith.negf %565 : vector<1x32xf32>
    %567 = math.exp %566 : vector<1x32xf32>
    %cst_131 = arith.constant 1.000000e+00 : f32
    %568 = vector.broadcast %cst_131 : f32 to vector<1x32xf32>
    %569 = arith.addf %568, %567 : vector<1x32xf32>
    %570 = arith.divf %568, %569 : vector<1x32xf32>
    %571 = vector.extract_strided_slice %553 {offsets = [0, 64], sizes = [1, 32], strides = [1, 1]} : vector<1x96xf32> to vector<1x32xf32>
    %572 = vector.extract_strided_slice %554 {offsets = [0, 64], sizes = [1, 32], strides = [1, 1]} : vector<1x96xf32> to vector<1x32xf32>
    %573 = arith.addf %572, %543 : vector<1x32xf32>
    %574 = arith.mulf %562, %573 : vector<1x32xf32>
    %575 = arith.addf %571, %574 : vector<1x32xf32>
    %576 = math.tanh %575 : vector<1x32xf32>
    %cst_132 = arith.constant 1.000000e+00 : f32
    %577 = vector.broadcast %cst_132 : f32 to vector<1x32xf32>
    %578 = arith.subf %577, %570 : vector<1x32xf32>
    %579 = arith.mulf %578, %576 : vector<1x32xf32>
    %580 = arith.mulf %570, %544 : vector<1x32xf32>
    %581 = arith.addf %579, %580 : vector<1x32xf32>
    %cst_133 = arith.constant dense<0.000000e+00> : vector<1x16xf32>
    %582 = tpu.matmul %581, %535, %cst_133 {dimension_numbers = #tpu.dot_dimension_numbers<[1], [0], [0], [1], [0, 0, 1, 1], [], []>} : vector<1x32xf32>, vector<32x16xf32>, vector<1x16xf32> -> vector<1x16xf32>
    %cst_134 = arith.constant 9.99999997E-7 : f32
    %583 = vector.broadcast %cst_134 : f32 to vector<1x16xf32>
    %584 = arith.addf %582, %583 : vector<1x16xf32>
    %585 = vector.broadcast %548 : i32 to vector<1x16xi32>
    %586 = arith.cmpi sge, %545, %585 : vector<1x16xi32>
    %cst_135 = arith.constant -1.000000e+30 : f32
    %587 = vector.broadcast %cst_135 : f32 to vector<1x16xf32>
    %588 = arith.select %586, %584, %587 : vector<1x16xi1>, vector<1x16xf32>
    %cst_136 = arith.constant dense<0xFF800000> : vector<1xf32>
    %589 = vector.multi_reduction <maximumf>, %588, %cst_136 [1] : vector<1x16xf32> to vector<1xf32>
    %590 = vector.shape_cast %589 : vector<1xf32> to vector<1x1xf32>
    %591 = vector.broadcast %590 : vector<1x1xf32> to vector<1x16xf32>
    %592 = arith.subf %588, %591 : vector<1x16xf32>
    %593 = math.exp %592 : vector<1x16xf32>
    %cst_137 = arith.constant dense<0.000000e+00> : vector<1xf32>
    %594 = vector.multi_reduction <add>, %593, %cst_137 [1] : vector<1x16xf32> to vector<1xf32>
    %595 = vector.shape_cast %594 : vector<1xf32> to vector<1x1xf32>
    %596 = math.log %595 : vector<1x1xf32>
    %597 = arith.addf %590, %596 : vector<1x1xf32>
    %598 = vector.broadcast %551 : i32 to vector<1x16xi32>
    %599 = arith.cmpi eq, %545, %598 : vector<1x16xi32>
    %cst_138 = arith.constant 0.000000e+00 : f32
    %600 = vector.broadcast %cst_138 : f32 to vector<1x16xf32>
    %601 = arith.select %599, %584, %600 : vector<1x16xi1>, vector<1x16xf32>
    %cst_139 = arith.constant dense<0.000000e+00> : vector<1xf32>
    %602 = vector.multi_reduction <add>, %601, %cst_139 [1] : vector<1x16xf32> to vector<1xf32>
    %603 = vector.shape_cast %602 : vector<1xf32> to vector<1x1xf32>
    %604 = arith.subf %597, %603 : vector<1x1xf32>
    %605 = arith.addf %546, %604 : vector<1x1xf32>
    %c1_i32_140 = arith.constant 1 : i32
    %606 = arith.index_cast %c1_i32_140 : i32 to index
    %607 = memref.load %arg1[%606] : memref<4xi32, #tpu.memory_space<smem>>
    %c1_i32_141 = arith.constant 1 : i32
    %608 = arith.addi %c1_i32_140, %c1_i32_141 : i32
    %609 = arith.index_cast %608 : i32 to index
    %610 = memref.load %arg1[%609] : memref<4xi32, #tpu.memory_space<smem>>
    %611 = arith.index_cast %607 : i32 to index
    %c0_142 = arith.constant 0 : index
    %612 = vector.load %arg14[%611, %c0_142] : memref<16x96xf32, #tpu.memory_space<vmem>>, vector<1x96xf32>
    %cst_143 = arith.constant dense<0.000000e+00> : vector<1x96xf32>
    %613 = tpu.matmul %581, %542, %cst_143 {dimension_numbers = #tpu.dot_dimension_numbers<[1], [0], [0], [1], [0, 0, 1, 1], [], []>} : vector<1x32xf32>, vector<32x96xf32>, vector<1x96xf32> -> vector<1x96xf32>
    %614 = vector.extract_strided_slice %612 {offsets = [0, 0], sizes = [1, 32], strides = [1, 1]} : vector<1x96xf32> to vector<1x32xf32>
    %615 = vector.extract_strided_slice %613 {offsets = [0, 0], sizes = [1, 32], strides = [1, 1]} : vector<1x96xf32> to vector<1x32xf32>
    %616 = arith.addf %614, %615 : vector<1x32xf32>
    %617 = arith.negf %616 : vector<1x32xf32>
    %618 = math.exp %617 : vector<1x32xf32>
    %cst_144 = arith.constant 1.000000e+00 : f32
    %619 = vector.broadcast %cst_144 : f32 to vector<1x32xf32>
    %620 = arith.addf %619, %618 : vector<1x32xf32>
    %621 = arith.divf %619, %620 : vector<1x32xf32>
    %622 = vector.extract_strided_slice %612 {offsets = [0, 32], sizes = [1, 32], strides = [1, 1]} : vector<1x96xf32> to vector<1x32xf32>
    %623 = vector.extract_strided_slice %613 {offsets = [0, 32], sizes = [1, 32], strides = [1, 1]} : vector<1x96xf32> to vector<1x32xf32>
    %624 = arith.addf %622, %623 : vector<1x32xf32>
    %625 = arith.negf %624 : vector<1x32xf32>
    %626 = math.exp %625 : vector<1x32xf32>
    %cst_145 = arith.constant 1.000000e+00 : f32
    %627 = vector.broadcast %cst_145 : f32 to vector<1x32xf32>
    %628 = arith.addf %627, %626 : vector<1x32xf32>
    %629 = arith.divf %627, %628 : vector<1x32xf32>
    %630 = vector.extract_strided_slice %612 {offsets = [0, 64], sizes = [1, 32], strides = [1, 1]} : vector<1x96xf32> to vector<1x32xf32>
    %631 = vector.extract_strided_slice %613 {offsets = [0, 64], sizes = [1, 32], strides = [1, 1]} : vector<1x96xf32> to vector<1x32xf32>
    %632 = arith.addf %631, %543 : vector<1x32xf32>
    %633 = arith.mulf %621, %632 : vector<1x32xf32>
    %634 = arith.addf %630, %633 : vector<1x32xf32>
    %635 = math.tanh %634 : vector<1x32xf32>
    %cst_146 = arith.constant 1.000000e+00 : f32
    %636 = vector.broadcast %cst_146 : f32 to vector<1x32xf32>
    %637 = arith.subf %636, %629 : vector<1x32xf32>
    %638 = arith.mulf %637, %635 : vector<1x32xf32>
    %639 = arith.mulf %629, %581 : vector<1x32xf32>
    %640 = arith.addf %638, %639 : vector<1x32xf32>
    %cst_147 = arith.constant dense<0.000000e+00> : vector<1x16xf32>
    %641 = tpu.matmul %640, %535, %cst_147 {dimension_numbers = #tpu.dot_dimension_numbers<[1], [0], [0], [1], [0, 0, 1, 1], [], []>} : vector<1x32xf32>, vector<32x16xf32>, vector<1x16xf32> -> vector<1x16xf32>
    %cst_148 = arith.constant 9.99999997E-7 : f32
    %642 = vector.broadcast %cst_148 : f32 to vector<1x16xf32>
    %643 = arith.addf %641, %642 : vector<1x16xf32>
    %644 = vector.broadcast %607 : i32 to vector<1x16xi32>
    %645 = arith.cmpi sge, %545, %644 : vector<1x16xi32>
    %cst_149 = arith.constant -1.000000e+30 : f32
    %646 = vector.broadcast %cst_149 : f32 to vector<1x16xf32>
    %647 = arith.select %645, %643, %646 : vector<1x16xi1>, vector<1x16xf32>
    %cst_150 = arith.constant dense<0xFF800000> : vector<1xf32>
    %648 = vector.multi_reduction <maximumf>, %647, %cst_150 [1] : vector<1x16xf32> to vector<1xf32>
    %649 = vector.shape_cast %648 : vector<1xf32> to vector<1x1xf32>
    %650 = vector.broadcast %649 : vector<1x1xf32> to vector<1x16xf32>
    %651 = arith.subf %647, %650 : vector<1x16xf32>
    %652 = math.exp %651 : vector<1x16xf32>
    %cst_151 = arith.constant dense<0.000000e+00> : vector<1xf32>
    %653 = vector.multi_reduction <add>, %652, %cst_151 [1] : vector<1x16xf32> to vector<1xf32>
    %654 = vector.shape_cast %653 : vector<1xf32> to vector<1x1xf32>
    %655 = math.log %654 : vector<1x1xf32>
    %656 = arith.addf %649, %655 : vector<1x1xf32>
    %657 = vector.broadcast %610 : i32 to vector<1x16xi32>
    %658 = arith.cmpi eq, %545, %657 : vector<1x16xi32>
    %cst_152 = arith.constant 0.000000e+00 : f32
    %659 = vector.broadcast %cst_152 : f32 to vector<1x16xf32>
    %660 = arith.select %658, %643, %659 : vector<1x16xi1>, vector<1x16xf32>
    %cst_153 = arith.constant dense<0.000000e+00> : vector<1xf32>
    %661 = vector.multi_reduction <add>, %660, %cst_153 [1] : vector<1x16xf32> to vector<1xf32>
    %662 = vector.shape_cast %661 : vector<1xf32> to vector<1x1xf32>
    %663 = arith.subf %656, %662 : vector<1x1xf32>
    %664 = arith.addf %605, %663 : vector<1x1xf32>
    %c2_i32_154 = arith.constant 2 : i32
    %665 = arith.index_cast %c2_i32_154 : i32 to index
    %666 = memref.load %arg1[%665] : memref<4xi32, #tpu.memory_space<smem>>
    %c1_i32_155 = arith.constant 1 : i32
    %667 = arith.addi %c2_i32_154, %c1_i32_155 : i32
    %668 = arith.index_cast %667 : i32 to index
    %669 = memref.load %arg1[%668] : memref<4xi32, #tpu.memory_space<smem>>
    %670 = arith.index_cast %666 : i32 to index
    %c0_156 = arith.constant 0 : index
    %671 = vector.load %arg14[%670, %c0_156] : memref<16x96xf32, #tpu.memory_space<vmem>>, vector<1x96xf32>
    %cst_157 = arith.constant dense<0.000000e+00> : vector<1x96xf32>
    %672 = tpu.matmul %640, %542, %cst_157 {dimension_numbers = #tpu.dot_dimension_numbers<[1], [0], [0], [1], [0, 0, 1, 1], [], []>} : vector<1x32xf32>, vector<32x96xf32>, vector<1x96xf32> -> vector<1x96xf32>
    %673 = vector.extract_strided_slice %671 {offsets = [0, 0], sizes = [1, 32], strides = [1, 1]} : vector<1x96xf32> to vector<1x32xf32>
    %674 = vector.extract_strided_slice %672 {offsets = [0, 0], sizes = [1, 32], strides = [1, 1]} : vector<1x96xf32> to vector<1x32xf32>
    %675 = arith.addf %673, %674 : vector<1x32xf32>
    %676 = arith.negf %675 : vector<1x32xf32>
    %677 = math.exp %676 : vector<1x32xf32>
    %cst_158 = arith.constant 1.000000e+00 : f32
    %678 = vector.broadcast %cst_158 : f32 to vector<1x32xf32>
    %679 = arith.addf %678, %677 : vector<1x32xf32>
    %680 = arith.divf %678, %679 : vector<1x32xf32>
    %681 = vector.extract_strided_slice %671 {offsets = [0, 32], sizes = [1, 32], strides = [1, 1]} : vector<1x96xf32> to vector<1x32xf32>
    %682 = vector.extract_strided_slice %672 {offsets = [0, 32], sizes = [1, 32], strides = [1, 1]} : vector<1x96xf32> to vector<1x32xf32>
    %683 = arith.addf %681, %682 : vector<1x32xf32>
    %684 = arith.negf %683 : vector<1x32xf32>
    %685 = math.exp %684 : vector<1x32xf32>
    %cst_159 = arith.constant 1.000000e+00 : f32
    %686 = vector.broadcast %cst_159 : f32 to vector<1x32xf32>
    %687 = arith.addf %686, %685 : vector<1x32xf32>
    %688 = arith.divf %686, %687 : vector<1x32xf32>
    %689 = vector.extract_strided_slice %671 {offsets = [0, 64], sizes = [1, 32], strides = [1, 1]} : vector<1x96xf32> to vector<1x32xf32>
    %690 = vector.extract_strided_slice %672 {offsets = [0, 64], sizes = [1, 32], strides = [1, 1]} : vector<1x96xf32> to vector<1x32xf32>
    %691 = arith.addf %690, %543 : vector<1x32xf32>
    %692 = arith.mulf %680, %691 : vector<1x32xf32>
    %693 = arith.addf %689, %692 : vector<1x32xf32>
    %694 = math.tanh %693 : vector<1x32xf32>
    %cst_160 = arith.constant 1.000000e+00 : f32
    %695 = vector.broadcast %cst_160 : f32 to vector<1x32xf32>
    %696 = arith.subf %695, %688 : vector<1x32xf32>
    %697 = arith.mulf %696, %694 : vector<1x32xf32>
    %698 = arith.mulf %688, %640 : vector<1x32xf32>
    %699 = arith.addf %697, %698 : vector<1x32xf32>
    %cst_161 = arith.constant dense<0.000000e+00> : vector<1x16xf32>
    %700 = tpu.matmul %699, %535, %cst_161 {dimension_numbers = #tpu.dot_dimension_numbers<[1], [0], [0], [1], [0, 0, 1, 1], [], []>} : vector<1x32xf32>, vector<32x16xf32>, vector<1x16xf32> -> vector<1x16xf32>
    %cst_162 = arith.constant 9.99999997E-7 : f32
    %701 = vector.broadcast %cst_162 : f32 to vector<1x16xf32>
    %702 = arith.addf %700, %701 : vector<1x16xf32>
    %703 = vector.broadcast %666 : i32 to vector<1x16xi32>
    %704 = arith.cmpi sge, %545, %703 : vector<1x16xi32>
    %cst_163 = arith.constant -1.000000e+30 : f32
    %705 = vector.broadcast %cst_163 : f32 to vector<1x16xf32>
    %706 = arith.select %704, %702, %705 : vector<1x16xi1>, vector<1x16xf32>
    %cst_164 = arith.constant dense<0xFF800000> : vector<1xf32>
    %707 = vector.multi_reduction <maximumf>, %706, %cst_164 [1] : vector<1x16xf32> to vector<1xf32>
    %708 = vector.shape_cast %707 : vector<1xf32> to vector<1x1xf32>
    %709 = vector.broadcast %708 : vector<1x1xf32> to vector<1x16xf32>
    %710 = arith.subf %706, %709 : vector<1x16xf32>
    %711 = math.exp %710 : vector<1x16xf32>
    %cst_165 = arith.constant dense<0.000000e+00> : vector<1xf32>
    %712 = vector.multi_reduction <add>, %711, %cst_165 [1] : vector<1x16xf32> to vector<1xf32>
    %713 = vector.shape_cast %712 : vector<1xf32> to vector<1x1xf32>
    %714 = math.log %713 : vector<1x1xf32>
    %715 = arith.addf %708, %714 : vector<1x1xf32>
    %716 = vector.broadcast %669 : i32 to vector<1x16xi32>
    %717 = arith.cmpi eq, %545, %716 : vector<1x16xi32>
    %cst_166 = arith.constant 0.000000e+00 : f32
    %718 = vector.broadcast %cst_166 : f32 to vector<1x16xf32>
    %719 = arith.select %717, %702, %718 : vector<1x16xi1>, vector<1x16xf32>
    %cst_167 = arith.constant dense<0.000000e+00> : vector<1xf32>
    %720 = vector.multi_reduction <add>, %719, %cst_167 [1] : vector<1x16xf32> to vector<1xf32>
    %721 = vector.shape_cast %720 : vector<1xf32> to vector<1x1xf32>
    %722 = arith.subf %715, %721 : vector<1x1xf32>
    %723 = arith.addf %664, %722 : vector<1x1xf32>
    %c3_i32_168 = arith.constant 3 : i32
    %c0_169 = arith.constant 0 : index
    %c0_170 = arith.constant 0 : index
    %724 = vector.load %arg11[%c0_169, %c0_170] : memref<1x1xf32, #tpu.memory_space<vmem>>, vector<1x1xf32>
    tpu.vector_store %arg11[%c0_169, %c0_170], %723 {strides = array<i32>} : memref<1x1xf32, #tpu.memory_space<vmem>>, vector<1x1xf32>,
    return
  }
  func.func @transform_0(%arg0: i32, %arg1: memref<4xi32, #tpu.memory_space<smem>>) -> (i32, i32) {
    %c0_i32 = arith.constant 0 : i32
    %c0_i32_0 = arith.constant 0 : i32
    %c0_i32_1 = arith.constant 0 : i32
    return %c0_i32, %c0_i32_0 : i32, i32
  }
  func.func @transform_1(%arg0: i32, %arg1: memref<4xi32, #tpu.memory_space<smem>>) -> (i32, i32) {
    %c0_i32 = arith.constant 0 : i32
    %c0_i32_0 = arith.constant 0 : i32
    %c0_i32_1 = arith.constant 0 : i32
    return %c0_i32, %c0_i32_0 : i32, i32
  }
  func.func @transform_2(%arg0: i32, %arg1: memref<4xi32, #tpu.memory_space<smem>>) -> (i32, i32) {
    %c0_i32 = arith.constant 0 : i32
    %c0_i32_0 = arith.constant 0 : i32
    %c0_i32_1 = arith.constant 0 : i32
    return %c0_i32, %c0_i32_0 : i32, i32
  }
  func.func @transform_3(%arg0: i32, %arg1: memref<4xi32, #tpu.memory_space<smem>>) -> (i32, i32) {
    %c0_i32 = arith.constant 0 : i32
    %c0_i32_0 = arith.constant 0 : i32
    %c0_i32_1 = arith.constant 0 : i32
    return %c0_i32, %c0_i32_0 : i32, i32
  }
  func.func @transform_4(%arg0: i32, %arg1: memref<4xi32, #tpu.memory_space<smem>>) -> (i32, i32) {
    %c0_i32 = arith.constant 0 : i32
    %c0_i32_0 = arith.constant 0 : i32
    %c0_i32_1 = arith.constant 0 : i32
    return %c0_i32, %c0_i32_0 : i32, i32
  }
  func.func @transform_5(%arg0: i32, %arg1: memref<4xi32, #tpu.memory_space<smem>>) -> (i32, i32) {
    %c0_i32 = arith.constant 0 : i32
    %c0_i32_0 = arith.constant 0 : i32
    %c0_i32_1 = arith.constant 0 : i32
    return %c0_i32, %c0_i32_0 : i32, i32
  }
  func.func @transform_6(%arg0: i32, %arg1: memref<4xi32, #tpu.memory_space<smem>>) -> (i32, i32) {
    %c0_i32 = arith.constant 0 : i32
    %c0_i32_0 = arith.constant 0 : i32
    %c0_i32_1 = arith.constant 0 : i32
    return %c0_i32, %c0_i32_0 : i32, i32
  }
  func.func @transform_7(%arg0: i32, %arg1: memref<4xi32, #tpu.memory_space<smem>>) -> (i32, i32) {
    %c0_i32 = arith.constant 0 : i32
    %c0_i32_0 = arith.constant 0 : i32
    %c0_i32_1 = arith.constant 0 : i32
    return %c0_i32, %c0_i32_0 : i32, i32
  }
  func.func @transform_8(%arg0: i32, %arg1: memref<4xi32, #tpu.memory_space<smem>>) -> (i32, i32) {
    %c0_i32 = arith.constant 0 : i32
    %c0_i32_0 = arith.constant 0 : i32
    %c0_i32_1 = arith.constant 0 : i32
    return %c0_i32, %c0_i32_0 : i32, i32
  }
  func.func @transform_9(%arg0: i32, %arg1: memref<4xi32, #tpu.memory_space<smem>>) -> (i32, i32) {
    %c0_i32 = arith.constant 0 : i32
    %c0_i32_0 = arith.constant 0 : i32
    %c0_i32_1 = arith.constant 0 : i32
    return %c0_i32, %c0_i32_0 : i32, i32
  }
}

</mosaic_0001>

<bundles_post_ra>
// kernel: tpu_custom_call.1
= control target key start
LH: loop header
LB: loop body
LE: loop exit
PB: predicated region body
PF: predicated region fallthrough
CT: control target
= control target key end

     0   :  { %s3480_s13 = smov [#allocation6]   ;;  %s4016_s0 = inlined_call_operand.hbm [shape: s32[4], index: 0, kind: input, shape index: {}]   ;;  %s4017_s1 = inlined_call_operand.hbm [shape: f32[16,64], index: 1, kind: input, shape index: {}]   ;;  %s4018_s2 = inlined_call_operand.hbm [shape: f32[64,96], index: 2, kind: input, shape index: {}]   ;;  %s4019_s3 = inlined_call_operand.vmem [shape: f32[1,96], index: 3, kind: input, shape index: {}]   ;;  %s4020_s4 = inlined_call_operand.hbm [shape: f32[32,96], index: 4, kind: input, shape index: {}]   ;;  %s4021_s5 = inlined_call_operand.vmem [shape: f32[1,32], index: 5, kind: input, shape index: {}]   ;;  %s4022_s6 = inlined_call_operand.hbm [shape: f32[32,96], index: 6, kind: input, shape index: {}]   ;;  %s4023_s7 = inlined_call_operand.vmem [shape: f32[1,96], index: 7, kind: input, shape index: {}]   ;;  %s4024_s8 = inlined_call_operand.hbm [shape: f32[32,96], index: 8, kind: input, shape index: {}]   ;;  %s4025_s9 = inlined_call_operand.vmem [shape: f32[1,32], index: 9, kind: input, shape index: {}]   ;;  %s4026_s10 = inlined_call_operand.hbm [shape: f32[1,1], index: 10, kind: output, shape index: {}]  }
   0x1   :  { %16 = dma.hbm_to_smem %s4016_s0, 16, %s3480_s13, [#allocation5] }
   0x2   :  { %3470 = dma.done.wait [#allocation5], 16 }
   0x3   :  { %3471 = vsyncadd [#allocation5], 4294967280 }
   0x4   :  { %18 = sfence }
   0x5   :  { %19 = vsyncpa [#allocation8], 0 }
   0x6   :  { %20 = vsyncpa [#allocation11], 0 }
   0x7   :  { %21 = vsyncpa [#allocation14], 0 }
   0x8   :  { %22 = vsyncpa [#allocation9], 0  ;;  %s3481_s16 = smov [#allocation10]   ;;  %s3482_s18 = smov [#allocation13]  }
   0x9   :  { %s40_s17 = sshll.u32 %s3481_s16, 4  ;;  %s68_s19 = sshll.u32 %s3482_s18, 4  ;;  %s41_s17 = int_to_ptr.vmem [resolvable:$true] %s40_s17  ;;  %s69_s19 = int_to_ptr.vmem [resolvable:$true] %s68_s19 }
   0xa   :  { %s3358_s20 = scalar_lea.vmem %s41_s17, 1024  ;;  %p3363_p1 = scmp.lt.s32.totalorder %s41_s17, %s41_s17 }
   0xb   :  { %p3359_p0 = scmp.ne.s32.totalorder %s41_s17, %s3358_s20  ;;  %p3364_p2 = scmp.lt.s32.totalorder %s3358_s20, %s3358_s20 }
   0xd   :  { %p3365_p3 = por %p3364_p2, %p3363_p1 }
   0xf   :  { %p3366_p4 = pnand %p3365_p3, %p3359_p0 }
  0x11   :  { %3369 = shalt.err (!%p3366_p4)
}
  0x12   :  { %s3483_s0 = smov 128   ;;  %s3484_s21 = smov 8  }
  0x13   :  { %46 = dma.hbm_to_vmem [thread:$0]  %s4018_s2, 1024, %s41_s17, [#allocation11], %s3483_s0, %s3483_s0, %s3484_s21  }
  0x14   :  { %s3378_s24 = scalar_lea.vmem %s69_s19, 512  ;;  %p3383_p6 = scmp.lt.s32.totalorder %s69_s19, %s69_s19 }
  0x15   :  { %p3379_p5 = scmp.ne.s32.totalorder %s69_s19, %s3378_s24  ;;  %p3384_p7 = scmp.lt.s32.totalorder %s3378_s24, %s3378_s24 }
  0x17   :  { %p3385_p8 = por %p3384_p7, %p3383_p6 }
  0x19   :  { %p3386_p9 = pnand %p3385_p8, %p3379_p5 }
  0x1b   :  { %3389 = shalt.err (!%p3386_p9)
}
  0x1c   :  { %74 = dma.hbm_to_vmem [thread:$0]  %s4022_s6, 512, %s69_s19, [#allocation14], %s3483_s0, %s3483_s0, %s3484_s21  }
  0x1d   :  { %s3485_s27 = smov [#allocation7]   ;;  %s3486_s29 = smov [#allocation12]  }
  0x1e   :  { %s28_s28 = sshll.u32 %s3485_s27, 4  ;;  %s54_s30 = sshll.u32 %s3486_s29, 4  ;;  %s29_s28 = int_to_ptr.vmem [resolvable:$true] %s28_s28  ;;  %s55_s30 = int_to_ptr.vmem [resolvable:$true] %s54_s30 }
  0x1f   :  { %s3398_s2 = scalar_lea.vmem %s29_s28, 256  ;;  %p3403_p11 = scmp.lt.s32.totalorder %s29_s28, %s29_s28 }
  0x20   :  { %p3399_p10 = scmp.ne.s32.totalorder %s29_s28, %s3398_s2  ;;  %p3404_p12 = scmp.lt.s32.totalorder %s3398_s2, %s3398_s2 }
  0x22   :  { %p3405_p13 = por %p3404_p12, %p3403_p11 }
  0x24   :  { %p3406_p0 = pnand %p3405_p13, %p3399_p10 }
  0x26   :  { %3409 = shalt.err (!%p3406_p0)
}
  0x27   :  { %34 = dma.hbm_to_vmem [thread:$0]  %s4017_s1, 256, %s29_s28, [#allocation8], %s3483_s0, %s3483_s0, %s3484_s21  }
  0x28   :  { %s3418_s6 = scalar_lea.vmem %s55_s30, 512  ;;  %p3423_p2 = scmp.lt.s32.totalorder %s55_s30, %s55_s30 }
  0x29   :  { %p3419_p1 = scmp.ne.s32.totalorder %s55_s30, %s3418_s6  ;;  %p3424_p3 = scmp.lt.s32.totalorder %s3418_s6, %s3418_s6 }
  0x2b   :  { %p3425_p4 = por %p3424_p3, %p3423_p2 }
  0x2d   :  { %p3426_p5 = pnand %p3425_p4, %p3419_p1 }
  0x2f   :  { %3429 = shalt.err (!%p3426_p5)
}
  0x30   :  { %60 = dma.hbm_to_vmem [thread:$0]  %s4020_s4, 512, %s55_s30, [#allocation11], %s3483_s0, %s3483_s0, %s3484_s21  }
  0x31   :  { %s3487_s15 = smov [#allocation15]  }
  0x32   :  { %s82_s16 = sshll.u32 %s3487_s15, 4  ;;  %s83_s16 = int_to_ptr.vmem [resolvable:$true] %s82_s16 }
  0x33   :  { %s3438_s17 = scalar_lea.vmem %s83_s16, 512  ;;  %p3443_p7 = scmp.lt.s32.totalorder %s83_s16, %s83_s16 }
  0x34   :  { %p3439_p6 = scmp.ne.s32.totalorder %s83_s16, %s3438_s17  ;;  %p3444_p8 = scmp.lt.s32.totalorder %s3438_s17, %s3438_s17 }
  0x36   :  { %p3445_p9 = por %p3444_p8, %p3443_p7 }
  0x38   :  { %p3446_p10 = pnand %p3445_p9, %p3439_p6 }
  0x3a   :  { %3449 = shalt.err (!%p3446_p10)
}
  0x3b   :  { %88 = dma.hbm_to_vmem [thread:$0]  %s4024_s8, 512, %s83_s16, [#allocation14], %s3483_s0, %s3483_s0, %s3484_s21  }
  0x3c   :  { %3472 = dma.done.wait [#allocation8], 256  }
  0x3d   :  { %3473 = vsyncadd [#allocation8], 4294967040 }
  0x3e   :  { %3474 = dma.done.wait [#allocation11], 1536  }
  0x3f   :  { %3475 = vsyncadd [#allocation11], 4294965760 }
  0x40   :  { %3476 = dma.done.wait [#allocation14], 1024  }
  0x41   :  { %3477 = vsyncadd [#allocation14], 4294966272  ;;  %v3488_v0 = vmov 0.0   ;;  %vm3489_vm0 = vmmov 0   ;;  %v115_v1 = vld [vmem:[#allocation10 + $0x38] sm:$0xff]  ;;  %v114_v3 = vld [vmem:[#allocation10 + $0x30] sm:$0xff] }
  0x42   :  { %2948 = vmatprep.subr.mxu1 %v3488_v0  ;;  %2956 = vmatprep.mubr.msk.f32.mxu1 %vm3489_vm0, %v3488_v0  ;;  %v3587_v2 = vld [vmem:[#allocation12 + $0x18] sm:$0xff]  ;;  %v3590_v4 = vld [vmem:[#allocation12 + $0x10] sm:$0xff]  ;;  %v113_v5 = vld [vmem:[#allocation10 + $0x28] sm:$0xff]  ;;  %vm123_vm1 = vcmask 523264   ;;  %s3490_s19 = smov 64   ;;  %vm205_vm2 = vcmask 785408  }
  0x43   :  { %2929 = vmatprep.subr.mxu0 %v115_v1  ;;  %2949 = vmatpush3.msra.mxu1 %v3587_v2  ;;  %v3593_v6 = vld [vmem:[#allocation12 + $0x8] sm:$0xff]  ;;  %v112_v7 = vld [vmem:[#allocation10 + $0x20] sm:$0xff]  ;;  %v111_v9 = vld [vmem:[#allocation10 + $0x18] sm:$0xff]  ;;  %vm327_vm3 = vcmask 253952   ;;  %vm214_vm4 = vcmask 261120   ;;  %s3492_s0 = smov 112  }
  0x44   :  { %2930 = vmatpush3.msra.mxu0 %v115_v1  ;;  %2950 = vmatprep.subr.mxu1 %v3488_v0  ;;  %v3597_v8 = vld [vmem:[#allocation12] sm:$0xff]  ;;  %v106_v10 = vld [vmem:[#allocation7] sm:$0xff]  ;;  %v109_v13 = vld [vmem:[#allocation10 + $0x8] sm:$0xff]  ;;  %vm1925_vm6 = vcmask 130048   ;;  %s3493_s21 = smov 16   ;;  %s3944_s25 = sld [smem:[#allocation6]] }
  0x45   :  { %2931 = vmatprep.subr.mxu0 %v114_v3  ;;  %2951 = vmatpush3.msra.mxu1 %v3590_v4  ;;  %v2750_v11 = vld [vmem:[%s4021_s5] ss:$0 sm:$0xff]  ;;  %v110_v12 = vld [vmem:[#allocation10 + $0x10] sm:$0xff]  ;;  %v107_v15 = vld [vmem:[#allocation7 + $0x8] sm:$0xff]  ;;  %s3971_s27 = sld [smem:[#allocation6 + $0x1]]  ;;  %vm2309_vm9 = vcmask 122880  }
  0x46   :  { %2932 = vmatpush3.msra.mxu0 %v114_v3  ;;  %2952 = vmatprep.subr.mxu1 %v3488_v0  ;;  %v108_v14 = vld [vmem:[#allocation10] sm:$0xff]  ;;  %s3988_s29 = sld [smem:[#allocation6 + $0x2]]  ;;  %s3495_s11 = smov [#allocation16]   ;;  %vm2724_vm15 = vcmask 0  }
  0x47   :  { %2933 = vmatprep.subr.mxu0 %v113_v5  ;;  %2953 = vmatpush3.msra.mxu1 %v3593_v6  ;;  %v2746_v21 = vld [vmem:[%s4019_s3] ss:$0 sm:$0xff]  ;;  %s3491_s3 = smov 96   ;;  %s2799_s2 = sld [smem:[#allocation6 + $0x3]] }
  0x48   :  { %2934 = vmatpush3.msra.mxu0 %v113_v5  ;;  %2954 = vmatprep.subr.mxu1 %v3488_v0  ;;  %s2732_s12 = sshll.u32 %s3495_s11, 4  ;;  %s2733_s12 = int_to_ptr.vmem [resolvable:$true] %s2732_s12 }
  0x49   :  { %2935 = vmatprep.subr.mxu0 %v112_v7  ;;  %2955 = vmatpush3.msra.mxu1 %v3597_v8  ;;  %s3450_s6 = scalar_lea.vmem %s2733_s12, 16  ;;  %s3454_s13 = scalar_lea.vmem %s2733_s12, 32 }
  0x4a   :  { %2936 = vmatpush3.msra.mxu0 %v112_v7  ;;  %2957 = vmatmul.mubr.f32.vlgmr.msra.gmra.mxu1 %v3488_v0  ;;  %s2118_s26 = scalar_lea.vmem [#allocation4], %s3944_s25  ;;  %p3451_p11 = scmp.ne.s32.totalorder %s2733_s12, %s3450_s6 }
  0x4b   :  { %2937 = vmatprep.subr.mxu0 %v111_v9  ;;  %2945 = vmatprep.mubr.msk.f32.mxu0 %vm123_vm1, %v106_v10  ;;  %s2331_s28 = scalar_lea.vmem [#allocation4], %s3971_s27  ;;  %p3455_p12 = scmp.lt.s32.totalorder %s2733_s12, %s2733_s12 }
  0x4c   :  { %2938 = vmatpush3.msra.mxu0 %v111_v9  ;;  %300 = vrot.lane.b32.xlu0 %v2750_v11, %s3490_s19  ;;  %s2528_s30 = scalar_lea.vmem [#allocation4], %s3988_s29  ;;  %p3456_p13 = scmp.lt.s32.totalorder %s3454_s13, %s3450_s6 }
  0x4d   :  { %2939 = vmatprep.subr.mxu0 %v110_v12  ;;  %2959 = vmatprep.subr.mxu1 %v3488_v0 }
  0x4e   :  { %2940 = vmatpush3.msra.mxu0 %v110_v12  ;;  %2960 = vmatpush3.msra.mxu1 %v3587_v2  ;;  %p3457_p0 = por %p3456_p13, %p3455_p12 }
  0x4f   :  { %2941 = vmatprep.subr.mxu0 %v109_v13  ;;  %2961 = vmatprep.subr.mxu1 %v3488_v0 }
  0x50   :  { %2942 = vmatpush3.msra.mxu0 %v109_v13  ;;  %2962 = vmatpush3.msra.mxu1 %v3590_v4  ;;  %p3458_p1 = pnand %p3457_p0, %p3451_p11 }
  0x51   :  { %2943 = vmatprep.subr.mxu0 %v108_v14  ;;  %2963 = vmatprep.subr.mxu1 %v3488_v0 }
  0x52   :  { %2944 = vmatpush3.msra.mxu0 %v108_v14  ;;  %2964 = vmatpush3.msra.mxu1 %v3593_v6 }
  0x53   :  { %2946 = vmatmul.mubr.msk.f32.vlgmr.msra.gmra.mxu0 %vm123_vm1, %v107_v15  ;;  %2965 = vmatprep.subr.mxu1 %v3488_v0 }
  0x54   :  { %2966 = vmatpush3.msra.mxu1 %v3597_v8  ;;  %2967 = vmatprep.mubr.msk.f32.mxu1 %vm3489_vm0, %v3488_v0 }
  0x55   :  { %2970 = vmatprep.subr.mxu0 %v3488_v0  ;;  %2978 = vmatprep.mubr.msk.f32.mxu0 %vm3489_vm0, %v3488_v0 }
  0x56   :  { %2971 = vmatpush3.msra.mxu0 %v3587_v2  ;;  %2981 = vmatprep.subr.mxu1 %v3488_v0 }
  0x57   :  { %2972 = vmatprep.subr.mxu0 %v3488_v0 }
  0x58   :  { %2973 = vmatpush3.msra.mxu0 %v3590_v4 }
  0x59   :  { %2974 = vmatprep.subr.mxu0 %v3488_v0 }
  0x5a   :  { %2975 = vmatpush3.msra.mxu0 %v3593_v6 }
  0x5b   :  { %2976 = vmatprep.subr.mxu0 %v3488_v0 }
  0x5c   :  { %2977 = vmatpush3.msra.mxu0 %v3597_v8 }
  0x5d   :  { %2992 = vmatprep.subr.mxu0 %v3488_v0 }
  0xbe   :  { %v3631_v16 = vpop.permute.xlu0 %300 }
 0x10a   :  { %v284_v17 = vpop.f32.mrf.mxu1 }
 0x10b   :  { %v303_v18 = vadd.f32 %v3631_v16, %v284_v17 }
 0x10c   :  { %v2958_v19 = vpop.f32.mrf.mxu1 }
 0x10d   :  { %305 = vrot.lane.b32.xlu0 %v303_v18, %s3490_s19 }
 0x113   :  { %v2947_v20 = vpop.f32.mrf.mxu0 }
 0x114   :  { %v202_v22 = vadd.f32 %v2947_v20, %v2746_v21 }
 0x115   :  { %v196_v23 = vpop.f32.mrf.mxu0 }
 0x116   :  { %207 = vst.msk [vmem:[#allocation2 + $0x8] sm:$0xff] %vm205_vm2, %v202_v22  ;;  %v197_v24 = vadd.f32 %v2746_v21, %v196_v23 }
 0x118   :  { %206 = vst.msk [vmem:[#allocation2] sm:$0xff] %vm205_vm2, %v197_v24 }
 0x11f   :  { %v213_v25 = vld [vmem:[#allocation2] sm:$0x1]  ;;  %v329_v45 = vld [vmem:[#allocation2 + $0x1] sm:$0x1]  ;;  %v434_v3 = vld [vmem:[#allocation2 + $0x2] sm:$0x1] }
 0x120   :  { %v288_v26 = vadd.f32 %v284_v17, %v213_v25 }
 0x122   :  { %v2749_v27 = vmul.f32 -1.442695, %v288_v26 }
 0x124   :  { %3212 = vpow2.f32 %v2749_v27  ;;  %v539_v27 = vld [vmem:[#allocation2 + $0x3] sm:$0x1] }
 0x131   :  { %v3213_v28 = vpop.eup %3212 }
 0x132   :  { %v292_v29 = vadd.f32 1.0, %v3213_v28 }
 0x134   :  { %3214 = vrcp.f32 %v292_v29 }
 0x141   :  { %v3215_v30 = vpop.eup %3214 }
 0x142   :  { %v315_v36 = vsub.f32 1.0, %v3215_v30  ;;  %v321_v38 = vmul.f32 0.0, %v3215_v30 }
 0x17f   :  { %v306_v31 = vpop.permute.xlu0 %305 }
 0x180   :  { %v308_v32 = vmul.f32 %v3215_v30, %v306_v31 }
 0x182   :  { %310 = vrot.lane.b32.xlu1 %v308_v32, %s3490_s19 }
 0x1f4   :  { %v311_v33 = vpop.permute.xlu1 %310 }
 0x1f5   :  { %v313_v34 = vadd.f32 %v311_v33, %v213_v25 }
 0x1f7   :  { %3216 = vtanh.f32 %v313_v34 }
 0x204   :  { %v3217_v35 = vpop.eup %3216 }
 0x205   :  { %317 = vrot.lane.b32.xlu1 %v3217_v35, %s3491_s3 }
 0x277   :  { %v318_v37 = vpop.permute.xlu1 %317 }
 0x278   :  { %v320_v39 = vmul.f32 %v318_v37, %v315_v36 }
 0x27a   :  { %v322_v40 = vadd.f32 %v321_v38, %v320_v39 }
 0x27c   :  { %324 = vrot.lane.b32.xlu0 %v322_v40, %s3491_s3 }
 0x2ee   :  { %v325_v41 = vpop.permute.xlu0 %324 }
 0x2ef   :  { %328 = vst.msk [vmem:[#allocation3] sm:$0x1] %vm327_vm3, %v325_v41  ;;  %2968 = vmatmul.mubr.msk.f32.vlgmr.msra.gmra.mxu1 %vm214_vm4, %v325_v41 }
 0x2f0   :  { %2982 = vmatpush3.msra.mxu1 %v3587_v2  ;;  %2989 = vmatprep.mubr.msk.f32.mxu1 %vm3489_vm0, %v3488_v0 }
 0x2f1   :  { %2983 = vmatprep.subr.mxu1 %v3488_v0 }
 0x2f2   :  { %2984 = vmatpush3.msra.mxu1 %v3590_v4 }
 0x2f3   :  { %2985 = vmatprep.subr.mxu1 %v3488_v0 }
 0x2f4   :  { %2986 = vmatpush3.msra.mxu1 %v3593_v6 }
 0x2f5   :  { %2987 = vmatprep.subr.mxu1 %v3488_v0 }
 0x2f6   :  { %2988 = vmatpush3.msra.mxu1 %v3597_v8 }
 0x2f7   :  { %3003 = vmatprep.subr.mxu1 %v3488_v0 }
 0x3af   :  { %v398_v42 = vpop.f32.mrf.mxu1 }
 0x3b0   :  { %v409_v43 = vadd.f32 %v398_v42, %v3631_v16  ;;  %v402_v46 = vadd.f32 %v398_v42, %v329_v45 }
 0x3b1   :  { %v2969_v44 = vpop.f32.mrf.mxu1 }
 0x3b2   :  { %411 = vrot.lane.b32.xlu1 %v409_v43, %s3490_s19  ;;  %v2752_v47 = vmul.f32 -1.442695, %v402_v46 }
 0x3b4   :  { %3218 = vpow2.f32 %v2752_v47  ;;  %v644_v47 = vld [vmem:[#allocation2 + $0x4] sm:$0x1] }
 0x3c1   :  { %v3219_v48 = vpop.eup %3218 }
 0x3c2   :  { %v406_v49 = vadd.f32 1.0, %v3219_v48 }
 0x3c4   :  { %3220 = vrcp.f32 %v406_v49 }
 0x3d1   :  { %v3221_v50 = vpop.eup %3220 }
 0x3d2   :  { %v421_v56 = vsub.f32 1.0, %v3221_v50  ;;  %v427_v58 = vmul.f32 %v3221_v50, %v322_v40 }
 0x424   :  { %v412_v51 = vpop.permute.xlu1 %411 }
 0x425   :  { %v414_v52 = vmul.f32 %v3221_v50, %v412_v51 }
 0x427   :  { %416 = vrot.lane.b32.xlu0 %v414_v52, %s3490_s19 }
 0x499   :  { %v417_v53 = vpop.permute.xlu0 %416 }
 0x49a   :  { %v419_v54 = vadd.f32 %v417_v53, %v329_v45 }
 0x49c   :  { %3222 = vtanh.f32 %v419_v54 }
 0x4a9   :  { %v3223_v55 = vpop.eup %3222 }
 0x4aa   :  { %423 = vrot.lane.b32.xlu1 %v3223_v55, %s3491_s3 }
 0x51c   :  { %v424_v57 = vpop.permute.xlu1 %423 }
 0x51d   :  { %v426_v59 = vmul.f32 %v424_v57, %v421_v56 }
 0x51f   :  { %v428_v60 = vadd.f32 %v427_v58, %v426_v59 }
 0x521   :  { %430 = vrot.lane.b32.xlu0 %v428_v60, %s3491_s3 }
 0x593   :  { %v431_v61 = vpop.permute.xlu0 %430 }
 0x594   :  { %433 = vst.msk [vmem:[#allocation3 + $0x1] sm:$0x1] %vm327_vm3, %v431_v61  ;;  %2979 = vmatmul.mubr.msk.f32.vlgmr.msra.gmra.mxu0 %vm214_vm4, %v431_v61 }
 0x595   :  { %2993 = vmatpush3.msra.mxu0 %v3587_v2  ;;  %3000 = vmatprep.mubr.msk.f32.mxu0 %vm3489_vm0, %v3488_v0 }
 0x596   :  { %2994 = vmatprep.subr.mxu0 %v3488_v0 }
 0x597   :  { %2995 = vmatpush3.msra.mxu0 %v3590_v4 }
 0x598   :  { %2996 = vmatprep.subr.mxu0 %v3488_v0 }
 0x599   :  { %2997 = vmatpush3.msra.mxu0 %v3593_v6 }
 0x59a   :  { %2998 = vmatprep.subr.mxu0 %v3488_v0 }
 0x59b   :  { %2999 = vmatpush3.msra.mxu0 %v3597_v8 }
 0x59c   :  { %3014 = vmatprep.subr.mxu0 %v3488_v0 }
 0x654   :  { %v503_v62 = vpop.f32.mrf.mxu0 }
 0x655   :  { %v514_v63 = vadd.f32 %v503_v62, %v3631_v16  ;;  %v507_v5 = vadd.f32 %v503_v62, %v434_v3 }
 0x656   :  { %v2980_v1 = vpop.f32.mrf.mxu0 }
 0x657   :  { %516 = vrot.lane.b32.xlu1 %v514_v63, %s3490_s19  ;;  %v2754_v7 = vmul.f32 -1.442695, %v507_v5 }
 0x659   :  { %3224 = vpow2.f32 %v2754_v7  ;;  %v749_v7 = vld [vmem:[#allocation2 + $0x5] sm:$0x1] }
 0x666   :  { %v3225_v9 = vpop.eup %3224 }
 0x667   :  { %v511_v10 = vadd.f32 1.0, %v3225_v9 }
 0x669   :  { %3226 = vrcp.f32 %v511_v10 }
 0x676   :  { %v3227_v11 = vpop.eup %3226 }
 0x677   :  { %v526_v18 = vsub.f32 1.0, %v3227_v11  ;;  %v532_v20 = vmul.f32 %v3227_v11, %v428_v60 }
 0x6c9   :  { %v517_v12 = vpop.permute.xlu1 %516 }
 0x6ca   :  { %v519_v13 = vmul.f32 %v3227_v11, %v517_v12 }
 0x6cc   :  { %521 = vrot.lane.b32.xlu0 %v519_v13, %s3490_s19 }
 0x73e   :  { %v522_v14 = vpop.permute.xlu0 %521 }
 0x73f   :  { %v524_v15 = vadd.f32 %v522_v14, %v434_v3 }
 0x741   :  { %3228 = vtanh.f32 %v524_v15 }
 0x74e   :  { %v3229_v17 = vpop.eup %3228 }
 0x74f   :  { %528 = vrot.lane.b32.xlu1 %v3229_v17, %s3491_s3 }
 0x7c1   :  { %v529_v19 = vpop.permute.xlu1 %528 }
 0x7c2   :  { %v531_v21 = vmul.f32 %v529_v19, %v526_v18 }
 0x7c4   :  { %v533_v22 = vadd.f32 %v532_v20, %v531_v21 }
 0x7c6   :  { %535 = vrot.lane.b32.xlu0 %v533_v22, %s3491_s3 }
 0x838   :  { %v536_v23 = vpop.permute.xlu0 %535 }
 0x839   :  { %538 = vst.msk [vmem:[#allocation3 + $0x2] sm:$0x1] %vm327_vm3, %v536_v23  ;;  %2990 = vmatmul.mubr.msk.f32.vlgmr.msra.gmra.mxu1 %vm214_vm4, %v536_v23 }
 0x83a   :  { %3004 = vmatpush3.msra.mxu1 %v3587_v2  ;;  %3011 = vmatprep.mubr.msk.f32.mxu1 %vm3489_vm0, %v3488_v0 }
 0x83b   :  { %3005 = vmatprep.subr.mxu1 %v3488_v0 }
 0x83c   :  { %3006 = vmatpush3.msra.mxu1 %v3590_v4 }
 0x83d   :  { %3007 = vmatprep.subr.mxu1 %v3488_v0 }
 0x83e   :  { %3008 = vmatpush3.msra.mxu1 %v3593_v6 }
 0x83f   :  { %3009 = vmatprep.subr.mxu1 %v3488_v0 }
 0x840   :  { %3010 = vmatpush3.msra.mxu1 %v3597_v8 }
 0x841   :  { %3025 = vmatprep.subr.mxu1 %v3488_v0 }
 0x8f9   :  { %v608_v24 = vpop.f32.mrf.mxu1 }
 0x8fa   :  { %v619_v25 = vadd.f32 %v608_v24, %v3631_v16  ;;  %v612_v28 = vadd.f32 %v608_v24, %v539_v27 }
 0x8fb   :  { %v2991_v26 = vpop.f32.mrf.mxu1 }
 0x8fc   :  { %621 = vrot.lane.b32.xlu1 %v619_v25, %s3490_s19  ;;  %v2756_v29 = vmul.f32 -1.442695, %v612_v28 }
 0x8fe   :  { %3230 = vpow2.f32 %v2756_v29  ;;  %v854_v29 = vld [vmem:[#allocation2 + $0x6] sm:$0x1] }
 0x90b   :  { %v3231_v30 = vpop.eup %3230 }
 0x90c   :  { %v616_v31 = vadd.f32 1.0, %v3231_v30 }
 0x90e   :  { %3232 = vrcp.f32 %v616_v31 }
 0x91b   :  { %v3233_v32 = vpop.eup %3232 }
 0x91c   :  { %v631_v38 = vsub.f32 1.0, %v3233_v32  ;;  %v637_v40 = vmul.f32 %v3233_v32, %v533_v22 }
 0x96e   :  { %v622_v33 = vpop.permute.xlu1 %621 }
 0x96f   :  { %v624_v34 = vmul.f32 %v3233_v32, %v622_v33 }
 0x971   :  { %626 = vrot.lane.b32.xlu0 %v624_v34, %s3490_s19 }
 0x9e3   :  { %v627_v35 = vpop.permute.xlu0 %626 }
 0x9e4   :  { %v629_v36 = vadd.f32 %v627_v35, %v539_v27 }
 0x9e6   :  { %3234 = vtanh.f32 %v629_v36 }
 0x9f3   :  { %v3235_v37 = vpop.eup %3234 }
 0x9f4   :  { %633 = vrot.lane.b32.xlu1 %v3235_v37, %s3491_s3 }
 0xa66   :  { %v634_v39 = vpop.permute.xlu1 %633 }
 0xa67   :  { %v636_v41 = vmul.f32 %v634_v39, %v631_v38 }
 0xa69   :  { %v638_v42 = vadd.f32 %v637_v40, %v636_v41 }
 0xa6b   :  { %640 = vrot.lane.b32.xlu0 %v638_v42, %s3491_s3 }
 0xadd   :  { %v641_v43 = vpop.permute.xlu0 %640 }
 0xade   :  { %643 = vst.msk [vmem:[#allocation3 + $0x3] sm:$0x1] %vm327_vm3, %v641_v43  ;;  %3001 = vmatmul.mubr.msk.f32.vlgmr.msra.gmra.mxu0 %vm214_vm4, %v641_v43 }
 0xadf   :  { %3015 = vmatpush3.msra.mxu0 %v3587_v2  ;;  %3022 = vmatprep.mubr.msk.f32.mxu0 %vm3489_vm0, %v3488_v0 }
 0xae0   :  { %3016 = vmatprep.subr.mxu0 %v3488_v0 }
 0xae1   :  { %3017 = vmatpush3.msra.mxu0 %v3590_v4 }
 0xae2   :  { %3018 = vmatprep.subr.mxu0 %v3488_v0 }
 0xae3   :  { %3019 = vmatpush3.msra.mxu0 %v3593_v6 }
 0xae4   :  { %3020 = vmatprep.subr.mxu0 %v3488_v0 }
 0xae5   :  { %3021 = vmatpush3.msra.mxu0 %v3597_v8 }
 0xae6   :  { %3036 = vmatprep.subr.mxu0 %v3488_v0 }
 0xb9e   :  { %v713_v44 = vpop.f32.mrf.mxu0 }
 0xb9f   :  { %v724_v45 = vadd.f32 %v713_v44, %v3631_v16  ;;  %v717_v48 = vadd.f32 %v713_v44, %v644_v47 }
 0xba0   :  { %v3002_v46 = vpop.f32.mrf.mxu0 }
 0xba1   :  { %726 = vrot.lane.b32.xlu1 %v724_v45, %s3490_s19  ;;  %v2758_v49 = vmul.f32 -1.442695, %v717_v48 }
 0xba3   :  { %3236 = vpow2.f32 %v2758_v49  ;;  %v959_v49 = vld [vmem:[#allocation2 + $0x7] sm:$0x1] }
 0xbb0   :  { %v3237_v50 = vpop.eup %3236 }
 0xbb1   :  { %v721_v51 = vadd.f32 1.0, %v3237_v50 }
 0xbb3   :  { %3238 = vrcp.f32 %v721_v51 }
 0xbc0   :  { %v3239_v52 = vpop.eup %3238 }
 0xbc1   :  { %v736_v58 = vsub.f32 1.0, %v3239_v52  ;;  %v742_v60 = vmul.f32 %v3239_v52, %v638_v42 }
 0xc13   :  { %v727_v53 = vpop.permute.xlu1 %726 }
 0xc14   :  { %v729_v54 = vmul.f32 %v3239_v52, %v727_v53 }
 0xc16   :  { %731 = vrot.lane.b32.xlu0 %v729_v54, %s3490_s19 }
 0xc88   :  { %v732_v55 = vpop.permute.xlu0 %731 }
 0xc89   :  { %v734_v56 = vadd.f32 %v732_v55, %v644_v47 }
 0xc8b   :  { %3240 = vtanh.f32 %v734_v56 }
 0xc98   :  { %v3241_v57 = vpop.eup %3240 }
 0xc99   :  { %738 = vrot.lane.b32.xlu1 %v3241_v57, %s3491_s3 }
 0xd0b   :  { %v739_v59 = vpop.permute.xlu1 %738 }
 0xd0c   :  { %v741_v61 = vmul.f32 %v739_v59, %v736_v58 }
 0xd0e   :  { %v743_v62 = vadd.f32 %v742_v60, %v741_v61 }
 0xd10   :  { %745 = vrot.lane.b32.xlu0 %v743_v62, %s3491_s3 }
 0xd82   :  { %v746_v63 = vpop.permute.xlu0 %745 }
 0xd83   :  { %748 = vst.msk [vmem:[#allocation3 + $0x4] sm:$0x1] %vm327_vm3, %v746_v63  ;;  %3012 = vmatmul.mubr.msk.f32.vlgmr.msra.gmra.mxu1 %vm214_vm4, %v746_v63 }
 0xd84   :  { %3026 = vmatpush3.msra.mxu1 %v3587_v2  ;;  %3033 = vmatprep.mubr.msk.f32.mxu1 %vm3489_vm0, %v3488_v0 }
 0xd85   :  { %3027 = vmatprep.subr.mxu1 %v3488_v0 }
 0xd86   :  { %3028 = vmatpush3.msra.mxu1 %v3590_v4 }
 0xd87   :  { %3029 = vmatprep.subr.mxu1 %v3488_v0 }
 0xd88   :  { %3030 = vmatpush3.msra.mxu1 %v3593_v6 }
 0xd89   :  { %3031 = vmatprep.subr.mxu1 %v3488_v0 }
 0xd8a   :  { %3032 = vmatpush3.msra.mxu1 %v3597_v8 }
 0xd8b   :  { %3047 = vmatprep.subr.mxu1 %v3488_v0 }
 0xe43   :  { %v818_v1 = vpop.f32.mrf.mxu1 }
 0xe44   :  { %v829_v3 = vadd.f32 %v818_v1, %v3631_v16  ;;  %v822_v9 = vadd.f32 %v818_v1, %v749_v7 }
 0xe45   :  { %v3013_v5 = vpop.f32.mrf.mxu1 }
 0xe46   :  { %831 = vrot.lane.b32.xlu1 %v829_v3, %s3490_s19  ;;  %v2760_v10 = vmul.f32 -1.442695, %v822_v9 }
 0xe48   :  { %3242 = vpow2.f32 %v2760_v10  ;;  %v1064_v10 = vld [vmem:[#allocation2 + $0x8] sm:$0x1] }
 0xe55   :  { %v3243_v11 = vpop.eup %3242 }
 0xe56   :  { %v826_v12 = vadd.f32 1.0, %v3243_v11 }
 0xe58   :  { %3244 = vrcp.f32 %v826_v12 }
 0xe65   :  { %v3245_v13 = vpop.eup %3244 }
 0xe66   :  { %v841_v20 = vsub.f32 1.0, %v3245_v13  ;;  %v847_v22 = vmul.f32 %v3245_v13, %v743_v62 }
 0xeb8   :  { %v832_v14 = vpop.permute.xlu1 %831 }
 0xeb9   :  { %v834_v15 = vmul.f32 %v3245_v13, %v832_v14 }
 0xebb   :  { %836 = vrot.lane.b32.xlu0 %v834_v15, %s3490_s19 }
 0xf2d   :  { %v837_v17 = vpop.permute.xlu0 %836 }
 0xf2e   :  { %v839_v18 = vadd.f32 %v837_v17, %v749_v7 }
 0xf30   :  { %3246 = vtanh.f32 %v839_v18 }
 0xf3d   :  { %v3247_v19 = vpop.eup %3246 }
 0xf3e   :  { %843 = vrot.lane.b32.xlu1 %v3247_v19, %s3491_s3 }
 0xfb0   :  { %v844_v21 = vpop.permute.xlu1 %843 }
 0xfb1   :  { %v846_v23 = vmul.f32 %v844_v21, %v841_v20 }
 0xfb3   :  { %v848_v24 = vadd.f32 %v847_v22, %v846_v23 }
 0xfb5   :  { %850 = vrot.lane.b32.xlu0 %v848_v24, %s3491_s3 }
0x1027   :  { %v851_v25 = vpop.permute.xlu0 %850 }
0x1028   :  { %853 = vst.msk [vmem:[#allocation3 + $0x5] sm:$0x1] %vm327_vm3, %v851_v25  ;;  %3023 = vmatmul.mubr.msk.f32.vlgmr.msra.gmra.mxu0 %vm214_vm4, %v851_v25 }
0x1029   :  { %3037 = vmatpush3.msra.mxu0 %v3587_v2  ;;  %3044 = vmatprep.mubr.msk.f32.mxu0 %vm3489_vm0, %v3488_v0 }
0x102a   :  { %3038 = vmatprep.subr.mxu0 %v3488_v0 }
0x102b   :  { %3039 = vmatpush3.msra.mxu0 %v3590_v4 }
0x102c   :  { %3040 = vmatprep.subr.mxu0 %v3488_v0 }
0x102d   :  { %3041 = vmatpush3.msra.mxu0 %v3593_v6 }
0x102e   :  { %3042 = vmatprep.subr.mxu0 %v3488_v0 }
0x102f   :  { %3043 = vmatpush3.msra.mxu0 %v3597_v8 }
0x1030   :  { %3058 = vmatprep.subr.mxu0 %v3488_v0 }
0x10e8   :  { %v923_v26 = vpop.f32.mrf.mxu0 }
0x10e9   :  { %v934_v27 = vadd.f32 %v923_v26, %v3631_v16  ;;  %v927_v30 = vadd.f32 %v923_v26, %v854_v29 }
0x10ea   :  { %v3024_v28 = vpop.f32.mrf.mxu0 }
0x10eb   :  { %936 = vrot.lane.b32.xlu1 %v934_v27, %s3490_s19  ;;  %v2762_v31 = vmul.f32 -1.442695, %v927_v30 }
0x10ed   :  { %3248 = vpow2.f32 %v2762_v31  ;;  %v1169_v31 = vld [vmem:[#allocation2 + $0x9] sm:$0x1] }
0x10fa   :  { %v3249_v32 = vpop.eup %3248 }
0x10fb   :  { %v931_v33 = vadd.f32 1.0, %v3249_v32 }
0x10fd   :  { %3250 = vrcp.f32 %v931_v33 }
0x110a   :  { %v3251_v34 = vpop.eup %3250 }
0x110b   :  { %v946_v40 = vsub.f32 1.0, %v3251_v34  ;;  %v952_v42 = vmul.f32 %v3251_v34, %v848_v24 }
0x115d   :  { %v937_v35 = vpop.permute.xlu1 %936 }
0x115e   :  { %v939_v36 = vmul.f32 %v3251_v34, %v937_v35 }
0x1160   :  { %941 = vrot.lane.b32.xlu0 %v939_v36, %s3490_s19 }
0x11d2   :  { %v942_v37 = vpop.permute.xlu0 %941 }
0x11d3   :  { %v944_v38 = vadd.f32 %v942_v37, %v854_v29 }
0x11d5   :  { %3252 = vtanh.f32 %v944_v38 }
0x11e2   :  { %v3253_v39 = vpop.eup %3252 }
0x11e3   :  { %948 = vrot.lane.b32.xlu1 %v3253_v39, %s3491_s3 }
0x1255   :  { %v949_v41 = vpop.permute.xlu1 %948 }
0x1256   :  { %v951_v43 = vmul.f32 %v949_v41, %v946_v40 }
0x1258   :  { %v953_v44 = vadd.f32 %v952_v42, %v951_v43 }
0x125a   :  { %955 = vrot.lane.b32.xlu0 %v953_v44, %s3491_s3 }
0x12cc   :  { %v956_v45 = vpop.permute.xlu0 %955 }
0x12cd   :  { %958 = vst.msk [vmem:[#allocation3 + $0x6] sm:$0x1] %vm327_vm3, %v956_v45  ;;  %3034 = vmatmul.mubr.msk.f32.vlgmr.msra.gmra.mxu1 %vm214_vm4, %v956_v45 }
0x12ce   :  { %3048 = vmatpush3.msra.mxu1 %v3587_v2  ;;  %3055 = vmatprep.mubr.msk.f32.mxu1 %vm3489_vm0, %v3488_v0 }
0x12cf   :  { %3049 = vmatprep.subr.mxu1 %v3488_v0 }
0x12d0   :  { %3050 = vmatpush3.msra.mxu1 %v3590_v4 }
0x12d1   :  { %3051 = vmatprep.subr.mxu1 %v3488_v0 }
0x12d2   :  { %3052 = vmatpush3.msra.mxu1 %v3593_v6 }
0x12d3   :  { %3053 = vmatprep.subr.mxu1 %v3488_v0 }
0x12d4   :  { %3054 = vmatpush3.msra.mxu1 %v3597_v8 }
0x12d5   :  { %3069 = vmatprep.subr.mxu1 %v3488_v0 }
0x138d   :  { %v1028_v46 = vpop.f32.mrf.mxu1 }
0x138e   :  { %v1039_v47 = vadd.f32 %v1028_v46, %v3631_v16  ;;  %v1032_v50 = vadd.f32 %v1028_v46, %v959_v49 }
0x138f   :  { %v3035_v48 = vpop.f32.mrf.mxu1 }
0x1390   :  { %1041 = vrot.lane.b32.xlu1 %v1039_v47, %s3490_s19  ;;  %v2764_v51 = vmul.f32 -1.442695, %v1032_v50 }
0x1392   :  { %3254 = vpow2.f32 %v2764_v51  ;;  %v1274_v51 = vld [vmem:[#allocation2 + $0xa] sm:$0x1] }
0x139f   :  { %v3255_v52 = vpop.eup %3254 }
0x13a0   :  { %v1036_v53 = vadd.f32 1.0, %v3255_v52 }
0x13a2   :  { %3256 = vrcp.f32 %v1036_v53 }
0x13af   :  { %v3257_v54 = vpop.eup %3256 }
0x13b0   :  { %v1051_v60 = vsub.f32 1.0, %v3257_v54  ;;  %v1057_v62 = vmul.f32 %v3257_v54, %v953_v44 }
0x1402   :  { %v1042_v55 = vpop.permute.xlu1 %1041 }
0x1403   :  { %v1044_v56 = vmul.f32 %v3257_v54, %v1042_v55 }
0x1405   :  { %1046 = vrot.lane.b32.xlu0 %v1044_v56, %s3490_s19 }
0x1477   :  { %v1047_v57 = vpop.permute.xlu0 %1046 }
0x1478   :  { %v1049_v58 = vadd.f32 %v1047_v57, %v959_v49 }
0x147a   :  { %3258 = vtanh.f32 %v1049_v58 }
0x1487   :  { %v3259_v59 = vpop.eup %3258 }
0x1488   :  { %1053 = vrot.lane.b32.xlu1 %v3259_v59, %s3491_s3 }
0x14fa   :  { %v1054_v61 = vpop.permute.xlu1 %1053 }
0x14fb   :  { %v1056_v63 = vmul.f32 %v1054_v61, %v1051_v60 }
0x14fd   :  { %v1058_v1 = vadd.f32 %v1057_v62, %v1056_v63 }
0x14ff   :  { %1060 = vrot.lane.b32.xlu0 %v1058_v1, %s3491_s3 }
0x1571   :  { %v1061_v3 = vpop.permute.xlu0 %1060 }
0x1572   :  { %1063 = vst.msk [vmem:[#allocation3 + $0x7] sm:$0x1] %vm327_vm3, %v1061_v3  ;;  %3045 = vmatmul.mubr.msk.f32.vlgmr.msra.gmra.mxu0 %vm214_vm4, %v1061_v3 }
0x1573   :  { %3059 = vmatpush3.msra.mxu0 %v3587_v2  ;;  %3066 = vmatprep.mubr.msk.f32.mxu0 %vm3489_vm0, %v3488_v0 }
0x1574   :  { %3060 = vmatprep.subr.mxu0 %v3488_v0 }
0x1575   :  { %3061 = vmatpush3.msra.mxu0 %v3590_v4 }
0x1576   :  { %3062 = vmatprep.subr.mxu0 %v3488_v0 }
0x1577   :  { %3063 = vmatpush3.msra.mxu0 %v3593_v6 }
0x1578   :  { %3064 = vmatprep.subr.mxu0 %v3488_v0 }
0x1579   :  { %3065 = vmatpush3.msra.mxu0 %v3597_v8 }
0x157a   :  { %3080 = vmatprep.subr.mxu0 %v3488_v0 }
0x1632   :  { %v1133_v5 = vpop.f32.mrf.mxu0 }
0x1633   :  { %v1144_v7 = vadd.f32 %v1133_v5, %v3631_v16  ;;  %v1137_v11 = vadd.f32 %v1133_v5, %v1064_v10 }
0x1634   :  { %v3046_v9 = vpop.f32.mrf.mxu0 }
0x1635   :  { %1146 = vrot.lane.b32.xlu1 %v1144_v7, %s3490_s19  ;;  %v2766_v12 = vmul.f32 -1.442695, %v1137_v11  ;;  %v1379_v11 = vld [vmem:[#allocation2 + $0xb] sm:$0x1] }
0x1637   :  { %3260 = vpow2.f32 %v2766_v12 }
0x1644   :  { %v3261_v13 = vpop.eup %3260 }
0x1645   :  { %v1141_v14 = vadd.f32 1.0, %v3261_v13 }
0x1647   :  { %3262 = vrcp.f32 %v1141_v14 }
0x1654   :  { %v3263_v15 = vpop.eup %3262 }
0x1655   :  { %v1156_v22 = vsub.f32 1.0, %v3263_v15  ;;  %v1162_v24 = vmul.f32 %v3263_v15, %v1058_v1 }
0x16a7   :  { %v1147_v17 = vpop.permute.xlu1 %1146 }
0x16a8   :  { %v1149_v18 = vmul.f32 %v3263_v15, %v1147_v17 }
0x16aa   :  { %1151 = vrot.lane.b32.xlu0 %v1149_v18, %s3490_s19 }
0x171c   :  { %v1152_v19 = vpop.permute.xlu0 %1151 }
0x171d   :  { %v1154_v20 = vadd.f32 %v1152_v19, %v1064_v10 }
0x171f   :  { %3264 = vtanh.f32 %v1154_v20 }
0x172c   :  { %v3265_v21 = vpop.eup %3264 }
0x172d   :  { %1158 = vrot.lane.b32.xlu1 %v3265_v21, %s3491_s3 }
0x179f   :  { %v1159_v23 = vpop.permute.xlu1 %1158 }
0x17a0   :  { %v1161_v25 = vmul.f32 %v1159_v23, %v1156_v22 }
0x17a2   :  { %v1163_v26 = vadd.f32 %v1162_v24, %v1161_v25 }
0x17a4   :  { %1165 = vrot.lane.b32.xlu0 %v1163_v26, %s3491_s3 }
0x1816   :  { %v1166_v27 = vpop.permute.xlu0 %1165 }
0x1817   :  { %1168 = vst.msk [vmem:[#allocation3 + $0x8] sm:$0x1] %vm327_vm3, %v1166_v27  ;;  %3056 = vmatmul.mubr.msk.f32.vlgmr.msra.gmra.mxu1 %vm214_vm4, %v1166_v27  ;;  %v3339_v27 = vld [vmem:[#allocation12 + $0x10] sm:$0xff] }
0x1818   :  { %3070 = vmatpush3.msra.mxu1 %v3587_v2  ;;  %3077 = vmatprep.mubr.msk.f32.mxu1 %vm3489_vm0, %v3488_v0 }
0x1819   :  { %3071 = vmatprep.subr.mxu1 %v3488_v0 }
0x181a   :  { %3072 = vmatpush3.msra.mxu1 %v3590_v4 }
0x181b   :  { %3073 = vmatprep.subr.mxu1 %v3488_v0 }
0x181c   :  { %3074 = vmatpush3.msra.mxu1 %v3593_v6 }
0x181d   :  { %3075 = vmatprep.subr.mxu1 %v3488_v0 }
0x181e   :  { %3076 = vmatpush3.msra.mxu1 %v3597_v8 }
0x181f   :  { %3091 = vmatprep.subr.mxu1 %v3488_v0 }
0x18d7   :  { %v1238_v28 = vpop.f32.mrf.mxu1 }
0x18d8   :  { %v1249_v29 = vadd.f32 %v1238_v28, %v3631_v16  ;;  %v1242_v32 = vadd.f32 %v1238_v28, %v1169_v31  ;;  %v3340_v28 = vld [vmem:[#allocation12 + $0x8] sm:$0xff] }
0x18d9   :  { %v3057_v30 = vpop.f32.mrf.mxu1 }
0x18da   :  { %1251 = vrot.lane.b32.xlu1 %v1249_v29, %s3490_s19  ;;  %v2768_v33 = vmul.f32 -1.442695, %v1242_v32  ;;  %v3341_v29 = vld [vmem:[#allocation12] sm:$0xff] }
0x18dc   :  { %3266 = vpow2.f32 %v2768_v33  ;;  %v1484_v33 = vld [vmem:[#allocation2 + $0xc] sm:$0x1] }
0x18e9   :  { %v3267_v34 = vpop.eup %3266 }
0x18ea   :  { %v1246_v35 = vadd.f32 1.0, %v3267_v34 }
0x18ec   :  { %3268 = vrcp.f32 %v1246_v35 }
0x18f9   :  { %v3269_v36 = vpop.eup %3268 }
0x18fa   :  { %v1261_v42 = vsub.f32 1.0, %v3269_v36  ;;  %v1267_v44 = vmul.f32 %v3269_v36, %v1163_v26  ;;  %v3338_v26 = vld [vmem:[#allocation12 + $0x18] sm:$0xff] }
0x194c   :  { %v1252_v37 = vpop.permute.xlu1 %1251 }
0x194d   :  { %v1254_v38 = vmul.f32 %v3269_v36, %v1252_v37 }
0x194f   :  { %1256 = vrot.lane.b32.xlu0 %v1254_v38, %s3490_s19 }
0x19c1   :  { %v1257_v39 = vpop.permute.xlu0 %1256 }
0x19c2   :  { %v1259_v40 = vadd.f32 %v1257_v39, %v1169_v31 }
0x19c4   :  { %3270 = vtanh.f32 %v1259_v40 }
0x19d1   :  { %v3271_v41 = vpop.eup %3270 }
0x19d2   :  { %1263 = vrot.lane.b32.xlu1 %v3271_v41, %s3491_s3 }
0x1a44   :  { %v1264_v43 = vpop.permute.xlu1 %1263 }
0x1a45   :  { %v1266_v45 = vmul.f32 %v1264_v43, %v1261_v42 }
0x1a47   :  { %v1268_v46 = vadd.f32 %v1267_v44, %v1266_v45 }
0x1a49   :  { %1270 = vrot.lane.b32.xlu0 %v1268_v46, %s3491_s3 }
0x1abb   :  { %v1271_v47 = vpop.permute.xlu0 %1270 }
0x1abc   :  { %1273 = vst.msk [vmem:[#allocation3 + $0x9] sm:$0x1] %vm327_vm3, %v1271_v47  ;;  %3067 = vmatmul.mubr.msk.f32.vlgmr.msra.gmra.mxu0 %vm214_vm4, %v1271_v47 }
0x1abd   :  { %3081 = vmatpush3.msra.mxu0 %v3587_v2  ;;  %3088 = vmatprep.mubr.msk.f32.mxu0 %vm3489_vm0, %v3488_v0 }
0x1abe   :  { %3082 = vmatprep.subr.mxu0 %v3488_v0 }
0x1abf   :  { %3083 = vmatpush3.msra.mxu0 %v3590_v4 }
0x1ac0   :  { %3084 = vmatprep.subr.mxu0 %v3488_v0 }
0x1ac1   :  { %3085 = vmatpush3.msra.mxu0 %v3593_v6 }
0x1ac2   :  { %3086 = vmatprep.subr.mxu0 %v3488_v0 }
0x1ac3   :  { %3087 = vmatpush3.msra.mxu0 %v3597_v8 }
0x1ac4   :  { %3102 = vmatprep.subr.mxu0 %v3488_v0 }
0x1b7c   :  { %v1343_v48 = vpop.f32.mrf.mxu0 }
0x1b7d   :  { %v1354_v49 = vadd.f32 %v1343_v48, %v3631_v16  ;;  %v1347_v52 = vadd.f32 %v1343_v48, %v1274_v51 }
0x1b7e   :  { %v3068_v50 = vpop.f32.mrf.mxu0 }
0x1b7f   :  { %1356 = vrot.lane.b32.xlu1 %v1354_v49, %s3490_s19  ;;  %v2770_v53 = vmul.f32 -1.442695, %v1347_v52 }
0x1b81   :  { %3272 = vpow2.f32 %v2770_v53  ;;  %v1589_v53 = vld [vmem:[#allocation2 + $0xd] sm:$0x1] }
0x1b8e   :  { %v3273_v54 = vpop.eup %3272 }
0x1b8f   :  { %v1351_v55 = vadd.f32 1.0, %v3273_v54 }
0x1b91   :  { %3274 = vrcp.f32 %v1351_v55 }
0x1b9e   :  { %v3275_v56 = vpop.eup %3274 }
0x1b9f   :  { %v1366_v62 = vsub.f32 1.0, %v3275_v56  ;;  %v1372_v1 = vmul.f32 %v3275_v56, %v1268_v46 }
0x1bf1   :  { %v1357_v57 = vpop.permute.xlu1 %1356 }
0x1bf2   :  { %v1359_v58 = vmul.f32 %v3275_v56, %v1357_v57 }
0x1bf4   :  { %1361 = vrot.lane.b32.xlu0 %v1359_v58, %s3490_s19 }
0x1c66   :  { %v1362_v59 = vpop.permute.xlu0 %1361 }
0x1c67   :  { %v1364_v60 = vadd.f32 %v1362_v59, %v1274_v51 }
0x1c69   :  { %3276 = vtanh.f32 %v1364_v60 }
0x1c76   :  { %v3277_v61 = vpop.eup %3276 }
0x1c77   :  { %1368 = vrot.lane.b32.xlu1 %v3277_v61, %s3491_s3 }
0x1ce9   :  { %v1369_v63 = vpop.permute.xlu1 %1368 }
0x1cea   :  { %v1371_v3 = vmul.f32 %v1369_v63, %v1366_v62 }
0x1cec   :  { %v1373_v5 = vadd.f32 %v1372_v1, %v1371_v3 }
0x1cee   :  { %1375 = vrot.lane.b32.xlu0 %v1373_v5, %s3491_s3 }
0x1d60   :  { %v1376_v7 = vpop.permute.xlu0 %1375 }
0x1d61   :  { %1378 = vst.msk [vmem:[#allocation3 + $0xa] sm:$0x1] %vm327_vm3, %v1376_v7  ;;  %3078 = vmatmul.mubr.msk.f32.vlgmr.msra.gmra.mxu1 %vm214_vm4, %v1376_v7 }
0x1d62   :  { %3092 = vmatpush3.msra.mxu1 %v3587_v2  ;;  %3099 = vmatprep.mubr.msk.f32.mxu1 %vm3489_vm0, %v3488_v0 }
0x1d63   :  { %3093 = vmatprep.subr.mxu1 %v3488_v0 }
0x1d64   :  { %3094 = vmatpush3.msra.mxu1 %v3590_v4 }
0x1d65   :  { %3095 = vmatprep.subr.mxu1 %v3488_v0 }
0x1d66   :  { %3096 = vmatpush3.msra.mxu1 %v3593_v6 }
0x1d67   :  { %3097 = vmatprep.subr.mxu1 %v3488_v0 }
0x1d68   :  { %3098 = vmatpush3.msra.mxu1 %v3597_v8 }
0x1d69   :  { %3113 = vmatprep.subr.mxu1 %v3488_v0 }
0x1e21   :  { %v1448_v9 = vpop.f32.mrf.mxu1 }
0x1e22   :  { %v1459_v2 = vadd.f32 %v1448_v9, %v3631_v16  ;;  %v1452_v12 = vadd.f32 %v1448_v9, %v1379_v11 }
0x1e23   :  { %v3079_v10 = vpop.f32.mrf.mxu1 }
0x1e24   :  { %1461 = vrot.lane.b32.xlu1 %v1459_v2, %s3490_s19  ;;  %v2772_v13 = vmul.f32 -1.442695, %v1452_v12 }
0x1e26   :  { %3278 = vpow2.f32 %v2772_v13  ;;  %v1694_v13 = vld [vmem:[#allocation2 + $0xe] sm:$0x1] }
0x1e33   :  { %v3279_v4 = vpop.eup %3278 }
0x1e34   :  { %v1456_v14 = vadd.f32 1.0, %v3279_v4 }
0x1e36   :  { %3280 = vrcp.f32 %v1456_v14 }
0x1e43   :  { %v3281_v6 = vpop.eup %3280 }
0x1e44   :  { %v1471_v20 = vsub.f32 1.0, %v3281_v6  ;;  %v1477_v22 = vmul.f32 %v3281_v6, %v1373_v5 }
0x1e96   :  { %v1462_v15 = vpop.permute.xlu1 %1461 }
0x1e97   :  { %v1464_v17 = vmul.f32 %v3281_v6, %v1462_v15 }
0x1e99   :  { %1466 = vrot.lane.b32.xlu0 %v1464_v17, %s3490_s19 }
0x1f0b   :  { %v1467_v8 = vpop.permute.xlu0 %1466 }
0x1f0c   :  { %v1469_v18 = vadd.f32 %v1467_v8, %v1379_v11 }
0x1f0e   :  { %3282 = vtanh.f32 %v1469_v18 }
0x1f1b   :  { %v3283_v19 = vpop.eup %3282 }
0x1f1c   :  { %1473 = vrot.lane.b32.xlu1 %v3283_v19, %s3491_s3 }
0x1f8e   :  { %v1474_v21 = vpop.permute.xlu1 %1473 }
0x1f8f   :  { %v1476_v23 = vmul.f32 %v1474_v21, %v1471_v20 }
0x1f91   :  { %v1478_v24 = vadd.f32 %v1477_v22, %v1476_v23 }
0x1f93   :  { %1480 = vrot.lane.b32.xlu0 %v1478_v24, %s3491_s3 }
0x2005   :  { %v1481_v25 = vpop.permute.xlu0 %1480 }
0x2006   :  { %1483 = vst.msk [vmem:[#allocation3 + $0xb] sm:$0x1] %vm327_vm3, %v1481_v25  ;;  %3089 = vmatmul.mubr.msk.f32.vlgmr.msra.gmra.mxu0 %vm214_vm4, %v1481_v25 }
0x2007   :  { %3103 = vmatpush3.msra.mxu0 %v3338_v26  ;;  %3110 = vmatprep.mubr.msk.f32.mxu0 %vm3489_vm0, %v3488_v0 }
0x2008   :  { %3104 = vmatprep.subr.mxu0 %v3488_v0 }
0x2009   :  { %3105 = vmatpush3.msra.mxu0 %v3339_v27 }
0x200a   :  { %3106 = vmatprep.subr.mxu0 %v3488_v0 }
0x200b   :  { %3107 = vmatpush3.msra.mxu0 %v3340_v28 }
0x200c   :  { %3108 = vmatprep.subr.mxu0 %v3488_v0 }
0x200d   :  { %3109 = vmatpush3.msra.mxu0 %v3341_v29 }
0x20c6   :  { %v1553_v30 = vpop.f32.mrf.mxu0 }
0x20c7   :  { %v1564_v31 = vadd.f32 %v1553_v30, %v3631_v16  ;;  %v1557_v34 = vadd.f32 %v1553_v30, %v1484_v33 }
0x20c8   :  { %v3090_v32 = vpop.f32.mrf.mxu0 }
0x20c9   :  { %1566 = vrot.lane.b32.xlu1 %v1564_v31, %s3490_s19  ;;  %v2774_v35 = vmul.f32 -1.442695, %v1557_v34  ;;  %v1799_v31 = vld [vmem:[#allocation2 + $0xf] sm:$0x1] }
0x20cb   :  { %3284 = vpow2.f32 %v2774_v35 }
0x20d8   :  { %v3285_v36 = vpop.eup %3284 }
0x20d9   :  { %v1561_v37 = vadd.f32 1.0, %v3285_v36 }
0x20db   :  { %3286 = vrcp.f32 %v1561_v37 }
0x20e8   :  { %v3287_v38 = vpop.eup %3286 }
0x20e9   :  { %v1576_v44 = vsub.f32 1.0, %v3287_v38  ;;  %v1582_v46 = vmul.f32 %v3287_v38, %v1478_v24 }
0x213b   :  { %v1567_v39 = vpop.permute.xlu1 %1566 }
0x213c   :  { %v1569_v40 = vmul.f32 %v3287_v38, %v1567_v39 }
0x213e   :  { %1571 = vrot.lane.b32.xlu0 %v1569_v40, %s3490_s19 }
0x21b0   :  { %v1572_v41 = vpop.permute.xlu0 %1571 }
0x21b1   :  { %v1574_v42 = vadd.f32 %v1572_v41, %v1484_v33 }
0x21b3   :  { %3288 = vtanh.f32 %v1574_v42 }
0x21c0   :  { %v3289_v43 = vpop.eup %3288 }
0x21c1   :  { %1578 = vrot.lane.b32.xlu1 %v3289_v43, %s3491_s3 }
0x2233   :  { %v1579_v45 = vpop.permute.xlu1 %1578 }
0x2234   :  { %v1581_v47 = vmul.f32 %v1579_v45, %v1576_v44 }
0x2236   :  { %v1583_v48 = vadd.f32 %v1582_v46, %v1581_v47  ;;  %v3868_v46 = vld [vmem:[#allocation3] sm:$0xff]  ;;  %v1906_v47 = vlaneseq }
0x2238   :  { %1585 = vrot.lane.b32.xlu0 %v1583_v48, %s3491_s3 }
0x22aa   :  { %v1586_v49 = vpop.permute.xlu0 %1585 }
0x22ab   :  { %1588 = vst.msk [vmem:[#allocation3 + $0xc] sm:$0x1] %vm327_vm3, %v1586_v49  ;;  %3100 = vmatmul.mubr.msk.f32.vlgmr.msra.gmra.mxu1 %vm214_vm4, %v1586_v49  ;;  %v3871_v49 = vand.u32 127, %v1906_v47 }
0x22ac   :  { %3114 = vmatpush3.msra.mxu1 %v3338_v26  ;;  %3121 = vmatprep.mubr.msk.f32.mxu1 %vm3489_vm0, %v3488_v0 }
0x22ad   :  { %3115 = vmatprep.subr.mxu1 %v3488_v0 }
0x22ae   :  { %3116 = vmatpush3.msra.mxu1 %v3339_v27 }
0x22af   :  { %3117 = vmatprep.subr.mxu1 %v3488_v0 }
0x22b0   :  { %3118 = vmatpush3.msra.mxu1 %v3340_v28 }
0x22b1   :  { %3119 = vmatprep.subr.mxu1 %v3488_v0 }
0x22b2   :  { %3120 = vmatpush3.msra.mxu1 %v3341_v29 }
0x236b   :  { %v1658_v50 = vpop.f32.mrf.mxu1 }
0x236c   :  { %v1669_v51 = vadd.f32 %v1658_v50, %v3631_v16  ;;  %v1662_v54 = vadd.f32 %v1658_v50, %v1589_v53 }
0x236d   :  { %v3101_v52 = vpop.f32.mrf.mxu1 }
0x236e   :  { %1671 = vrot.lane.b32.xlu1 %v1669_v51, %s3490_s19  ;;  %v2776_v55 = vmul.f32 -1.442695, %v1662_v54 }
0x2370   :  { %3290 = vpow2.f32 %v2776_v55 }
0x237d   :  { %v3291_v56 = vpop.eup %3290 }
0x237e   :  { %v1666_v57 = vadd.f32 1.0, %v3291_v56 }
0x2380   :  { %3292 = vrcp.f32 %v1666_v57 }
0x238d   :  { %v3293_v58 = vpop.eup %3292 }
0x238e   :  { %v1681_v1 = vsub.f32 1.0, %v3293_v58  ;;  %v1687_v5 = vmul.f32 %v3293_v58, %v1583_v48  ;;  %v1907_v48 = vshrl.u32 %v1906_v47, 7 }
0x2390   :  { %v1911_v50 = vadd.s32 %v3871_v49, %v1907_v48  ;;  %v1908_v54 = vadd.s32 8, %v1907_v48 }
0x2392   :  { %vm1913_vm5 = vcmp.eq.s32.totalorder %v1911_v50, 15  ;;  %v1912_v55 = vadd.s32 %v3871_v49, %v1908_v54 }
0x2393   :  { %v1915_v51 = vsel %vm1913_vm5, 1.0, %v3488_v0 }
0x2394   :  { %vm1914_vm7 = vcmp.eq.s32.totalorder %v1912_v55, 15 }
0x23e0   :  { %v1672_v59 = vpop.permute.xlu1 %1671 }
0x23e1   :  { %v1674_v60 = vmul.f32 %v3293_v58, %v1672_v59  ;;  %v1916_v58 = vsel %vm1914_vm7, 1.0, %v3488_v0  ;;  %v2020_v59 = vld [vmem:[#allocation13 + $0x18] sm:$0xff] }
0x23e2   :  { %3131 = vmatprep.subr.mxu1 %v2020_v59 }
0x23e3   :  { %1676 = vrot.lane.b32.xlu0 %v1674_v60, %s3490_s19  ;;  %v3883_v60 = vld [vmem:[#allocation15 + $0x18] sm:$0xff] }
0x2455   :  { %v1677_v61 = vpop.permute.xlu0 %1676 }
0x2456   :  { %v1679_v62 = vadd.f32 %v1677_v61, %v1589_v53  ;;  %v2019_v61 = vld [vmem:[#allocation13 + $0x10] sm:$0xff] }
0x2458   :  { %3294 = vtanh.f32 %v1679_v62  ;;  %v3886_v62 = vld [vmem:[#allocation15 + $0x10] sm:$0xff] }
0x2465   :  { %v3295_v63 = vpop.eup %3294 }
0x2466   :  { %1683 = vrot.lane.b32.xlu1 %v3295_v63, %s3491_s3  ;;  %v2018_v63 = vld [vmem:[#allocation13 + $0x8] sm:$0xff] }
0x24d8   :  { %v1684_v3 = vpop.permute.xlu1 %1683 }
0x24d9   :  { %v1686_v7 = vmul.f32 %v1684_v3, %v1681_v1  ;;  %v3891_v1 = vld [vmem:[#allocation15 + $0x8] sm:$0xff]  ;;  %v2017_v3 = vld [vmem:[#allocation13] sm:$0xff] }
0x24db   :  { %v1688_v9 = vadd.f32 %v1687_v5, %v1686_v7  ;;  %v3895_v5 = vld [vmem:[#allocation15] sm:$0xff] }
0x24dd   :  { %1690 = vrot.lane.b32.xlu0 %v1688_v9, %s3491_s3 }
0x254f   :  { %v1691_v2 = vpop.permute.xlu0 %1690 }
0x2550   :  { %1693 = vst.msk [vmem:[#allocation3 + $0xd] sm:$0x1] %vm327_vm3, %v1691_v2  ;;  %3111 = vmatmul.mubr.msk.f32.vlgmr.msra.gmra.mxu0 %vm214_vm4, %v1691_v2  ;;  %v2789_v2 = vld [vmem:[%s4025_s9] ss:$0 sm:$0xff] }
0x2551   :  { %3128 = vmatprep.mubr.msk.f32.mxu0 %vm1925_vm6, %v1915_v51 }
0x2610   :  { %v1763_v10 = vpop.f32.mrf.mxu0 }
0x2611   :  { %v1774_v11 = vadd.f32 %v1763_v10, %v3631_v16  ;;  %v1767_v4 = vadd.f32 %v1763_v10, %v1694_v13 }
0x2612   :  { %v3112_v12 = vpop.f32.mrf.mxu0 }
0x2613   :  { %1776 = vrot.lane.b32.xlu1 %v1774_v11, %s3490_s19  ;;  %v2778_v14 = vmul.f32 -1.442695, %v1767_v4 }
0x2615   :  { %3296 = vpow2.f32 %v2778_v14 }
0x2622   :  { %v3297_v6 = vpop.eup %3296 }
0x2623   :  { %v1771_v15 = vadd.f32 1.0, %v3297_v6  ;;  %v2783_v6 = vld [vmem:[%s4023_s7] ss:$0 sm:$0xff]  ;;  %s3494_s7 = smov 32  }
0x2625   :  { %3298 = vrcp.f32 %v1771_v15 }
0x2632   :  { %v3299_v17 = vpop.eup %3298 }
0x2633   :  { %v1786_v22 = vsub.f32 1.0, %v3299_v17  ;;  %v1792_v24 = vmul.f32 %v3299_v17, %v1688_v9 }
0x2685   :  { %v1777_v8 = vpop.permute.xlu1 %1776 }
0x2686   :  { %v1779_v18 = vmul.f32 %v3299_v17, %v1777_v8 }
0x2688   :  { %1781 = vrot.lane.b32.xlu0 %v1779_v18, %s3490_s19 }
0x26fa   :  { %v1782_v19 = vpop.permute.xlu0 %1781 }
0x26fb   :  { %v1784_v20 = vadd.f32 %v1782_v19, %v1694_v13 }
0x26fd   :  { %3300 = vtanh.f32 %v1784_v20 }
0x270a   :  { %v3301_v21 = vpop.eup %3300 }
0x270b   :  { %1788 = vrot.lane.b32.xlu1 %v3301_v21, %s3491_s3 }
0x277d   :  { %v1789_v23 = vpop.permute.xlu1 %1788 }
0x277e   :  { %v1791_v25 = vmul.f32 %v1789_v23, %v1786_v22 }
0x2780   :  { %v1793_v26 = vadd.f32 %v1792_v24, %v1791_v25 }
0x2782   :  { %1795 = vrot.lane.b32.xlu0 %v1793_v26, %s3491_s3 }
0x27f4   :  { %v1796_v27 = vpop.permute.xlu0 %1795 }
0x27f5   :  { %1798 = vst.msk [vmem:[#allocation3 + $0xe] sm:$0x1] %vm327_vm3, %v1796_v27  ;;  %3122 = vmatmul.mubr.msk.f32.vlgmr.msra.gmra.mxu1 %vm214_vm4, %v1796_v27 }
0x27f6   :  { %3132 = vmatpush3.msra.mxu1 %v2020_v59 }
0x27f7   :  { %3133 = vmatprep.subr.mxu1 %v2019_v61 }
0x27f8   :  { %3134 = vmatpush3.msra.mxu1 %v2019_v61 }
0x27f9   :  { %3135 = vmatprep.subr.mxu1 %v2018_v63 }
0x27fa   :  { %3136 = vmatpush3.msra.mxu1 %v2018_v63 }
0x27fb   :  { %3137 = vmatprep.subr.mxu1 %v2017_v3 }
0x27fc   :  { %3138 = vmatpush3.msra.mxu1 %v2017_v3 }
0x27fd   :  { %3153 = vmatprep.subr.mxu1 %v3488_v0 }
0x28b5   :  { %v1868_v28 = vpop.f32.mrf.mxu1 }
0x28b6   :  { %v1879_v29 = vadd.f32 %v1868_v28, %v3631_v16  ;;  %v1872_v32 = vadd.f32 %v1868_v28, %v1799_v31 }
0x28b7   :  { %v3123_v30 = vpop.f32.mrf.mxu1 }
0x28b8   :  { %1881 = vrot.lane.b32.xlu1 %v1879_v29, %s3490_s19  ;;  %v2780_v33 = vmul.f32 -1.442695, %v1872_v32 }
0x28ba   :  { %3302 = vpow2.f32 %v2780_v33 }
0x28c7   :  { %v3303_v34 = vpop.eup %3302 }
0x28c8   :  { %v1876_v35 = vadd.f32 1.0, %v3303_v34 }
0x28ca   :  { %3304 = vrcp.f32 %v1876_v35 }
0x28d7   :  { %v3305_v36 = vpop.eup %3304 }
0x28d8   :  { %v1891_v16 = vsub.f32 1.0, %v3305_v36  ;;  %v1897_v43 = vmul.f32 %v3305_v36, %v1793_v26 }
0x292a   :  { %v1882_v37 = vpop.permute.xlu1 %1881 }
0x292b   :  { %v1884_v38 = vmul.f32 %v3305_v36, %v1882_v37 }
0x292d   :  { %1886 = vrot.lane.b32.xlu0 %v1884_v38, %s3490_s19 }
0x299f   :  { %v1887_v39 = vpop.permute.xlu0 %1886 }
0x29a0   :  { %v1889_v40 = vadd.f32 %v1887_v39, %v1799_v31 }
0x29a2   :  { %3306 = vtanh.f32 %v1889_v40 }
0x29af   :  { %v3307_v41 = vpop.eup %3306 }
0x29b0   :  { %1893 = vrot.lane.b32.xlu1 %v3307_v41, %s3491_s3 }
0x2a22   :  { %v1894_v42 = vpop.permute.xlu1 %1893 }
0x2a23   :  { %v1896_v44 = vmul.f32 %v1894_v42, %v1891_v16 }
0x2a25   :  { %v1898_v45 = vadd.f32 %v1897_v43, %v1896_v44 }
0x2a27   :  { %1900 = vrot.lane.b32.xlu0 %v1898_v45, %s3491_s3 }
0x2a2b   :  { %1919 = vrot.lane.b32.xlu0 %v3868_v46, %s3492_s0 }
0x2a99   :  { %v1901_v52 = vpop.permute.xlu0 %1900 }
0x2a9a   :  { %1903 = vst.msk [vmem:[#allocation3 + $0xf] sm:$0x1] %vm327_vm3, %v1901_v52 }
0x2a9d   :  { %v1920_v57 = vpop.permute.xlu0 %1919 }
0x2aa1   :  { %v1905_v53 = vld [vmem:[#allocation3 + $0x8] sm:$0xff] }
0x2aa2   :  { %1921 = vrot.lane.b32.xlu1 %v1905_v53, %s3492_s0 }
0x2b14   :  { %v1922_v56 = vpop.permute.xlu1 %1921 }
0x2b15   :  { %3124 = vmatprep.subr.mxu0 %v1922_v56 }
0x2b16   :  { %3125 = vmatpush3.msra.mxu0 %v1922_v56 }
0x2b17   :  { %3126 = vmatprep.subr.mxu0 %v1920_v57 }
0x2b18   :  { %3127 = vmatpush3.msra.mxu0 %v1920_v57 }
0x2b19   :  { %3129 = vmatmul.mubr.msk.f32.vlgmr.msra.gmra.mxu0 %vm1925_vm6, %v1916_v58  ;;  %3142 = vmatprep.subr.mxu0 %v3488_v0 }
0x2b1a   :  { %3150 = vmatprep.mubr.msk.f32.mxu0 %vm3489_vm0, %v3488_v0  ;;  %3143 = vmatpush3.msra.mxu0 %v3883_v60 }
0x2b1b   :  { %3144 = vmatprep.subr.mxu0 %v3488_v0 }
0x2b1c   :  { %3145 = vmatpush3.msra.mxu0 %v3886_v62 }
0x2b1d   :  { %3146 = vmatprep.subr.mxu0 %v3488_v0 }
0x2b1e   :  { %3147 = vmatpush3.msra.mxu0 %v3891_v1 }
0x2b1f   :  { %3148 = vmatprep.subr.mxu0 %v3488_v0 }
0x2b20   :  { %3149 = vmatpush3.msra.mxu0 %v3895_v5 }
0x2b21   :  { %3160 = vmatprep.subr.mxu0 %v3488_v0 }
0x2bd9   :  { %v3130_v7 = vpop.f32.mrf.mxu0 }
0x2bda   :  { %2011 = vrot.lane.b32.xlu1 %v3130_v7, %s3493_s21 }
0x2bdb   :  { %v1998_v9 = vpop.f32.mrf.mxu0 }
0x2bdc   :  { %2009 = vrot.lane.b32.xlu0 %v1998_v9, %s3493_s21 }
0x2bde   :  { %2205 = vrot.lane.b32.xlu1 %v2789_v2, %s3490_s19 }
0x2c4c   :  { %v2012_v10 = vpop.permute.xlu1 %2011 }
0x2c4d   :  { %v3905_v11 = vsel %vm1925_vm6, %v1905_v53, %v2012_v10 }
0x2c4e   :  { %v2120_v12 = vrot.slane %v3905_v11, 7  ;;  %v2010_v13 = vpop.permute.xlu0 %2009 }
0x2c4f   :  { %v3910_v4 = vsel %vm1925_vm6, %v3868_v46, %v2010_v13 }
0x2c50   :  { %3139 = vmatprep.mubr.msk.f32.mxu1 %vm214_vm4, %v3910_v4  ;;  %3151 = vmatmul.mubr.msk.f32.vlgmr.msra.gmra.mxu0 %vm214_vm4, %v2120_v12  ;;  %v3935_v14 = vpop.permute.xlu1 %2205 }
0x2c51   :  { %3140 = vmatmul.mubr.msk.f32.vlgmr.msra.gmra.mxu1 %vm214_vm4, %v3905_v11  ;;  %3161 = vmatpush3.msra.mxu0 %v3883_v60 }
0x2c52   :  { %3154 = vmatpush3.xpose.msk.msra.mxu1 %vm214_vm4, %v3905_v11  ;;  %3162 = vmatprep.subr.mxu0 %v3488_v0 }
0x2c53   :  { %3155 = vmatprep.subr.mxu1 %v3488_v0  ;;  %3163 = vmatpush3.msra.mxu0 %v3886_v62 }
0x2c54   :  { %3164 = vmatprep.subr.mxu0 %v3488_v0  ;;  %3157 = vmatprep.mubr.msk.f32.mxu1 %vm3489_vm0, %v3488_v0 }
0x2c55   :  { %3165 = vmatpush3.msra.mxu0 %v3891_v1  ;;  %3168 = vmatprep.mubr.msk.f32.mxu0 %vm3489_vm0, %v3488_v0 }
0x2c56   :  { %3156 = vmatpush3.xpose.msk.msra.mxu1 %vm214_vm4, %v3910_v4  ;;  %3166 = vmatprep.subr.mxu0 %v3488_v0 }
0x2c57   :  { %3167 = vmatpush3.msra.mxu0 %v3895_v5  ;;  %3171 = vmatprep.subr.mxu1 %v3488_v0 }
0x2c58   :  { %3178 = vmatprep.subr.mxu0 %v3488_v0 }
0x2d10   :  { %v2189_v15 = vpop.f32.mrf.mxu0 }
0x2d11   :  { %v2208_v17 = vadd.f32 %v3935_v14, %v2189_v15  ;;  %v3141_v8 = vpop.f32.mrf.mxu1 }
0x2d12   :  { %v2106_v18 = vadd.f32 %v3141_v8, %v2783_v6  ;;  %v3152_v19 = vpop.f32.mrf.mxu0 }
0x2d13   :  { %v2100_v20 = vpop.f32.mrf.mxu1  ;;  %2210 = vrot.lane.b32.xlu0 %v2208_v17, %s3490_s19 }
0x2d14   :  { %2110 = vst.msk [vmem:[#allocation4 + $0x8] sm:$0xff] %vm205_vm2, %v2106_v18  ;;  %v2101_v21 = vadd.f32 %v2783_v6, %v2100_v20 }
0x2d16   :  { %2109 = vst.msk [vmem:[#allocation4] sm:$0xff] %vm205_vm2, %v2101_v21 }
0x2d1d   :  { %v2119_v22 = vld [vmem:[%s2118_s26] sm:$0x1] }
0x2d1e   :  { %v2193_v23 = vadd.f32 %v2189_v15, %v2119_v22  ;;  %v2332_v44 = vld [vmem:[%s2331_s28] sm:$0x1]  ;;  %v2306_v15 = vstv %s3944_s25 }
0x2d1f   :  { %v2529_v7 = vld [vmem:[%s2528_s30] sm:$0x1]  ;;  %vm2307_vm8 = vcmp.ge.s32.totalorder %v3871_v49, %v2306_v15 }
0x2d20   :  { %v2788_v24 = vmul.f32 -1.442695, %v2193_v23 }
0x2d22   :  { %3308 = vpow2.f32 %v2788_v24 }
0x2d2f   :  { %v3309_v25 = vpop.eup %3308 }
0x2d30   :  { %v2197_v26 = vadd.f32 1.0, %v3309_v25  ;;  %v2322_v25 = vstv %s3971_s27 }
0x2d31   :  { %vm2505_vm10 = vcmp.ge.s32.totalorder %v3871_v49, %v2322_v25  ;;  %vm2323_vm12 = vcmp.eq.s32.totalorder %v3871_v49, %v2322_v25 }
0x2d32   :  { %3310 = vrcp.f32 %v2197_v26 }
0x2d3f   :  { %v3311_v27 = vpop.eup %3310 }
0x2d40   :  { %v2220_v34 = vsub.f32 1.0, %v3311_v27 }
0x2d85   :  { %v2211_v28 = vpop.permute.xlu0 %2210 }
0x2d86   :  { %v2213_v29 = vmul.f32 %v3311_v27, %v2211_v28 }
0x2d88   :  { %2215 = vrot.lane.b32.xlu1 %v2213_v29, %s3490_s19 }
0x2d8c   :  { %2226 = vrot.lane.b32.xlu1 %v2120_v12, %s3494_s7 }
0x2dfa   :  { %v2216_v30 = vpop.permute.xlu1 %2215 }
0x2dfb   :  { %v2218_v31 = vadd.f32 %v2216_v30, %v2119_v22 }
0x2dfd   :  { %3312 = vtanh.f32 %v2218_v31 }
0x2dfe   :  { %v2227_v33 = vpop.permute.xlu1 %2226 }
0x2dff   :  { %v2229_v36 = vmul.f32 %v3311_v27, %v2227_v33 }
0x2e0a   :  { %v3313_v32 = vpop.eup %3312 }
0x2e0b   :  { %2222 = vrot.lane.b32.xlu0 %v3313_v32, %s3491_s3 }
0x2e7d   :  { %v2223_v35 = vpop.permute.xlu0 %2222 }
0x2e7e   :  { %v2225_v37 = vmul.f32 %v2223_v35, %v2220_v34 }
0x2e80   :  { %v2230_v38 = vadd.f32 %v2229_v36, %v2225_v37  ;;  %v2519_v37 = vstv %s3988_s29 }
0x2e81   :  { %vm2702_vm11 = vcmp.ge.s32.totalorder %v3871_v49, %v2519_v37  ;;  %vm2520_vm14 = vcmp.eq.s32.totalorder %v3871_v49, %v2519_v37 }
0x2e82   :  { %2232 = vrot.lane.b32.xlu0 %v2230_v38, %s3491_s3 }
0x2ef4   :  { %v2233_v39 = vpop.permute.xlu0 %2232 }
0x2ef5   :  { %3158 = vmatmul.mubr.msk.f32.vlgmr.msra.gmra.mxu1 %vm214_vm4, %v2233_v39  ;;  %3169 = vmatmul.mubr.msk.f32.vlgmr.msra.gmra.mxu0 %vm214_vm4, %v2233_v39 }
0x2ef6   :  { %3172 = vmatpush3.xpose.msk.msra.mxu1 %vm214_vm4, %v3905_v11  ;;  %3179 = vmatpush3.msra.mxu0 %v3883_v60 }
0x2ef7   :  { %3173 = vmatprep.subr.mxu1 %v3488_v0  ;;  %3180 = vmatprep.subr.mxu0 %v3488_v0 }
0x2ef8   :  { %3181 = vmatpush3.msra.mxu0 %v3886_v62  ;;  %3175 = vmatprep.mubr.msk.f32.mxu1 %vm3489_vm0, %v3488_v0 }
0x2ef9   :  { %3182 = vmatprep.subr.mxu0 %v3488_v0  ;;  %3186 = vmatprep.mubr.msk.f32.mxu0 %vm3489_vm0, %v3488_v0 }
0x2efa   :  { %3174 = vmatpush3.xpose.msk.msra.mxu1 %vm214_vm4, %v3910_v4  ;;  %3183 = vmatpush3.msra.mxu0 %v3891_v1 }
0x2efb   :  { %3184 = vmatprep.subr.mxu0 %v3488_v0  ;;  %3189 = vmatprep.subr.mxu1 %v3488_v0 }
0x2efc   :  { %3185 = vmatpush3.msra.mxu0 %v3895_v5 }
0x2fb5   :  { %v2302_v40 = vpop.f32.mrf.mxu1  ;;  %v2399_v41 = vpop.f32.mrf.mxu0 }
0x2fb6   :  { %v2410_v16 = vadd.f32 %v2399_v41, %v3935_v14  ;;  %v2403_v45 = vadd.f32 %v2399_v41, %v2332_v44  ;;  %v2303_v17 = vadd.f32 1e-06, %v2302_v40 }
0x2fb7   :  { %v3159_v42 = vpop.f32.mrf.mxu1  ;;  %v3170_v43 = vpop.f32.mrf.mxu0 }
0x2fb8   :  { %2412 = vrot.lane.b32.xlu1 %v2410_v16, %s3490_s19  ;;  %v2795_v46 = vmul.f32 -1.442695, %v2403_v45  ;;  %v2308_v8 = vsel %vm2307_vm8, %v2303_v17, -1e+30  ;;  %v2716_v43 = vstv %s2799_s2  ;;  %v2324_v45 = vsel %vm2323_vm12, %v2303_v17, 0.0 }
0x2fb9   :  { %v2310_v18 = vsel %vm2309_vm9, %v2308_v8, -inf  ;;  %vm2717_vm13 = vcmp.eq.s32.totalorder %v3871_v49, %v2716_v43 }
0x2fba   :  { %3314 = vpow2.f32 %v2795_v46  ;;  %v2325_v46 = vsel %vm2309_vm9, %v2324_v45, 0.0 }
0x2fc7   :  { %v3315_v47 = vpop.eup %3314 }
0x2fc8   :  { %v2407_v48 = vadd.f32 1.0, %v3315_v47 }
0x2fca   :  { %3316 = vrcp.f32 %v2407_v48 }
0x2fd7   :  { %v3317_v50 = vpop.eup %3316 }
0x2fd8   :  { %v2422_v56 = vsub.f32 1.0, %v3317_v50  ;;  %v2428_v58 = vmul.f32 %v3317_v50, %v2230_v38 }
0x302a   :  { %v2413_v51 = vpop.permute.xlu1 %2412 }
0x302b   :  { %v2415_v52 = vmul.f32 %v3317_v50, %v2413_v51 }
0x302d   :  { %2417 = vrot.lane.b32.xlu0 %v2415_v52, %s3490_s19 }
0x309f   :  { %v2418_v53 = vpop.permute.xlu0 %2417 }
0x30a0   :  { %v2420_v54 = vadd.f32 %v2418_v53, %v2332_v44 }
0x30a2   :  { %3318 = vtanh.f32 %v2420_v54 }
0x30af   :  { %v3319_v55 = vpop.eup %3318 }
0x30b0   :  { %2424 = vrot.lane.b32.xlu1 %v3319_v55, %s3491_s3 }
0x3122   :  { %v2425_v57 = vpop.permute.xlu1 %2424 }
0x3123   :  { %v2427_v59 = vmul.f32 %v2425_v57, %v2422_v56 }
0x3125   :  { %v2429_v60 = vadd.f32 %v2428_v58, %v2427_v59 }
0x3127   :  { %2431 = vrot.lane.b32.xlu0 %v2429_v60, %s3491_s3 }
0x3199   :  { %v2432_v61 = vpop.permute.xlu0 %2431 }
0x319a   :  { %3176 = vmatmul.mubr.msk.f32.vlgmr.msra.gmra.mxu1 %vm214_vm4, %v2432_v61  ;;  %3187 = vmatmul.mubr.msk.f32.vlgmr.msra.gmra.mxu0 %vm214_vm4, %v2432_v61 }
0x319b   :  { %3190 = vmatpush3.xpose.msk.msra.mxu1 %vm214_vm4, %v3905_v11  ;;  %3193 = vmatprep.mubr.msk.f32.mxu1 %vm3489_vm0, %v3488_v0 }
0x319c   :  { %3191 = vmatprep.subr.mxu1 %v3488_v0 }
0x319f   :  { %3192 = vmatpush3.xpose.msk.msra.mxu1 %vm214_vm4, %v3910_v4 }
0x325a   :  { %v2501_v62 = vpop.f32.mrf.mxu1  ;;  %v2596_v63 = vpop.f32.mrf.mxu0 }
0x325b   :  { %v2607_v1 = vadd.f32 %v2596_v63, %v3935_v14  ;;  %v2600_v9 = vadd.f32 %v2596_v63, %v2529_v7  ;;  %v2502_v24 = vadd.f32 1e-06, %v2501_v62 }
0x325c   :  { %v3177_v3 = vpop.f32.mrf.mxu1  ;;  %v3188_v5 = vpop.f32.mrf.mxu0 }
0x325d   :  { %2609 = vrot.lane.b32.xlu1 %v2607_v1, %s3490_s19  ;;  %v2801_v2 = vmul.f32 -1.442695, %v2600_v9  ;;  %v2506_v26 = vsel %vm2505_vm10, %v2502_v24, -1e+30  ;;  %v2521_v55 = vsel %vm2520_vm14, %v2502_v24, 0.0 }
0x325e   :  { %v2507_v27 = vsel %vm2309_vm9, %v2506_v26, -inf  ;;  %v2522_v56 = vsel %vm2309_vm9, %v2521_v55, 0.0 }
0x325f   :  { %3320 = vpow2.f32 %v2801_v2 }
0x326c   :  { %v3321_v0 = vpop.eup %3320 }
0x326d   :  { %v2604_v10 = vadd.f32 1.0, %v3321_v0 }
0x326f   :  { %3322 = vrcp.f32 %v2604_v10 }
0x327c   :  { %v3323_v11 = vpop.eup %3322 }
0x327d   :  { %v2619_v19 = vsub.f32 1.0, %v3323_v11  ;;  %v2625_v21 = vmul.f32 %v3323_v11, %v2429_v60 }
0x32cf   :  { %v2610_v12 = vpop.permute.xlu1 %2609 }
0x32d0   :  { %v2612_v13 = vmul.f32 %v3323_v11, %v2610_v12 }
0x32d2   :  { %2614 = vrot.lane.b32.xlu0 %v2612_v13, %s3490_s19 }
0x3344   :  { %v2615_v4 = vpop.permute.xlu0 %2614 }
0x3345   :  { %v2617_v14 = vadd.f32 %v2615_v4, %v2529_v7 }
0x3347   :  { %3324 = vtanh.f32 %v2617_v14 }
0x3354   :  { %v3325_v6 = vpop.eup %3324 }
0x3355   :  { %2621 = vrot.lane.b32.xlu1 %v3325_v6, %s3491_s3 }
0x3379   :  { %2311 = vmax.xlane.f32.xlu1 %v2310_v18 }
0x33c7   :  { %v2622_v20 = vpop.permute.xlu1 %2621 }
0x33c8   :  { %v2624_v22 = vmul.f32 %v2622_v20, %v2619_v19 }
0x33ca   :  { %v2626_v23 = vadd.f32 %v2625_v21, %v2624_v22 }
0x33cc   :  { %2628 = vrot.lane.b32.xlu0 %v2626_v23, %s3491_s3 }
0x33eb   :  { %2508 = vmax.xlane.f32.xlu0 %v2507_v27 }
0x3402   :  { %v2312_v28 = vpop.xlane.xlu1 %2311 }
0x3403   :  { %v2313_v29 = vsub.f32 %v2308_v8, %v2312_v28 }
0x3405   :  { %v2314_v30 = vmul.f32 1.442695, %v2313_v29 }
0x3407   :  { %3326 = vpow2.f32 %v2314_v30 }
0x3414   :  { %v3327_v31 = vpop.eup %3326 }
0x3415   :  { %v2316_v32 = vsel %vm2309_vm9, %v3327_v31, 0.0 }
0x3416   :  { %2317 = vadd.xlane.f32.xlu1 %v2316_v32 }
0x343e   :  { %v2629_v33 = vpop.permute.xlu0 %2628 }
0x343f   :  { %3194 = vmatmul.mubr.msk.f32.vlgmr.msra.gmra.mxu1 %vm214_vm4, %v2629_v33 }
0x3474   :  { %v2509_v34 = vpop.xlane.xlu0 %2508 }
0x3475   :  { %v2510_v35 = vsub.f32 %v2506_v26, %v2509_v34 }
0x3477   :  { %v2511_v36 = vmul.f32 1.442695, %v2510_v35 }
0x3479   :  { %3328 = vpow2.f32 %v2511_v36 }
0x3486   :  { %v3329_v42 = vpop.eup %3328 }
0x3487   :  { %v2513_v44 = vsel %vm2309_vm9, %v3329_v42, 0.0 }
0x349f   :  { %v2318_v58 = vpop.xlane.xlu1 %2317 }
0x34ff   :  { %v2698_v38 = vpop.f32.mrf.mxu1 }
0x3500   :  { %v2699_v39 = vadd.f32 1e-06, %v2698_v38 }
0x3501   :  { %v3195_v40 = vpop.f32.mrf.mxu1 }
0x3502   :  { %v2703_v41 = vsel %vm2702_vm11, %v2699_v39, -1e+30  ;;  %v2718_v47 = vsel %vm2717_vm13, %v2699_v39, 0.0 }
0x3503   :  { %v2704_v16 = vsel %vm2309_vm9, %v2703_v41, -inf  ;;  %v2719_v48 = vsel %vm2309_vm9, %v2718_v47, 0.0 }
0x3504   :  { %2705 = vmax.xlane.f32.xlu0 %v2704_v16 }
0x3508   :  { %2514 = vadd.xlane.f32.xlu0 %v2513_v44 }
0x350c   :  { %2326 = vadd.xlane.f32.xlu0 %v2325_v46 }
0x3510   :  { %2720 = vadd.xlane.f32.xlu0 %v2719_v48 }
0x358d   :  { %v2706_v50 = vpop.xlane.xlu0 %2705 }
0x358e   :  { %v2707_v51 = vsub.f32 %v2703_v41, %v2706_v50 }
0x3590   :  { %v2708_v52 = vmul.f32 1.442695, %v2707_v51 }
0x3591   :  { %v2515_v57 = vpop.xlane.xlu0 %2514 }
0x3592   :  { %3330 = vpow2.f32 %v2708_v52 }
0x3593   :  { %3332 = vlog2.f32 %v2515_v57 }
0x3594   :  { %3334 = vlog2.f32 %v2318_v58 }
0x3595   :  { %v2327_v1 = vpop.xlane.xlu0 %2326 }
0x3599   :  { %v2721_v11 = vpop.xlane.xlu0 %2720 }
0x359f   :  { %v3331_v53 = vpop.eup %3330 }
0x35a0   :  { %v2710_v54 = vsel %vm2309_vm9, %v3331_v53, 0.0  ;;  %v3333_v60 = vpop.eup %3332 }
0x35a1   :  { %2711 = vadd.xlane.f32.xlu1 %v2710_v54  ;;  %v3335_v61 = vpop.eup %3334  ;;  %v2517_v62 = vmul.f32 0.6931472, %v3333_v60 }
0x35a2   :  { %v2320_v63 = vmul.f32 0.6931472, %v3335_v61 }
0x35a3   :  { %v2518_v3 = vadd.f32 %v2517_v62, %v2509_v34 }
0x35a4   :  { %v2321_v7 = vadd.f32 %v2320_v63, %v2312_v28 }
0x35a5   :  { %2523 = vadd.xlane.f32.xlu1 %v2522_v56 }
0x35a6   :  { %v2328_v0 = vsub.f32 %v2321_v7, %v2327_v1 }
0x362a   :  { %v2712_v59 = vpop.xlane.xlu1 %2711 }
0x362b   :  { %3336 = vlog2.f32 %v2712_v59 }
0x362e   :  { %v2524_v49 = vpop.xlane.xlu1 %2523 }
0x362f   :  { %v2525_v2 = vsub.f32 %v2518_v3, %v2524_v49 }
0x3631   :  { %v2526_v13 = vadd.f32 %v2525_v2, %v2328_v0 }
0x3638   :  { %v3337_v5 = vpop.eup %3336 }
0x3639   :  { %v2714_v9 = vmul.f32 0.6931472, %v3337_v5 }
0x363b   :  { %v2715_v10 = vadd.f32 %v2714_v9, %v2706_v50 }
0x363d   :  { %v2722_v12 = vsub.f32 %v2715_v10, %v2721_v11 }
0x363f   :  { %v2723_v4 = vadd.f32 %v2722_v12, %v2526_v13 }
0x3641   :  { %2725 = vst.msk [vmem:[#allocation16] sm:$0x1] %vm2724_vm15, %v2723_v4 }
0x3642   :  { %3461 = shalt.err (!%p3458_p1)
}
0x3643   :  { %2735 = dma.vmem_to_hbm [thread:$0]  %s2733_s12, 16, %s4026_s10, [#allocation9]  }
0x3644   :  { %3478 = dma.done.wait [#allocation9], 16  }
0x3645   :  { %3479 = vsyncadd [#allocation9], 4294967280 }
0x3646   :  { %2739 = vsyncpa [#allocation8], 1 }
0x3647   :  { %2740 = vsyncpa [#allocation11], 1 }
0x3648   :  { %2741 = vsyncpa [#allocation14], 1 }
0x3649   :  { %2742 = vsyncpa [#allocation9], 1 }

</bundles_post_ra>
